<compile_context>
chip_gen: v7x
topology: tpu7x:2x2x1
jax: 0.10.0
libtpu: 0.0.40
codegen_flags: <defaults>
</compile_context>

<pallas_src>
import functools
import math

import jax
import jax.numpy as jnp
from jax.experimental import pallas as pl
from jax.experimental.pallas import tpu as pltpu


def _round_up(x, m):
    return ((x + m - 1) // m) * m


def _cdiv(a, b):
    return (a + b - 1) // b


def _pick_tile(L, t_max):
    """Row tile: round_up(L, 8) for short sequences, multiples of 128 for long ones."""
    if L <= 128:
        return _round_up(L, 8)
    t = min(t_max, _round_up(L, 128))
    return max(128, (t // 128) * 128)


def _vmem_limit_bytes():
    """Scoped-VMEM request derived from physical capacity (v7x 64 MiB -> ~48 MiB,
    v5e/v6e 128 MiB -> ~96 MiB), leaving headroom for compiler scratch / double buffers."""
    cap = 128 * 1024 * 1024
    try:
        cap = int(getattr(pltpu.get_tpu_info(), "vmem_capacity_bytes", cap))
    except Exception:
        pass
    return min((cap * 3) // 4, 100 * 1024 * 1024)


def _cols(x_rep, n):
    """First n lanes of a lane-replicated (rows, 128) array (broadcast if n > 128)."""
    if n == x_rep.shape[-1]:
        return x_rep
    if n < x_rep.shape[-1]:
        return x_rep[:, :n]
    return jnp.broadcast_to(x_rep[:, :1], (x_rep.shape[0], n))


# --------------------------------------------------------------------------------------
# Fused kernel: LN + Q proj (once per q-tile) -> streamed K/V proj + flash online-softmax
#               over the kv grid axis -> out proj + residual in finalize.
# --------------------------------------------------------------------------------------
def _pos_cross_attn_kernel(q_ref, qpos_ref, x_ref, mask_ref,
                           g_ref, beta_ref, wq_ref, bq_ref, wk_ref, bk_ref,
                           wv_ref, bv_ref, wo_ref, bo_ref,
                           o_ref,
                           qn_sc, q_sc, m_sc, l_sc, acc_sc,
                           *, scale, mask_keys, nhead, dh):
    ki = pl.program_id(2)

    @pl.when(ki == 0)
    def _init():
        # LayerNorm(q_embed), stash residual; Q = (qn + query_pos) @ Wq^T + bq, pre-scaled.
        x = q_ref[0].astype(jnp.float32)                                 # (tq, D)
        mu = jnp.mean(x, axis=-1, keepdims=True)
        xc = x - mu
        var = jnp.mean(xc * xc, axis=-1, keepdims=True)
        xn = xc * jax.lax.rsqrt(var + 1e-5)
        xn = xn * g_ref[...].astype(jnp.float32) + beta_ref[...].astype(jnp.float32)
        qn_sc[...] = xn
        q_in = (xn + qpos_ref[0].astype(jnp.float32)).astype(wq_ref.dtype)
        q = jnp.dot(q_in, wq_ref[...], preferred_element_type=jnp.float32)
        q_sc[...] = (q + bq_ref[...].astype(jnp.float32)) * scale
        m_sc[...] = jnp.full_like(m_sc, -jnp.inf)
        l_sc[...] = jnp.zeros_like(l_sc)
        acc_sc[...] = jnp.zeros_like(acc_sc)

    # K / V projection of this (bb_feat + pos) tile, fused in-kernel (no K/V HBM round trip).
    cdt = x_ref.dtype                                                    # MXU compute dtype
    x = x_ref[0].astype(wk_ref.dtype)                                    # (tk, D)
    k = jnp.dot(x, wk_ref[...], preferred_element_type=jnp.float32) \
        + bk_ref[...].astype(jnp.float32)                                # (tk, D) f32
    v = jnp.dot(x, wv_ref[...], preferred_element_type=jnp.float32) \
        + bv_ref[...].astype(jnp.float32)                                # (tk, D) f32

    q_all = q_sc[...]                                                    # (tq, D) f32
    tk = x.shape[0]

    ctx_parts, alpha_parts = [], []
    for h in range(nhead):                                               # static loop over heads
        sl = slice(h * dh, (h + 1) * dh)
        s = jax.lax.dot_general(q_all[:, sl].astype(cdt), k[:, sl].astype(cdt),
                                (((1,), (1,)), ((), ())),
                                preferred_element_type=jnp.float32)      # (tq, tk)
        if mask_keys:                                                    # static: only when keys padded
            s = s + mask_ref[0]                                          # additive mask row, no iota/select
        m_prev = m_sc[h]                                                 # (tq, 128) lane-replicated
        m_new = jnp.maximum(m_prev, jnp.max(s, axis=-1, keepdims=True))
        alpha = jnp.exp(m_prev - m_new)
        p = jnp.exp(s - _cols(m_new, tk))
        l_sc[h] = alpha * l_sc[h] + jnp.sum(p, axis=-1, keepdims=True)
        m_sc[h] = m_new
        ctx_parts.append(jnp.dot(p.astype(cdt), v[:, sl].astype(cdt),
                                 preferred_element_type=jnp.float32))    # (tq, dh)
        alpha_parts.append(_cols(alpha, dh))

    # single lane-dense accumulator update (one full-width store per kv step)
    acc_sc[...] = (jnp.concatenate(alpha_parts, axis=-1) * acc_sc[...]
                   + jnp.concatenate(ctx_parts, axis=-1))

    @pl.when(ki == pl.num_programs(2) - 1)
    def _finalize():
        inv_l = jnp.concatenate(
            [_cols(pl.reciprocal(l_sc[h], approx=True), dh) for h in range(nhead)], axis=-1)
        ctx = acc_sc[...] * inv_l                                        # (tq, D) f32
        out = qn_sc[...] + bo_ref[...].astype(jnp.float32) + jnp.dot(
            ctx.astype(wo_ref.dtype), wo_ref[...], preferred_element_type=jnp.float32)
        o_ref[0] = out.astype(o_ref.dtype)


# --------------------------------------------------------------------------------------
# Wrapper
# --------------------------------------------------------------------------------------
def position_cross_attention_layer(q_embed, bb_feat, params, *, nhead,
                                   query_pos=None, pos=None,
                                   tq_max=512, tk_max=512, kv_buffer_count=2):
    """q_embed: (Lq, B, D); bb_feat: (Lk, B, D). Returns (Lq, B, D)."""
    Lq, B, D = q_embed.shape
    Lk = bb_feat.shape[0]
    assert D % nhead == 0
    dh = D // nhead
    dtype = q_embed.dtype

    gamma, beta, wq_t, bq, wk_t, bk, wv_t, bv, wo_t, bo = params

    if query_pos is None:
        query_pos = jnp.zeros_like(q_embed)
    x_kv = bb_feat if pos is None else bb_feat + pos      # key/value positional add fused into relayout

    # --- tile selection: 128-aligned when long, /8 when short; ensure >=2 parallel units (v7x) ---
    tq = _pick_tile(Lq, tq_max)
    tk = _pick_tile(Lk, tk_max)
    if B * (_round_up(Lq, tq) // tq) < 2 and Lq >= 16:
        tq = _round_up(_cdiv(Lq, 2), 8)
    Lq_pad = _round_up(Lq, tq)
    Lk_pad = _round_up(Lk, tk)
    nq, nk = Lq_pad // tq, Lk_pad // tk

    def _bld(t, L, L_pad):                                 # (L, B, D) -> (B, L_pad, D)
        t = jnp.transpose(t, (1, 0, 2))
        if L_pad != L:
            t = jnp.pad(t, ((0, 0), (0, L_pad - L), (0, 0)))
        return t

    qb = _bld(q_embed, Lq, Lq_pad)
    qpb = _bld(query_pos, Lq, Lq_pad)
    xb = _bld(x_kv, Lk, Lk_pad)

    mask_keys = Lk_pad != Lk
    mask = jnp.where(jnp.arange(Lk_pad) < Lk, 0.0, -1e30).astype(jnp.float32).reshape(nk, 1, tk)

    g2, beta2 = gamma.reshape(1, D), beta.reshape(1, D)
    bq2, bk2, bv2, bo2 = (t.reshape(1, D) for t in (bq, bk, bv, bo))

    kernel = functools.partial(_pos_cross_attn_kernel, scale=1.0 / math.sqrt(dh),
                               mask_keys=mask_keys, nhead=nhead, dh=dh)

    const2 = lambda b, qi, ki: (0, 0)
    kv_kwargs = {} if kv_buffer_count == 2 else {"pipeline_mode": pl.Buffered(kv_buffer_count)}

    itemsize = jnp.dtype(dtype).itemsize
    cost = pl.CostEstimate(
        flops=int(2 * B * Lq_pad * D * D                   # Q projection
                  + 4 * B * nq * Lk_pad * D * D            # K, V projections (per q-tile)
                  + 4 * B * Lq_pad * Lk_pad * D            # QK^T + P.V over all heads
                  + 2 * B * Lq_pad * D * D),               # output projection
        transcendentals=int(B * nhead * Lq_pad * Lk_pad),
        bytes_accessed=int((2 * B * Lq_pad * D + B * nq * Lk_pad * D
                            + B * Lq_pad * D + 4 * D * D + 6 * D) * itemsize),
    )

    out_pad = pl.pallas_call(
        kernel,
        out_shape=jax.ShapeDtypeStruct((B, Lq_pad, D), dtype),
        grid_spec=pltpu.PrefetchScalarGridSpec(
            num_scalar_prefetch=0,
            grid=(B, nq, nk),
            in_specs=[
                pl.BlockSpec((1, tq, D), lambda b, qi, ki: (b, qi, 0)),           # q_embed
                pl.BlockSpec((1, tq, D), lambda b, qi, ki: (b, qi, 0)),           # query_pos
                pl.BlockSpec((1, tk, D), lambda b, qi, ki: (b, ki, 0), **kv_kwargs),  # bb_feat + pos
                pl.BlockSpec((1, 1, tk), lambda b, qi, ki: (ki, 0, 0)),           # additive key-pad mask
                pl.BlockSpec((1, D), const2),                                     # LN gamma
                pl.BlockSpec((1, D), const2),                                     # LN beta
                pl.BlockSpec((D, D), const2),                                     # Wq^T
                pl.BlockSpec((1, D), const2),                                     # bq
                pl.BlockSpec((D, D), const2),                                     # Wk^T
                pl.BlockSpec((1, D), const2),                                     # bk
                pl.BlockSpec((D, D), const2),                                     # Wv^T
                pl.BlockSpec((1, D), const2),                                     # bv
                pl.BlockSpec((D, D), const2),                                     # Wo^T
                pl.BlockSpec((1, D), const2),                                     # bo
            ],
            out_specs=pl.BlockSpec((1, tq, D), lambda b, qi, ki: (b, qi, 0)),
            scratch_shapes=[
                pltpu.VMEM((tq, D), jnp.float32),            # qn (LayerNorm output, residual source)
                pltpu.VMEM((tq, D), jnp.float32),            # Q  (projected, pre-scaled)
                pltpu.VMEM((nhead, tq, 128), jnp.float32),   # running max (lane-replicated)
                pltpu.VMEM((nhead, tq, 128), jnp.float32),   # running denominator (lane-replicated)
                pltpu.VMEM((tq, D), jnp.float32),            # running numerator (lane-dense)
            ],
        ),
        compiler_params=pltpu.CompilerParams(
            dimension_semantics=("parallel", "parallel", "arbitrary"),
            vmem_limit_bytes=_vmem_limit_bytes()),
        cost_estimate=cost,
    )(qb, qpb, xb, mask, g2, beta2, wq_t, bq2, wk_t, bk2, wv_t, bv2, wo_t, bo2)

    return jnp.transpose(out_pad[:, :Lq, :], (1, 0, 2))      # back to (Lq, B, D)


# --------------------------------------------------------------------------------------
# Parameters (xavier_uniform for every >1-D param as in _reset_parameters; biases randomized
# here just to exercise the bias paths) and a pure-JAX reference.
# --------------------------------------------------------------------------------------
def make_params(key, d_model, nhead, dtype=jnp.float32):
    ks = jax.random.split(key, 9)

    def xavier(k, shape):
        fan_out, fan_in = shape
        lim = math.sqrt(6.0 / (fan_in + fan_out))
        return jax.random.uniform(k, shape, dtype, minval=-lim, maxval=lim)

    wq = xavier(ks[0], (d_model, d_model))
    wk = xavier(ks[1], (d_model, d_model))
    wv = xavier(ks[2], (d_model, d_model))
    wo = xavier(ks[3], (d_model, d_model))
    small = lambda k: 0.02 * jax.random.normal(k, (d_model,), dtype)
    gamma = jnp.ones((d_model,), dtype)
    beta = small(ks[4])
    bq, bk, bv, bo = (small(k) for k in ks[5:9])
    # y = x @ W^T + b -> weights pre-transposed for the kernel.
    return (gamma, beta, wq.T, bq, wk.T, bk, wv.T, bv, wo.T, bo)


def position_cross_attention_layer_ref(q_embed, bb_feat, params, *, nhead, query_pos, pos):
    gamma, beta, wq_t, bq, wk_t, bk, wv_t, bv, wo_t, bo = params
    Lq, B, D = q_embed.shape
    Lk = bb_feat.shape[0]
    dh = D // nhead
    x = q_embed.astype(jnp.float32)
    mu = x.mean(-1, keepdims=True)
    var = ((x - mu) ** 2).mean(-1, keepdims=True)
    qn = (x - mu) * jax.lax.rsqrt(var + 1e-5) * gamma + beta
    q_in = qn + query_pos
    kv_in = bb_feat.astype(jnp.float32) + pos
    Q = jnp.dot(q_in, wq_t, precision='highest') + bq
    K = jnp.dot(kv_in, wk_t, precision='highest') + bk
    V = jnp.dot(kv_in, wv_t, precision='highest') + bv
    Qh = Q.reshape(Lq, B, nhead, dh)
    Kh = K.reshape(Lk, B, nhead, dh)
    Vh = V.reshape(Lk, B, nhead, dh)
    s = jnp.einsum('qbhd,kbhd->bhqk', Qh, Kh, precision='highest') / math.sqrt(dh)
    p = jax.nn.softmax(s, axis=-1)
    ctx = jnp.einsum('bhqk,kbhd->qbhd', p, Vh, precision='highest').reshape(Lq, B, D)
    attn = jnp.dot(ctx, wo_t, precision='highest') + bo
    return (qn + attn).astype(q_embed.dtype)


if __name__ == "__main__":
    d_model, nhead = 128, 4
    Lq, Lk, B = 16, 200, 2

    key = jax.random.PRNGKey(0)
    kq, kf, kqp, kp, kw = jax.random.split(key, 5)
    q_embed = jax.random.normal(kq, (Lq, B, d_model), jnp.float32)
    bb_feat = jax.random.normal(kf, (Lk, B, d_model), jnp.float32)
    query_pos = jax.random.normal(kqp, (Lq, B, d_model), jnp.float32)
    pos = jax.random.normal(kp, (Lk, B, d_model), jnp.float32)
    params = make_params(kw, d_model, nhead)

    # tk_max=128 so the demo exercises multi-tile K/V streaming + key-padding masking (Lk=200 -> 2 tiles).
    out = position_cross_attention_layer(q_embed, bb_feat, params, nhead=nhead,
                                         query_pos=query_pos, pos=pos,
                                         tq_max=512, tk_max=128)
    out = jax.block_until_ready(out)

    ref = position_cross_attention_layer_ref(q_embed, bb_feat, params, nhead=nhead,
                                             query_pos=query_pos, pos=pos)
    assert out.shape == (Lq, B, d_model)
    err = float(jnp.max(jnp.abs(out - ref)))
    # 5e-3 tolerance: approx (EUP) reciprocal in the softmax finalize + MXU accumulation order.
    assert jnp.allclose(out, ref, atol=5e-3, rtol=5e-3), f"mismatch vs reference, max abs err={err}"
    print("KERNEL_OK")
</pallas_src>

<mosaic_0001>
module attributes {stable_mosaic.version = 11 : i64} {
  func.func @_pos_cross_attn_kernel(%arg0: i32, %arg1: i32, %arg2: i32, %arg3: memref<1x16x128xf32, #tpu.memory_space<vmem>>, %arg4: memref<1x16x128xf32, #tpu.memory_space<vmem>>, %arg5: memref<1x128x128xf32, #tpu.memory_space<vmem>>, %arg6: memref<1x1x128xf32, #tpu.memory_space<vmem>>, %arg7: memref<1x128xf32, #tpu.memory_space<vmem>>, %arg8: memref<1x128xf32, #tpu.memory_space<vmem>>, %arg9: memref<128x128xf32, #tpu.memory_space<vmem>>, %arg10: memref<1x128xf32, #tpu.memory_space<vmem>>, %arg11: memref<128x128xf32, #tpu.memory_space<vmem>>, %arg12: memref<1x128xf32, #tpu.memory_space<vmem>>, %arg13: memref<128x128xf32, #tpu.memory_space<vmem>>, %arg14: memref<1x128xf32, #tpu.memory_space<vmem>>, %arg15: memref<128x128xf32, #tpu.memory_space<vmem>>, %arg16: memref<1x128xf32, #tpu.memory_space<vmem>>, %arg17: memref<1x16x128xf32, #tpu.memory_space<vmem>>, %arg18: memref<16x128xf32, #tpu.memory_space<vmem>>, %arg19: memref<16x128xf32, #tpu.memory_space<vmem>>, %arg20: memref<4x16x128xf32, #tpu.memory_space<vmem>>, %arg21: memref<4x16x128xf32, #tpu.memory_space<vmem>>, %arg22: memref<16x128xf32, #tpu.memory_space<vmem>>) attributes {dimension_semantics = [#tpu.dimension_semantics<parallel>, #tpu.dimension_semantics<parallel>, #tpu.dimension_semantics<arbitrary>], iteration_bounds = array<i64: 2, 1, 2>, scalar_prefetch = 0 : i64, scratch_operands = 5 : i64, tpu.core_type = #tpu.core_type<tc>, window_params = [{transform_indices = @transform_0, window_bounds = array<i64: 1, 16, 128>}, {transform_indices = @transform_1, window_bounds = array<i64: 1, 16, 128>}, {transform_indices = @transform_2, window_bounds = array<i64: 1, 128, 128>}, {transform_indices = @transform_3, window_bounds = array<i64: 1, 1, 128>}, {pipeline_mode = #tpu.pipeline_mode<synchronous>, transform_indices = @transform_4, window_bounds = array<i64: 1, 128>}, {pipeline_mode = #tpu.pipeline_mode<synchronous>, transform_indices = @transform_5, window_bounds = array<i64: 1, 128>}, {pipeline_mode = #tpu.pipeline_mode<synchronous>, transform_indices = @transform_6, window_bounds = array<i64: 128, 128>}, {pipeline_mode = #tpu.pipeline_mode<synchronous>, transform_indices = @transform_7, window_bounds = array<i64: 1, 128>}, {pipeline_mode = #tpu.pipeline_mode<synchronous>, transform_indices = @transform_8, window_bounds = array<i64: 128, 128>}, {pipeline_mode = #tpu.pipeline_mode<synchronous>, transform_indices = @transform_9, window_bounds = array<i64: 1, 128>}, {pipeline_mode = #tpu.pipeline_mode<synchronous>, transform_indices = @transform_10, window_bounds = array<i64: 128, 128>}, {pipeline_mode = #tpu.pipeline_mode<synchronous>, transform_indices = @transform_11, window_bounds = array<i64: 1, 128>}, {pipeline_mode = #tpu.pipeline_mode<synchronous>, transform_indices = @transform_12, window_bounds = array<i64: 128, 128>}, {pipeline_mode = #tpu.pipeline_mode<synchronous>, transform_indices = @transform_13, window_bounds = array<i64: 1, 128>}, {transform_indices = @transform_14, window_bounds = array<i64: 1, 16, 128>}]} {
    %c0_i32 = arith.constant 0 : i32
    %0 = arith.cmpi eq, %arg2, %c0_i32 : i32
    %1 = arith.extui %0 : i1 to i32
    %c0_i32_0 = arith.constant 0 : i32
    %2 = arith.cmpi ne, %1, %c0_i32_0 : i32
    scf.if %2 {
      %c0_92 = arith.constant 0 : index
      %c0_93 = arith.constant 0 : index
      %c0_94 = arith.constant 0 : index
      %157 = vector.load %arg3[%c0_92, %c0_93, %c0_94] : memref<1x16x128xf32, #tpu.memory_space<vmem>>, vector<1x16x128xf32>
      %158 = vector.shape_cast %157 : vector<1x16x128xf32> to vector<16x128xf32>
      %cst_95 = arith.constant dense<0.000000e+00> : vector<16xf32>
      %159 = vector.multi_reduction <add>, %158, %cst_95 [1] : vector<16x128xf32> to vector<16xf32>
      %160 = vector.shape_cast %159 : vector<16xf32> to vector<16x1xf32>
      %cst_96 = arith.constant 1.280000e+02 : f32
      %161 = vector.broadcast %cst_96 : f32 to vector<16x1xf32>
      %162 = arith.divf %160, %161 : vector<16x1xf32>
      %163 = vector.broadcast %162 : vector<16x1xf32> to vector<16x128xf32>
      %164 = arith.subf %158, %163 : vector<16x128xf32>
      %165 = arith.mulf %164, %164 : vector<16x128xf32>
      %cst_97 = arith.constant dense<0.000000e+00> : vector<16xf32>
      %166 = vector.multi_reduction <add>, %165, %cst_97 [1] : vector<16x128xf32> to vector<16xf32>
      %167 = vector.shape_cast %166 : vector<16xf32> to vector<16x1xf32>
      %cst_98 = arith.constant 1.280000e+02 : f32
      %168 = vector.broadcast %cst_98 : f32 to vector<16x1xf32>
      %169 = arith.divf %167, %168 : vector<16x1xf32>
      %cst_99 = arith.constant 9.99999974E-6 : f32
      %170 = vector.broadcast %cst_99 : f32 to vector<16x1xf32>
      %171 = arith.addf %169, %170 : vector<16x1xf32>
      %172 = math.rsqrt %171 : vector<16x1xf32>
      %173 = vector.broadcast %172 : vector<16x1xf32> to vector<16x128xf32>
      %174 = arith.mulf %164, %173 : vector<16x128xf32>
      %c0_100 = arith.constant 0 : index
      %c0_101 = arith.constant 0 : index
      %175 = vector.load %arg7[%c0_100, %c0_101] : memref<1x128xf32, #tpu.memory_space<vmem>>, vector<1x128xf32>
      %176 = vector.broadcast %175 : vector<1x128xf32> to vector<16x128xf32>
      %177 = arith.mulf %174, %176 : vector<16x128xf32>
      %c0_102 = arith.constant 0 : index
      %c0_103 = arith.constant 0 : index
      %178 = vector.load %arg8[%c0_102, %c0_103] : memref<1x128xf32, #tpu.memory_space<vmem>>, vector<1x128xf32>
      %179 = vector.broadcast %178 : vector<1x128xf32> to vector<16x128xf32>
      %180 = arith.addf %177, %179 : vector<16x128xf32>
      %c0_104 = arith.constant 0 : index
      %c0_105 = arith.constant 0 : index
      %181 = vector.load %arg18[%c0_104, %c0_105] : memref<16x128xf32, #tpu.memory_space<vmem>>, vector<16x128xf32>
      tpu.vector_store %arg18[%c0_104, %c0_105], %180 {strides = array<i32>} : memref<16x128xf32, #tpu.memory_space<vmem>>, vector<16x128xf32>,
      %c0_106 = arith.constant 0 : index
      %c0_107 = arith.constant 0 : index
      %c0_108 = arith.constant 0 : index
      %182 = vector.load %arg4[%c0_106, %c0_107, %c0_108] : memref<1x16x128xf32, #tpu.memory_space<vmem>>, vector<1x16x128xf32>
      %183 = vector.shape_cast %182 : vector<1x16x128xf32> to vector<16x128xf32>
      %184 = arith.addf %180, %183 : vector<16x128xf32>
      %c0_109 = arith.constant 0 : index
      %c0_110 = arith.constant 0 : index
      %185 = vector.load %arg9[%c0_109, %c0_110] : memref<128x128xf32, #tpu.memory_space<vmem>>, vector<128x128xf32>
      %cst_111 = arith.constant dense<0.000000e+00> : vector<16x128xf32>
      %186 = tpu.matmul %184, %185, %cst_111 {dimension_numbers = #tpu.dot_dimension_numbers<[1], [0], [0], [1], [0, 0, 1, 1], [], []>} : vector<16x128xf32>, vector<128x128xf32>, vector<16x128xf32> -> vector<16x128xf32>
      %c0_112 = arith.constant 0 : index
      %c0_113 = arith.constant 0 : index
      %187 = vector.load %arg10[%c0_112, %c0_113] : memref<1x128xf32, #tpu.memory_space<vmem>>, vector<1x128xf32>
      %188 = vector.broadcast %187 : vector<1x128xf32> to vector<16x128xf32>
      %189 = arith.addf %186, %188 : vector<16x128xf32>
      %cst_114 = arith.constant 0.176776692 : f32
      %190 = vector.broadcast %cst_114 : f32 to vector<16x128xf32>
      %191 = arith.mulf %189, %190 : vector<16x128xf32>
      %c0_115 = arith.constant 0 : index
      %c0_116 = arith.constant 0 : index
      %192 = vector.load %arg19[%c0_115, %c0_116] : memref<16x128xf32, #tpu.memory_space<vmem>>, vector<16x128xf32>
      tpu.vector_store %arg19[%c0_115, %c0_116], %191 {strides = array<i32>} : memref<16x128xf32, #tpu.memory_space<vmem>>, vector<16x128xf32>,
      %cst_117 = arith.constant 0xFF800000 : f32
      %193 = vector.broadcast %cst_117 : f32 to vector<4x16x128xf32>
      %c0_118 = arith.constant 0 : index
      %c0_119 = arith.constant 0 : index
      %c0_120 = arith.constant 0 : index
      %194 = vector.load %arg20[%c0_118, %c0_119, %c0_120] : memref<4x16x128xf32, #tpu.memory_space<vmem>>, vector<4x16x128xf32>
      tpu.vector_store %arg20[%c0_118, %c0_119, %c0_120], %193 {strides = array<i32>} : memref<4x16x128xf32, #tpu.memory_space<vmem>>, vector<4x16x128xf32>,
      %cst_121 = arith.constant 0.000000e+00 : f32
      %195 = vector.broadcast %cst_121 : f32 to vector<4x16x128xf32>
      %c0_122 = arith.constant 0 : index
      %c0_123 = arith.constant 0 : index
      %c0_124 = arith.constant 0 : index
      %196 = vector.load %arg21[%c0_122, %c0_123, %c0_124] : memref<4x16x128xf32, #tpu.memory_space<vmem>>, vector<4x16x128xf32>
      tpu.vector_store %arg21[%c0_122, %c0_123, %c0_124], %195 {strides = array<i32>} : memref<4x16x128xf32, #tpu.memory_space<vmem>>, vector<4x16x128xf32>,
      %cst_125 = arith.constant 0.000000e+00 : f32
      %197 = vector.broadcast %cst_125 : f32 to vector<16x128xf32>
      %c0_126 = arith.constant 0 : index
      %c0_127 = arith.constant 0 : index
      %198 = vector.load %arg22[%c0_126, %c0_127] : memref<16x128xf32, #tpu.memory_space<vmem>>, vector<16x128xf32>
      tpu.vector_store %arg22[%c0_126, %c0_127], %197 {strides = array<i32>} : memref<16x128xf32, #tpu.memory_space<vmem>>, vector<16x128xf32>,
    } else {
    }
    %c0 = arith.constant 0 : index
    %c0_1 = arith.constant 0 : index
    %c0_2 = arith.constant 0 : index
    %3 = vector.load %arg5[%c0, %c0_1, %c0_2] : memref<1x128x128xf32, #tpu.memory_space<vmem>>, vector<1x128x128xf32>
    %4 = vector.shape_cast %3 : vector<1x128x128xf32> to vector<128x128xf32>
    %c0_3 = arith.constant 0 : index
    %c0_4 = arith.constant 0 : index
    %5 = vector.load %arg11[%c0_3, %c0_4] : memref<128x128xf32, #tpu.memory_space<vmem>>, vector<128x128xf32>
    %cst = arith.constant dense<0.000000e+00> : vector<128x128xf32>
    %6 = tpu.matmul %4, %5, %cst {dimension_numbers = #tpu.dot_dimension_numbers<[1], [0], [0], [1], [0, 0, 1, 1], [], []>} : vector<128x128xf32>, vector<128x128xf32>, vector<128x128xf32> -> vector<128x128xf32>
    %c0_5 = arith.constant 0 : index
    %c0_6 = arith.constant 0 : index
    %7 = vector.load %arg12[%c0_5, %c0_6] : memref<1x128xf32, #tpu.memory_space<vmem>>, vector<1x128xf32>
    %8 = vector.broadcast %7 : vector<1x128xf32> to vector<128x128xf32>
    %9 = arith.addf %6, %8 : vector<128x128xf32>
    %c0_7 = arith.constant 0 : index
    %c0_8 = arith.constant 0 : index
    %10 = vector.load %arg13[%c0_7, %c0_8] : memref<128x128xf32, #tpu.memory_space<vmem>>, vector<128x128xf32>
    %cst_9 = arith.constant dense<0.000000e+00> : vector<128x128xf32>
    %11 = tpu.matmul %4, %10, %cst_9 {dimension_numbers = #tpu.dot_dimension_numbers<[1], [0], [0], [1], [0, 0, 1, 1], [], []>} : vector<128x128xf32>, vector<128x128xf32>, vector<128x128xf32> -> vector<128x128xf32>
    %c0_10 = arith.constant 0 : index
    %c0_11 = arith.constant 0 : index
    %12 = vector.load %arg14[%c0_10, %c0_11] : memref<1x128xf32, #tpu.memory_space<vmem>>, vector<1x128xf32>
    %13 = vector.broadcast %12 : vector<1x128xf32> to vector<128x128xf32>
    %14 = arith.addf %11, %13 : vector<128x128xf32>
    %c0_12 = arith.constant 0 : index
    %c0_13 = arith.constant 0 : index
    %15 = vector.load %arg19[%c0_12, %c0_13] : memref<16x128xf32, #tpu.memory_space<vmem>>, vector<16x128xf32>
    %16 = vector.extract_strided_slice %15 {offsets = [0, 0], sizes = [16, 32], strides = [1, 1]} : vector<16x128xf32> to vector<16x32xf32>
    %17 = vector.extract_strided_slice %9 {offsets = [0, 0], sizes = [128, 32], strides = [1, 1]} : vector<128x128xf32> to vector<128x32xf32>
    %cst_14 = arith.constant dense<0.000000e+00> : vector<16x128xf32>
    %18 = tpu.matmul %16, %17, %cst_14 {dimension_numbers = #tpu.dot_dimension_numbers<[1], [1], [0], [0], [0, 0, 1, 0], [], []>} : vector<16x32xf32>, vector<128x32xf32>, vector<16x128xf32> -> vector<16x128xf32>
    %c0_15 = arith.constant 0 : index
    %c0_16 = arith.constant 0 : index
    %c0_17 = arith.constant 0 : index
    %19 = vector.load %arg6[%c0_15, %c0_16, %c0_17] : memref<1x1x128xf32, #tpu.memory_space<vmem>>, vector<1x1x128xf32>
    %20 = vector.shape_cast %19 : vector<1x1x128xf32> to vector<1x128xf32>
    %21 = vector.broadcast %20 : vector<1x128xf32> to vector<16x128xf32>
    %22 = arith.addf %18, %21 : vector<16x128xf32>
    %c0_18 = arith.constant 0 : index
    %c0_19 = arith.constant 0 : index
    %c0_20 = arith.constant 0 : index
    %23 = vector.load %arg20[%c0_18, %c0_19, %c0_20] : memref<4x16x128xf32, #tpu.memory_space<vmem>>, vector<1x16x128xf32>
    %24 = vector.shape_cast %23 : vector<1x16x128xf32> to vector<16x128xf32>
    %cst_21 = arith.constant dense<0xFF800000> : vector<16xf32>
    %25 = vector.multi_reduction <maximumf>, %22, %cst_21 [1] : vector<16x128xf32> to vector<16xf32>
    %26 = vector.shape_cast %25 : vector<16xf32> to vector<16x1xf32>
    %27 = vector.broadcast %26 : vector<16x1xf32> to vector<16x128xf32>
    %28 = arith.maximumf %24, %27 : vector<16x128xf32>
    %29 = arith.subf %24, %28 : vector<16x128xf32>
    %30 = math.exp %29 : vector<16x128xf32>
    %31 = arith.subf %22, %28 : vector<16x128xf32>
    %32 = math.exp %31 : vector<16x128xf32>
    %c0_22 = arith.constant 0 : index
    %c0_23 = arith.constant 0 : index
    %c0_24 = arith.constant 0 : index
    %33 = vector.load %arg21[%c0_22, %c0_23, %c0_24] : memref<4x16x128xf32, #tpu.memory_space<vmem>>, vector<1x16x128xf32>
    %34 = vector.shape_cast %33 : vector<1x16x128xf32> to vector<16x128xf32>
    %35 = arith.mulf %30, %34 : vector<16x128xf32>
    %cst_25 = arith.constant dense<0.000000e+00> : vector<16xf32>
    %36 = vector.multi_reduction <add>, %32, %cst_25 [1] : vector<16x128xf32> to vector<16xf32>
    %37 = vector.shape_cast %36 : vector<16xf32> to vector<16x1xf32>
    %38 = vector.broadcast %37 : vector<16x1xf32> to vector<16x128xf32>
    %39 = arith.addf %35, %38 : vector<16x128xf32>
    %c0_26 = arith.constant 0 : index
    %c0_27 = arith.constant 0 : index
    %c0_28 = arith.constant 0 : index
    %40 = vector.load %arg21[%c0_26, %c0_27, %c0_28] : memref<4x16x128xf32, #tpu.memory_space<vmem>>, vector<1x16x128xf32>
    %41 = vector.shape_cast %40 : vector<1x16x128xf32> to vector<16x128xf32>
    %42 = vector.shape_cast %39 : vector<16x128xf32> to vector<1x16x128xf32>
    tpu.vector_store %arg21[%c0_26, %c0_27, %c0_28], %42 {strides = array<i32>} : memref<4x16x128xf32, #tpu.memory_space<vmem>>, vector<1x16x128xf32>,
    %c0_29 = arith.constant 0 : index
    %c0_30 = arith.constant 0 : index
    %c0_31 = arith.constant 0 : index
    %43 = vector.load %arg20[%c0_29, %c0_30, %c0_31] : memref<4x16x128xf32, #tpu.memory_space<vmem>>, vector<1x16x128xf32>
    %44 = vector.shape_cast %43 : vector<1x16x128xf32> to vector<16x128xf32>
    %45 = vector.shape_cast %28 : vector<16x128xf32> to vector<1x16x128xf32>
    tpu.vector_store %arg20[%c0_29, %c0_30, %c0_31], %45 {strides = array<i32>} : memref<4x16x128xf32, #tpu.memory_space<vmem>>, vector<1x16x128xf32>,
    %46 = vector.extract_strided_slice %14 {offsets = [0, 0], sizes = [128, 32], strides = [1, 1]} : vector<128x128xf32> to vector<128x32xf32>
    %cst_32 = arith.constant dense<0.000000e+00> : vector<16x32xf32>
    %47 = tpu.matmul %32, %46, %cst_32 {dimension_numbers = #tpu.dot_dimension_numbers<[1], [0], [0], [1], [0, 0, 1, 1], [], []>} : vector<16x128xf32>, vector<128x32xf32>, vector<16x32xf32> -> vector<16x32xf32>
    %48 = vector.extract_strided_slice %30 {offsets = [0, 0], sizes = [16, 32], strides = [1, 1]} : vector<16x128xf32> to vector<16x32xf32>
    %49 = vector.extract_strided_slice %15 {offsets = [0, 32], sizes = [16, 32], strides = [1, 1]} : vector<16x128xf32> to vector<16x32xf32>
    %50 = vector.extract_strided_slice %9 {offsets = [0, 32], sizes = [128, 32], strides = [1, 1]} : vector<128x128xf32> to vector<128x32xf32>
    %cst_33 = arith.constant dense<0.000000e+00> : vector<16x128xf32>
    %51 = tpu.matmul %49, %50, %cst_33 {dimension_numbers = #tpu.dot_dimension_numbers<[1], [1], [0], [0], [0, 0, 1, 0], [], []>} : vector<16x32xf32>, vector<128x32xf32>, vector<16x128xf32> -> vector<16x128xf32>
    %c0_34 = arith.constant 0 : index
    %c0_35 = arith.constant 0 : index
    %c0_36 = arith.constant 0 : index
    %52 = vector.load %arg6[%c0_34, %c0_35, %c0_36] : memref<1x1x128xf32, #tpu.memory_space<vmem>>, vector<1x1x128xf32>
    %53 = vector.shape_cast %52 : vector<1x1x128xf32> to vector<1x128xf32>
    %54 = vector.broadcast %53 : vector<1x128xf32> to vector<16x128xf32>
    %55 = arith.addf %51, %54 : vector<16x128xf32>
    %c1 = arith.constant 1 : index
    %c0_37 = arith.constant 0 : index
    %c0_38 = arith.constant 0 : index
    %56 = vector.load %arg20[%c1, %c0_37, %c0_38] : memref<4x16x128xf32, #tpu.memory_space<vmem>>, vector<1x16x128xf32>
    %57 = vector.shape_cast %56 : vector<1x16x128xf32> to vector<16x128xf32>
    %cst_39 = arith.constant dense<0xFF800000> : vector<16xf32>
    %58 = vector.multi_reduction <maximumf>, %55, %cst_39 [1] : vector<16x128xf32> to vector<16xf32>
    %59 = vector.shape_cast %58 : vector<16xf32> to vector<16x1xf32>
    %60 = vector.broadcast %59 : vector<16x1xf32> to vector<16x128xf32>
    %61 = arith.maximumf %57, %60 : vector<16x128xf32>
    %62 = arith.subf %57, %61 : vector<16x128xf32>
    %63 = math.exp %62 : vector<16x128xf32>
    %64 = arith.subf %55, %61 : vector<16x128xf32>
    %65 = math.exp %64 : vector<16x128xf32>
    %c1_40 = arith.constant 1 : index
    %c0_41 = arith.constant 0 : index
    %c0_42 = arith.constant 0 : index
    %66 = vector.load %arg21[%c1_40, %c0_41, %c0_42] : memref<4x16x128xf32, #tpu.memory_space<vmem>>, vector<1x16x128xf32>
    %67 = vector.shape_cast %66 : vector<1x16x128xf32> to vector<16x128xf32>
    %68 = arith.mulf %63, %67 : vector<16x128xf32>
    %cst_43 = arith.constant dense<0.000000e+00> : vector<16xf32>
    %69 = vector.multi_reduction <add>, %65, %cst_43 [1] : vector<16x128xf32> to vector<16xf32>
    %70 = vector.shape_cast %69 : vector<16xf32> to vector<16x1xf32>
    %71 = vector.broadcast %70 : vector<16x1xf32> to vector<16x128xf32>
    %72 = arith.addf %68, %71 : vector<16x128xf32>
    %c1_44 = arith.constant 1 : index
    %c0_45 = arith.constant 0 : index
    %c0_46 = arith.constant 0 : index
    %73 = vector.load %arg21[%c1_44, %c0_45, %c0_46] : memref<4x16x128xf32, #tpu.memory_space<vmem>>, vector<1x16x128xf32>
    %74 = vector.shape_cast %73 : vector<1x16x128xf32> to vector<16x128xf32>
    %75 = vector.shape_cast %72 : vector<16x128xf32> to vector<1x16x128xf32>
    tpu.vector_store %arg21[%c1_44, %c0_45, %c0_46], %75 {strides = array<i32>} : memref<4x16x128xf32, #tpu.memory_space<vmem>>, vector<1x16x128xf32>,
    %c1_47 = arith.constant 1 : index
    %c0_48 = arith.constant 0 : index
    %c0_49 = arith.constant 0 : index
    %76 = vector.load %arg20[%c1_47, %c0_48, %c0_49] : memref<4x16x128xf32, #tpu.memory_space<vmem>>, vector<1x16x128xf32>
    %77 = vector.shape_cast %76 : vector<1x16x128xf32> to vector<16x128xf32>
    %78 = vector.shape_cast %61 : vector<16x128xf32> to vector<1x16x128xf32>
    tpu.vector_store %arg20[%c1_47, %c0_48, %c0_49], %78 {strides = array<i32>} : memref<4x16x128xf32, #tpu.memory_space<vmem>>, vector<1x16x128xf32>,
    %79 = vector.extract_strided_slice %14 {offsets = [0, 32], sizes = [128, 32], strides = [1, 1]} : vector<128x128xf32> to vector<128x32xf32>
    %cst_50 = arith.constant dense<0.000000e+00> : vector<16x32xf32>
    %80 = tpu.matmul %65, %79, %cst_50 {dimension_numbers = #tpu.dot_dimension_numbers<[1], [0], [0], [1], [0, 0, 1, 1], [], []>} : vector<16x128xf32>, vector<128x32xf32>, vector<16x32xf32> -> vector<16x32xf32>
    %81 = vector.extract_strided_slice %63 {offsets = [0, 0], sizes = [16, 32], strides = [1, 1]} : vector<16x128xf32> to vector<16x32xf32>
    %82 = vector.extract_strided_slice %15 {offsets = [0, 64], sizes = [16, 32], strides = [1, 1]} : vector<16x128xf32> to vector<16x32xf32>
    %83 = vector.extract_strided_slice %9 {offsets = [0, 64], sizes = [128, 32], strides = [1, 1]} : vector<128x128xf32> to vector<128x32xf32>
    %cst_51 = arith.constant dense<0.000000e+00> : vector<16x128xf32>
    %84 = tpu.matmul %82, %83, %cst_51 {dimension_numbers = #tpu.dot_dimension_numbers<[1], [1], [0], [0], [0, 0, 1, 0], [], []>} : vector<16x32xf32>, vector<128x32xf32>, vector<16x128xf32> -> vector<16x128xf32>
    %c0_52 = arith.constant 0 : index
    %c0_53 = arith.constant 0 : index
    %c0_54 = arith.constant 0 : index
    %85 = vector.load %arg6[%c0_52, %c0_53, %c0_54] : memref<1x1x128xf32, #tpu.memory_space<vmem>>, vector<1x1x128xf32>
    %86 = vector.shape_cast %85 : vector<1x1x128xf32> to vector<1x128xf32>
    %87 = vector.broadcast %86 : vector<1x128xf32> to vector<16x128xf32>
    %88 = arith.addf %84, %87 : vector<16x128xf32>
    %c2 = arith.constant 2 : index
    %c0_55 = arith.constant 0 : index
    %c0_56 = arith.constant 0 : index
    %89 = vector.load %arg20[%c2, %c0_55, %c0_56] : memref<4x16x128xf32, #tpu.memory_space<vmem>>, vector<1x16x128xf32>
    %90 = vector.shape_cast %89 : vector<1x16x128xf32> to vector<16x128xf32>
    %cst_57 = arith.constant dense<0xFF800000> : vector<16xf32>
    %91 = vector.multi_reduction <maximumf>, %88, %cst_57 [1] : vector<16x128xf32> to vector<16xf32>
    %92 = vector.shape_cast %91 : vector<16xf32> to vector<16x1xf32>
    %93 = vector.broadcast %92 : vector<16x1xf32> to vector<16x128xf32>
    %94 = arith.maximumf %90, %93 : vector<16x128xf32>
    %95 = arith.subf %90, %94 : vector<16x128xf32>
    %96 = math.exp %95 : vector<16x128xf32>
    %97 = arith.subf %88, %94 : vector<16x128xf32>
    %98 = math.exp %97 : vector<16x128xf32>
    %c2_58 = arith.constant 2 : index
    %c0_59 = arith.constant 0 : index
    %c0_60 = arith.constant 0 : index
    %99 = vector.load %arg21[%c2_58, %c0_59, %c0_60] : memref<4x16x128xf32, #tpu.memory_space<vmem>>, vector<1x16x128xf32>
    %100 = vector.shape_cast %99 : vector<1x16x128xf32> to vector<16x128xf32>
    %101 = arith.mulf %96, %100 : vector<16x128xf32>
    %cst_61 = arith.constant dense<0.000000e+00> : vector<16xf32>
    %102 = vector.multi_reduction <add>, %98, %cst_61 [1] : vector<16x128xf32> to vector<16xf32>
    %103 = vector.shape_cast %102 : vector<16xf32> to vector<16x1xf32>
    %104 = vector.broadcast %103 : vector<16x1xf32> to vector<16x128xf32>
    %105 = arith.addf %101, %104 : vector<16x128xf32>
    %c2_62 = arith.constant 2 : index
    %c0_63 = arith.constant 0 : index
    %c0_64 = arith.constant 0 : index
    %106 = vector.load %arg21[%c2_62, %c0_63, %c0_64] : memref<4x16x128xf32, #tpu.memory_space<vmem>>, vector<1x16x128xf32>
    %107 = vector.shape_cast %106 : vector<1x16x128xf32> to vector<16x128xf32>
    %108 = vector.shape_cast %105 : vector<16x128xf32> to vector<1x16x128xf32>
    tpu.vector_store %arg21[%c2_62, %c0_63, %c0_64], %108 {strides = array<i32>} : memref<4x16x128xf32, #tpu.memory_space<vmem>>, vector<1x16x128xf32>,
    %c2_65 = arith.constant 2 : index
    %c0_66 = arith.constant 0 : index
    %c0_67 = arith.constant 0 : index
    %109 = vector.load %arg20[%c2_65, %c0_66, %c0_67] : memref<4x16x128xf32, #tpu.memory_space<vmem>>, vector<1x16x128xf32>
    %110 = vector.shape_cast %109 : vector<1x16x128xf32> to vector<16x128xf32>
    %111 = vector.shape_cast %94 : vector<16x128xf32> to vector<1x16x128xf32>
    tpu.vector_store %arg20[%c2_65, %c0_66, %c0_67], %111 {strides = array<i32>} : memref<4x16x128xf32, #tpu.memory_space<vmem>>, vector<1x16x128xf32>,
    %112 = vector.extract_strided_slice %14 {offsets = [0, 64], sizes = [128, 32], strides = [1, 1]} : vector<128x128xf32> to vector<128x32xf32>
    %cst_68 = arith.constant dense<0.000000e+00> : vector<16x32xf32>
    %113 = tpu.matmul %98, %112, %cst_68 {dimension_numbers = #tpu.dot_dimension_numbers<[1], [0], [0], [1], [0, 0, 1, 1], [], []>} : vector<16x128xf32>, vector<128x32xf32>, vector<16x32xf32> -> vector<16x32xf32>
    %114 = vector.extract_strided_slice %96 {offsets = [0, 0], sizes = [16, 32], strides = [1, 1]} : vector<16x128xf32> to vector<16x32xf32>
    %115 = vector.extract_strided_slice %15 {offsets = [0, 96], sizes = [16, 32], strides = [1, 1]} : vector<16x128xf32> to vector<16x32xf32>
    %116 = vector.extract_strided_slice %9 {offsets = [0, 96], sizes = [128, 32], strides = [1, 1]} : vector<128x128xf32> to vector<128x32xf32>
    %cst_69 = arith.constant dense<0.000000e+00> : vector<16x128xf32>
    %117 = tpu.matmul %115, %116, %cst_69 {dimension_numbers = #tpu.dot_dimension_numbers<[1], [1], [0], [0], [0, 0, 1, 0], [], []>} : vector<16x32xf32>, vector<128x32xf32>, vector<16x128xf32> -> vector<16x128xf32>
    %c0_70 = arith.constant 0 : index
    %c0_71 = arith.constant 0 : index
    %c0_72 = arith.constant 0 : index
    %118 = vector.load %arg6[%c0_70, %c0_71, %c0_72] : memref<1x1x128xf32, #tpu.memory_space<vmem>>, vector<1x1x128xf32>
    %119 = vector.shape_cast %118 : vector<1x1x128xf32> to vector<1x128xf32>
    %120 = vector.broadcast %119 : vector<1x128xf32> to vector<16x128xf32>
    %121 = arith.addf %117, %120 : vector<16x128xf32>
    %c3 = arith.constant 3 : index
    %c0_73 = arith.constant 0 : index
    %c0_74 = arith.constant 0 : index
    %122 = vector.load %arg20[%c3, %c0_73, %c0_74] : memref<4x16x128xf32, #tpu.memory_space<vmem>>, vector<1x16x128xf32>
    %123 = vector.shape_cast %122 : vector<1x16x128xf32> to vector<16x128xf32>
    %cst_75 = arith.constant dense<0xFF800000> : vector<16xf32>
    %124 = vector.multi_reduction <maximumf>, %121, %cst_75 [1] : vector<16x128xf32> to vector<16xf32>
    %125 = vector.shape_cast %124 : vector<16xf32> to vector<16x1xf32>
    %126 = vector.broadcast %125 : vector<16x1xf32> to vector<16x128xf32>
    %127 = arith.maximumf %123, %126 : vector<16x128xf32>
    %128 = arith.subf %123, %127 : vector<16x128xf32>
    %129 = math.exp %128 : vector<16x128xf32>
    %130 = arith.subf %121, %127 : vector<16x128xf32>
    %131 = math.exp %130 : vector<16x128xf32>
    %c3_76 = arith.constant 3 : index
    %c0_77 = arith.constant 0 : index
    %c0_78 = arith.constant 0 : index
    %132 = vector.load %arg21[%c3_76, %c0_77, %c0_78] : memref<4x16x128xf32, #tpu.memory_space<vmem>>, vector<1x16x128xf32>
    %133 = vector.shape_cast %132 : vector<1x16x128xf32> to vector<16x128xf32>
    %134 = arith.mulf %129, %133 : vector<16x128xf32>
    %cst_79 = arith.constant dense<0.000000e+00> : vector<16xf32>
    %135 = vector.multi_reduction <add>, %131, %cst_79 [1] : vector<16x128xf32> to vector<16xf32>
    %136 = vector.shape_cast %135 : vector<16xf32> to vector<16x1xf32>
    %137 = vector.broadcast %136 : vector<16x1xf32> to vector<16x128xf32>
    %138 = arith.addf %134, %137 : vector<16x128xf32>
    %c3_80 = arith.constant 3 : index
    %c0_81 = arith.constant 0 : index
    %c0_82 = arith.constant 0 : index
    %139 = vector.load %arg21[%c3_80, %c0_81, %c0_82] : memref<4x16x128xf32, #tpu.memory_space<vmem>>, vector<1x16x128xf32>
    %140 = vector.shape_cast %139 : vector<1x16x128xf32> to vector<16x128xf32>
    %141 = vector.shape_cast %138 : vector<16x128xf32> to vector<1x16x128xf32>
    tpu.vector_store %arg21[%c3_80, %c0_81, %c0_82], %141 {strides = array<i32>} : memref<4x16x128xf32, #tpu.memory_space<vmem>>, vector<1x16x128xf32>,
    %c3_83 = arith.constant 3 : index
    %c0_84 = arith.constant 0 : index
    %c0_85 = arith.constant 0 : index
    %142 = vector.load %arg20[%c3_83, %c0_84, %c0_85] : memref<4x16x128xf32, #tpu.memory_space<vmem>>, vector<1x16x128xf32>
    %143 = vector.shape_cast %142 : vector<1x16x128xf32> to vector<16x128xf32>
    %144 = vector.shape_cast %127 : vector<16x128xf32> to vector<1x16x128xf32>
    tpu.vector_store %arg20[%c3_83, %c0_84, %c0_85], %144 {strides = array<i32>} : memref<4x16x128xf32, #tpu.memory_space<vmem>>, vector<1x16x128xf32>,
    %145 = vector.extract_strided_slice %14 {offsets = [0, 96], sizes = [128, 32], strides = [1, 1]} : vector<128x128xf32> to vector<128x32xf32>
    %cst_86 = arith.constant dense<0.000000e+00> : vector<16x32xf32>
    %146 = tpu.matmul %131, %145, %cst_86 {dimension_numbers = #tpu.dot_dimension_numbers<[1], [0], [0], [1], [0, 0, 1, 1], [], []>} : vector<16x128xf32>, vector<128x32xf32>, vector<16x32xf32> -> vector<16x32xf32>
    %147 = vector.extract_strided_slice %129 {offsets = [0, 0], sizes = [16, 32], strides = [1, 1]} : vector<16x128xf32> to vector<16x32xf32>
    %148 = tpu.concatenate %48, %81, %114, %147 in 1 : vector<16x32xf32>, vector<16x32xf32>, vector<16x32xf32>, vector<16x32xf32> -> vector<16x128xf32>
    %c0_87 = arith.constant 0 : index
    %c0_88 = arith.constant 0 : index
    %149 = vector.load %arg22[%c0_87, %c0_88] : memref<16x128xf32, #tpu.memory_space<vmem>>, vector<16x128xf32>
    %150 = arith.mulf %148, %149 : vector<16x128xf32>
    %151 = tpu.concatenate %47, %80, %113, %146 in 1 : vector<16x32xf32>, vector<16x32xf32>, vector<16x32xf32>, vector<16x32xf32> -> vector<16x128xf32>
    %152 = arith.addf %150, %151 : vector<16x128xf32>
    %c0_89 = arith.constant 0 : index
    %c0_90 = arith.constant 0 : index
    %153 = vector.load %arg22[%c0_89, %c0_90] : memref<16x128xf32, #tpu.memory_space<vmem>>, vector<16x128xf32>
    tpu.vector_store %arg22[%c0_89, %c0_90], %152 {strides = array<i32>} : memref<16x128xf32, #tpu.memory_space<vmem>>, vector<16x128xf32>,
    %c1_i32 = arith.constant 1 : i32
    %154 = arith.cmpi eq, %arg2, %c1_i32 : i32
    %155 = arith.extui %154 : i1 to i32
    %c0_i32_91 = arith.constant 0 : i32
    %156 = arith.cmpi ne, %155, %c0_i32_91 : i32
    scf.if %156 {
      %c0_92 = arith.constant 0 : index
      %c0_93 = arith.constant 0 : index
      %c0_94 = arith.constant 0 : index
      %157 = vector.load %arg21[%c0_92, %c0_93, %c0_94] : memref<4x16x128xf32, #tpu.memory_space<vmem>>, vector<1x16x128xf32>
      %158 = vector.shape_cast %157 : vector<1x16x128xf32> to vector<16x128xf32>
      %159 = tpu.reciprocal %158 {approx = true} : vector<16x128xf32> -> vector<16x128xf32>
      %160 = vector.extract_strided_slice %159 {offsets = [0, 0], sizes = [16, 32], strides = [1, 1]} : vector<16x128xf32> to vector<16x32xf32>
      %c1_95 = arith.constant 1 : index
      %c0_96 = arith.constant 0 : index
      %c0_97 = arith.constant 0 : index
      %161 = vector.load %arg21[%c1_95, %c0_96, %c0_97] : memref<4x16x128xf32, #tpu.memory_space<vmem>>, vector<1x16x128xf32>
      %162 = vector.shape_cast %161 : vector<1x16x128xf32> to vector<16x128xf32>
      %163 = tpu.reciprocal %162 {approx = true} : vector<16x128xf32> -> vector<16x128xf32>
      %164 = vector.extract_strided_slice %163 {offsets = [0, 0], sizes = [16, 32], strides = [1, 1]} : vector<16x128xf32> to vector<16x32xf32>
      %c2_98 = arith.constant 2 : index
      %c0_99 = arith.constant 0 : index
      %c0_100 = arith.constant 0 : index
      %165 = vector.load %arg21[%c2_98, %c0_99, %c0_100] : memref<4x16x128xf32, #tpu.memory_space<vmem>>, vector<1x16x128xf32>
      %166 = vector.shape_cast %165 : vector<1x16x128xf32> to vector<16x128xf32>
      %167 = tpu.reciprocal %166 {approx = true} : vector<16x128xf32> -> vector<16x128xf32>
      %168 = vector.extract_strided_slice %167 {offsets = [0, 0], sizes = [16, 32], strides = [1, 1]} : vector<16x128xf32> to vector<16x32xf32>
      %c3_101 = arith.constant 3 : index
      %c0_102 = arith.constant 0 : index
      %c0_103 = arith.constant 0 : index
      %169 = vector.load %arg21[%c3_101, %c0_102, %c0_103] : memref<4x16x128xf32, #tpu.memory_space<vmem>>, vector<1x16x128xf32>
      %170 = vector.shape_cast %169 : vector<1x16x128xf32> to vector<16x128xf32>
      %171 = tpu.reciprocal %170 {approx = true} : vector<16x128xf32> -> vector<16x128xf32>
      %172 = vector.extract_strided_slice %171 {offsets = [0, 0], sizes = [16, 32], strides = [1, 1]} : vector<16x128xf32> to vector<16x32xf32>
      %173 = tpu.concatenate %160, %164, %168, %172 in 1 : vector<16x32xf32>, vector<16x32xf32>, vector<16x32xf32>, vector<16x32xf32> -> vector<16x128xf32>
      %c0_104 = arith.constant 0 : index
      %c0_105 = arith.constant 0 : index
      %174 = vector.load %arg22[%c0_104, %c0_105] : memref<16x128xf32, #tpu.memory_space<vmem>>, vector<16x128xf32>
      %175 = arith.mulf %174, %173 : vector<16x128xf32>
      %c0_106 = arith.constant 0 : index
      %c0_107 = arith.constant 0 : index
      %176 = vector.load %arg18[%c0_106, %c0_107] : memref<16x128xf32, #tpu.memory_space<vmem>>, vector<16x128xf32>
      %c0_108 = arith.constant 0 : index
      %c0_109 = arith.constant 0 : index
      %177 = vector.load %arg16[%c0_108, %c0_109] : memref<1x128xf32, #tpu.memory_space<vmem>>, vector<1x128xf32>
      %178 = vector.broadcast %177 : vector<1x128xf32> to vector<16x128xf32>
      %179 = arith.addf %176, %178 : vector<16x128xf32>
      %c0_110 = arith.constant 0 : index
      %c0_111 = arith.constant 0 : index
      %180 = vector.load %arg15[%c0_110, %c0_111] : memref<128x128xf32, #tpu.memory_space<vmem>>, vector<128x128xf32>
      %cst_112 = arith.constant dense<0.000000e+00> : vector<16x128xf32>
      %181 = tpu.matmul %175, %180, %cst_112 {dimension_numbers = #tpu.dot_dimension_numbers<[1], [0], [0], [1], [0, 0, 1, 1], [], []>} : vector<16x128xf32>, vector<128x128xf32>, vector<16x128xf32> -> vector<16x128xf32>
      %182 = arith.addf %179, %181 : vector<16x128xf32>
      %c0_113 = arith.constant 0 : index
      %c0_114 = arith.constant 0 : index
      %c0_115 = arith.constant 0 : index
      %183 = vector.load %arg17[%c0_113, %c0_114, %c0_115] : memref<1x16x128xf32, #tpu.memory_space<vmem>>, vector<1x16x128xf32>
      %184 = vector.shape_cast %183 : vector<1x16x128xf32> to vector<16x128xf32>
      %185 = vector.shape_cast %182 : vector<16x128xf32> to vector<1x16x128xf32>
      tpu.vector_store %arg17[%c0_113, %c0_114, %c0_115], %185 {strides = array<i32>} : memref<1x16x128xf32, #tpu.memory_space<vmem>>, vector<1x16x128xf32>,
    } else {
    }
    return
  }
  func.func @transform_0(%arg0: i32, %arg1: i32, %arg2: i32) -> (i32, i32, i32) {
    %c0_i32 = arith.constant 0 : i32
    %c0_i32_0 = arith.constant 0 : i32
    return %arg0, %arg1, %c0_i32 : i32, i32, i32
  }
  func.func @transform_1(%arg0: i32, %arg1: i32, %arg2: i32) -> (i32, i32, i32) {
    %c0_i32 = arith.constant 0 : i32
    %c0_i32_0 = arith.constant 0 : i32
    return %arg0, %arg1, %c0_i32 : i32, i32, i32
  }
  func.func @transform_2(%arg0: i32, %arg1: i32, %arg2: i32) -> (i32, i32, i32) {
    %c0_i32 = arith.constant 0 : i32
    %c0_i32_0 = arith.constant 0 : i32
    return %arg0, %arg2, %c0_i32 : i32, i32, i32
  }
  func.func @transform_3(%arg0: i32, %arg1: i32, %arg2: i32) -> (i32, i32, i32) {
    %c0_i32 = arith.constant 0 : i32
    %c0_i32_0 = arith.constant 0 : i32
    %c0_i32_1 = arith.constant 0 : i32
    return %arg2, %c0_i32, %c0_i32_0 : i32, i32, i32
  }
  func.func @transform_4(%arg0: i32, %arg1: i32, %arg2: i32) -> (i32, i32) {
    %c0_i32 = arith.constant 0 : i32
    %c0_i32_0 = arith.constant 0 : i32
    %c0_i32_1 = arith.constant 0 : i32
    return %c0_i32, %c0_i32_0 : i32, i32
  }
  func.func @transform_5(%arg0: i32, %arg1: i32, %arg2: i32) -> (i32, i32) {
    %c0_i32 = arith.constant 0 : i32
    %c0_i32_0 = arith.constant 0 : i32
    %c0_i32_1 = arith.constant 0 : i32
    return %c0_i32, %c0_i32_0 : i32, i32
  }
  func.func @transform_6(%arg0: i32, %arg1: i32, %arg2: i32) -> (i32, i32) {
    %c0_i32 = arith.constant 0 : i32
    %c0_i32_0 = arith.constant 0 : i32
    %c0_i32_1 = arith.constant 0 : i32
    return %c0_i32, %c0_i32_0 : i32, i32
  }
  func.func @transform_7(%arg0: i32, %arg1: i32, %arg2: i32) -> (i32, i32) {
    %c0_i32 = arith.constant 0 : i32
    %c0_i32_0 = arith.constant 0 : i32
    %c0_i32_1 = arith.constant 0 : i32
    return %c0_i32, %c0_i32_0 : i32, i32
  }
  func.func @transform_8(%arg0: i32, %arg1: i32, %arg2: i32) -> (i32, i32) {
    %c0_i32 = arith.constant 0 : i32
    %c0_i32_0 = arith.constant 0 : i32
    %c0_i32_1 = arith.constant 0 : i32
    return %c0_i32, %c0_i32_0 : i32, i32
  }
  func.func @transform_9(%arg0: i32, %arg1: i32, %arg2: i32) -> (i32, i32) {
    %c0_i32 = arith.constant 0 : i32
    %c0_i32_0 = arith.constant 0 : i32
    %c0_i32_1 = arith.constant 0 : i32
    return %c0_i32, %c0_i32_0 : i32, i32
  }
  func.func @transform_10(%arg0: i32, %arg1: i32, %arg2: i32) -> (i32, i32) {
    %c0_i32 = arith.constant 0 : i32
    %c0_i32_0 = arith.constant 0 : i32
    %c0_i32_1 = arith.constant 0 : i32
    return %c0_i32, %c0_i32_0 : i32, i32
  }
  func.func @transform_11(%arg0: i32, %arg1: i32, %arg2: i32) -> (i32, i32) {
    %c0_i32 = arith.constant 0 : i32
    %c0_i32_0 = arith.constant 0 : i32
    %c0_i32_1 = arith.constant 0 : i32
    return %c0_i32, %c0_i32_0 : i32, i32
  }
  func.func @transform_12(%arg0: i32, %arg1: i32, %arg2: i32) -> (i32, i32) {
    %c0_i32 = arith.constant 0 : i32
    %c0_i32_0 = arith.constant 0 : i32
    %c0_i32_1 = arith.constant 0 : i32
    return %c0_i32, %c0_i32_0 : i32, i32
  }
  func.func @transform_13(%arg0: i32, %arg1: i32, %arg2: i32) -> (i32, i32) {
    %c0_i32 = arith.constant 0 : i32
    %c0_i32_0 = arith.constant 0 : i32
    %c0_i32_1 = arith.constant 0 : i32
    return %c0_i32, %c0_i32_0 : i32, i32
  }
  func.func @transform_14(%arg0: i32, %arg1: i32, %arg2: i32) -> (i32, i32, i32) {
    %c0_i32 = arith.constant 0 : i32
    %c0_i32_0 = arith.constant 0 : i32
    return %arg0, %arg1, %c0_i32 : i32, i32, i32
  }
}

</mosaic_0001>

<bundles_post_ra>
// kernel: tpu_custom_call.1
= control target key start
LH: loop header
LB: loop body
LE: loop exit
PB: predicated region body
PF: predicated region fallthrough
CT: control target
= control target key end

     0   :  { %s6868_s0 = inlined_call_operand.hbm [shape: f32[2,16,128], index: 0, kind: input, shape index: {}]   ;;  %s6869_s1 = inlined_call_operand.hbm [shape: f32[2,16,128], index: 1, kind: input, shape index: {}]   ;;  %s6870_s2 = inlined_call_operand.hbm [shape: f32[2,256,128], index: 2, kind: input, shape index: {}]   ;;  %s6871_s3 = inlined_call_operand.hbm [shape: f32[2,1,128], index: 3, kind: input, shape index: {}]   ;;  %s6872_s4 = inlined_call_operand.hbm [shape: f32[1,128], index: 4, kind: input, shape index: {}]   ;;  %s6873_s5 = inlined_call_operand.hbm [shape: f32[1,128], index: 5, kind: input, shape index: {}]   ;;  %s6874_s6 = inlined_call_operand.hbm [shape: f32[128,128], index: 6, kind: input, shape index: {}]   ;;  %s6875_s7 = inlined_call_operand.hbm [shape: f32[1,128], index: 7, kind: input, shape index: {}]   ;;  %s6876_s8 = inlined_call_operand.hbm [shape: f32[128,128], index: 8, kind: input, shape index: {}]   ;;  %s6877_s9 = inlined_call_operand.hbm [shape: f32[1,128], index: 9, kind: input, shape index: {}]   ;;  %s6878_s10 = inlined_call_operand.hbm [shape: f32[128,128], index: 10, kind: input, shape index: {}]   ;;  %s6879_s11 = inlined_call_operand.hbm [shape: f32[1,128], index: 11, kind: input, shape index: {}]   ;;  %s6880_s12 = inlined_call_operand.hbm [shape: f32[128,128], index: 12, kind: input, shape index: {}]   ;;  %s6881_s13 = inlined_call_operand.hbm [shape: f32[1,128], index: 13, kind: input, shape index: {}]   ;;  %s6882_s14 = inlined_call_operand.hbm [shape: f32[2,16,128], index: 14, kind: output, shape index: {}]  }
   0x1   :  { %6916 = sst [smem:[#allocation55_spill]] %s6868_s0 }
   0x2   :  { %6917 = sst [smem:[#allocation56_spill]] %s6869_s1 }
   0x3   :  { %6918 = sst [smem:[#allocation57_spill]] %s6870_s2 }
   0x4   :  { %6919 = sst [smem:[#allocation58_spill]] %s6871_s3 }
   0x5   :  { %6920 = sst [smem:[#allocation59_spill]] %s6872_s4 }
   0x6   :  { %6921 = sst [smem:[#allocation60_spill]] %s6873_s5 }
   0x7   :  { %6922 = sst [smem:[#allocation61_spill]] %s6874_s6 }
   0x8   :  { %6923 = sst [smem:[#allocation62_spill]] %s6875_s7 }
   0x9   :  { %6924 = sst [smem:[#allocation63_spill]] %s6876_s8 }
   0xa   :  { %6925 = sst [smem:[#allocation64_spill]] %s6877_s9 }
   0xb   :  { %6926 = sst [smem:[#allocation65_spill]] %s6878_s10 }
   0xc   :  { %6927 = sst [smem:[#allocation66_spill]] %s6879_s11 }
   0xd   :  { %6928 = sst [smem:[#allocation67_spill]] %s6880_s12 }
   0xe   :  { %6929 = sst [smem:[#allocation68_spill]] %s6881_s13 }
   0xf   :  { %6930 = sst [smem:[#allocation69_spill]] %s6882_s14 }
  0x10   :  { %19 = vsyncpa [#allocation8], 0 }
  0x11   :  { %21 = vsyncpa [#allocation8 + $0x1], 0 }
  0x12   :  { %22 = vsyncpa [#allocation11], 0 }
  0x13   :  { %24 = vsyncpa [#allocation11 + $0x1], 0 }
  0x14   :  { %25 = vsyncpa [#allocation14], 0 }
  0x15   :  { %27 = vsyncpa [#allocation14 + $0x1], 0 }
  0x16   :  { %28 = vsyncpa [#allocation17], 0 }
  0x17   :  { %29 = vsyncpa [#allocation20], 0 }
  0x18   :  { %30 = vsyncpa [#allocation23], 0 }
  0x19   :  { %31 = vsyncpa [#allocation26], 0 }
  0x1a   :  { %32 = vsyncpa [#allocation29], 0 }
  0x1b   :  { %33 = vsyncpa [#allocation9], 0 }
  0x1c   :  { %35 = vsyncpa [#allocation9 + $0x1], 0  ;;  %s5516_s29 = smov 0   ;;  %s5518_s30 = smov 0  }
  0x1d   :  { %s5520_s15 = smov 0   ;;  %s5522_s16 = smov 0  }
  0x1e   :  { %s5524_s17 = smov 0   ;;  %s5526_s18 = smov 0  }
  0x1f   :  { %s5528_s19 = smov 0   ;;  %s5530_s20 = smov 0  }
  0x20   :  { %s5532_s21 = smov 0   ;;  %s5534_s22 = smov 0  }
  0x21   :  { %s5536_s23 = smov 0   ;;  %s5538_s24 = smov 0  }
  0x22   :  { %s5540_s25 = smov 0   ;;  %s5542_s26 = smov 0  }
  0x23 LB: > { %6931 = sst [smem:[#allocation42_spill]] %s5360_s29  ;;  %s5587_s27 = sadd.s32 4294967295, %s5412_s26   ;;  %s5412_s26 = sphi %s5542_s26, %s41_s26   ;;  %s5408_s25 = sphi %s5540_s25, %s7042_s25   ;;  %s5404_s24 = sphi %s5538_s24, %s7041_s24   ;;  %s5400_s23 = sphi %s5536_s23, %s7040_s23   ;;  %s5396_s22 = sphi %s5534_s22, %s7032_s22   ;;  %s5392_s21 = sphi %s5532_s21, %s7039_s21   ;;  %s5388_s20 = sphi %s5530_s20, %s7038_s20   ;;  %s5384_s19 = sphi %s5528_s19, %s7037_s19   ;;  %s5380_s18 = sphi %s5526_s18, %s7036_s18   ;;  %s5376_s17 = sphi %s5524_s17, %s7031_s17   ;;  %s5372_s16 = sphi %s5522_s16, %s7030_s16   ;;  %s5368_s15 = sphi %s5520_s15, %s7035_s15   ;;  %s5364_s30 = sphi %s5518_s30, %s7029_s30   ;;  %s5360_s29 = sphi %s5516_s29, %s7028_s29  }
  0x24   : > { %6932 = sst [smem:[#allocation43_spill]] %s5364_s30  ;;  %p3000_p0 = scmp.ge.s32.totalorder %s5412_s26, 1 }
  0x25   : > { %6933 = sst [smem:[#allocation44_spill]] %s5368_s15  ;;  %p6891_p1 = scmp.eq.s32.totalorder %s5587_s27, 0 }
  0x26   : > { %6934 = sst [smem:[#allocation45_spill]] %s5372_s16  ;;  %p413_p2 = scmp.lt.s32.totalorder %s5412_s26, 5 }
  0x27   : > { %6935 = sst [smem:[#allocation46_spill]] %s5376_s17  ;;  %s5414_s14 = smov [#allocation15]  }
  0x28   : > { %6936 = sst [smem:[#allocation47_spill]] %s5380_s18  ;;  %p5592_p3 = pnand %p3000_p0, %p413_p2 }
  0x29   : > { %6937 = sst [smem:[#allocation48_spill]] %s5384_s19  ;;  %s5416_s30 = smov [#allocation19]  }
  0x2a   : > { %6938 = sst [smem:[#allocation49_spill]] %s5396_s22  ;;  %p4334_p4 = pneg %p5592_p3 }
  0x2b   : > { %6939 = sst [smem:[#allocation50_spill]] %s5400_s23  ;;  %s426_s23 = sshll.u32 %s5414_s14, 4  ;;  %s427_s23 = int_to_ptr.vmem [resolvable:$true] %s426_s23 }
  0x2c   : > { %6940 = sst [smem:[#allocation51_spill]] %s5404_s24  ;;  %s5415_s22 = smov [#allocation16]  }
  0x2d   : > { %s6941_s28 = scalar_select %p5592_p3, 1, 0 }
  0x2e   : > { %s437_s3 = sshll.u32 %s5415_s22, 4  ;;  %p5600_p5 = pnand %p4334_p4, %p6891_p1  ;;  %s5604_s3 = int_to_ptr.vmem [resolvable:$true] %s437_s3 }
  0x2f   : > { %6942 = sst [smem:[#allocation52_spill]] %s6941_s28  ;;  %s461_s15 = sshll.u32 %s5416_s30, 4  ;;  %s5606_s15 = int_to_ptr.vmem [resolvable:$true] %s461_s15 }
  0x30   : > { %s6943_s29 = scalar_select %p5600_p5, 1, 0 }
  0x31   : > { %s6944_s4 = sld [smem:[#allocation59_spill]]  ;;  %p5616_p7 = pneg %p5600_p5 }
  0x37   : > { %s4830_s14 = scalar_lea.hbm %s6944_s4, 16 }
  0x38   : > { %p4831_p6 = scmp.ne.s32.totalorder %s6944_s4, %s4830_s14  ;;  %p4837_p10 = scmp.lt.u32.totalorder %s4830_s14, %s6944_s4 }
  0x3a   : > { %p4833_p8 = pnand %p5616_p7, %p4831_p6 }
  0x3c   : > { %p4834_p9 = pneg %p4833_p8 }
  0x3e   : > { %p4839_p11 = pnand %p4837_p10, %p4834_p9 }
  0x40   : > { %4842 = shalt.err (!%p4839_p11)
}
  0x41   : > { %s4843_s2 = scalar_lea.vmem %s427_s23, 16  ;;  %s4850_s16 = scalar_lea.vmem %s427_s23, 32 }
  0x42   : > { %p4844_p12 = scmp.ne.s32.totalorder %s427_s23, %s4843_s2  ;;  %p4851_p2 = scmp.lt.s32.totalorder %s427_s23, %s427_s23 }
  0x43   : > { %p4852_p4 = scmp.lt.s32.totalorder %s4850_s16, %s4843_s2 }
  0x44   : > { %p4846_p13 = pnand %p4844_p12, %p5616_p7 }
  0x45   : > { %p4853_p1 = por %p4852_p4, %p4851_p2 }
  0x46   : > { %p4847_p0 = pneg %p4846_p13 }
  0x48   : > { %p4854_p3 = pnand %p4853_p1, %p4847_p0 }
  0x4a   : > { %4857 = shalt.err (!%p4854_p3)
}
  0x4b   : > { %4337 = dma.hbm_to_vmem [thread:$0]  (!%p5600_p5), %s6944_s4, 16, %s427_s23, [#allocation14]  }
  0x4c   : > { %s6946_s5 = sld [smem:[#allocation60_spill]] }
  0x52   : > { %s4858_s30 = scalar_lea.hbm %s6946_s5, 16 }
  0x53   : > { %p4859_p6 = scmp.ne.s32.totalorder %s6946_s5, %s4858_s30  ;;  %p4865_p1 = scmp.lt.u32.totalorder %s4858_s30, %s6946_s5 }
  0x55   : > { %p4861_p8 = pnand %p4859_p6, %p5616_p7 }
  0x57   : > { %p4862_p9 = pneg %p4861_p8 }
  0x59   : > { %p4867_p3 = pnand %p4865_p1, %p4862_p9 }
  0x5b   : > { %4870 = shalt.err (!%p4867_p3)
}
  0x5c   : > { %s4871_s23 = scalar_lea.vmem %s5604_s3, 16  ;;  %s4878_s0 = scalar_lea.vmem %s5604_s3, 32 }
  0x5d   : > { %p4872_p10 = scmp.ne.s32.totalorder %s5604_s3, %s4871_s23  ;;  %p4879_p13 = scmp.lt.s32.totalorder %s5604_s3, %s5604_s3 }
  0x5e   : > { %p4880_p0 = scmp.lt.s32.totalorder %s4878_s0, %s4871_s23 }
  0x5f   : > { %p4874_p11 = pnand %p4872_p10, %p5616_p7 }
  0x60   : > { %p4881_p2 = por %p4880_p0, %p4879_p13 }
  0x61   : > { %p4875_p12 = pneg %p4874_p11 }
  0x63   : > { %p4882_p4 = pnand %p4881_p2, %p4875_p12 }
  0x65   : > { %4885 = shalt.err (!%p4882_p4)
}
  0x66   : > { %4340 = dma.hbm_to_vmem [thread:$0]  (!%p5600_p5), %s6946_s5, 16, %s5604_s3, [#allocation17]  }
  0x67   : > { %s6947_s7 = sld [smem:[#allocation62_spill]] }
  0x6d   : > { %s4886_s14 = scalar_lea.hbm %s6947_s7, 16 }
  0x6e   : > { %p4887_p6 = scmp.ne.s32.totalorder %s6947_s7, %s4886_s14  ;;  %p4893_p1 = scmp.lt.u32.totalorder %s4886_s14, %s6947_s7 }
  0x70   : > { %p4889_p8 = pnand %p4887_p6, %p5616_p7 }
  0x72   : > { %p4890_p9 = pneg %p4889_p8 }
  0x74   : > { %p4895_p3 = pnand %p4893_p1, %p4890_p9 }
  0x76   : > { %4898 = shalt.err (!%p4895_p3)
}
  0x77   : > { %s4899_s3 = scalar_lea.vmem %s5606_s15, 16  ;;  %s4906_s0 = scalar_lea.vmem %s5606_s15, 32 }
  0x78   : > { %p4900_p10 = scmp.ne.s32.totalorder %s5606_s15, %s4899_s3  ;;  %p4907_p13 = scmp.lt.s32.totalorder %s5606_s15, %s5606_s15 }
  0x79   : > { %p4908_p0 = scmp.lt.s32.totalorder %s4906_s0, %s4899_s3 }
  0x7a   : > { %p4902_p11 = pnand %p4900_p10, %p5616_p7 }
  0x7b   : > { %p4909_p2 = por %p4908_p0, %p4907_p13 }
  0x7c   : > { %p4903_p12 = pneg %p4902_p11 }
  0x7e   : > { %p4910_p4 = pnand %p4909_p2, %p4903_p12 }
  0x80   : > { %4913 = shalt.err (!%p4910_p4)
}
  0x81   : > { %4346 = dma.hbm_to_vmem [thread:$0]  (!%p5600_p5), %s6947_s7, 16, %s5606_s15, [#allocation20]  }
  0x82   : > { %s5417_s28 = smov [#allocation22]   ;;  %s5418_s14 = smov [#allocation25]  }
  0x83   : > { %s485_s18 = sshll.u32 %s5417_s28, 4  ;;  %s509_s30 = sshll.u32 %s5418_s14, 4  ;;  %s486_s18 = int_to_ptr.vmem [resolvable:$true] %s485_s18  ;;  %s510_s30 = int_to_ptr.vmem [resolvable:$true] %s509_s30 }
  0x84   : > { %s6948_s9 = sld [smem:[#allocation64_spill]] }
  0x8a   : > { %s4914_s23 = scalar_lea.hbm %s6948_s9, 16 }
  0x8b   : > { %p4915_p6 = scmp.ne.s32.totalorder %s6948_s9, %s4914_s23  ;;  %p4921_p1 = scmp.lt.u32.totalorder %s4914_s23, %s6948_s9 }
  0x8d   : > { %p4917_p8 = pnand %p4915_p6, %p5616_p7 }
  0x8f   : > { %p4918_p9 = pneg %p4917_p8 }
  0x91   : > { %p4923_p3 = pnand %p4921_p1, %p4918_p9 }
  0x93   : > { %4926 = shalt.err (!%p4923_p3)
}
  0x94   : > { %s4927_s15 = scalar_lea.vmem %s486_s18, 16  ;;  %s4934_s17 = scalar_lea.vmem %s486_s18, 32 }
  0x95   : > { %p4928_p10 = scmp.ne.s32.totalorder %s486_s18, %s4927_s15  ;;  %p4935_p13 = scmp.lt.s32.totalorder %s486_s18, %s486_s18 }
  0x96   : > { %p4936_p0 = scmp.lt.s32.totalorder %s4934_s17, %s4927_s15 }
  0x97   : > { %p4930_p11 = pnand %p4928_p10, %p5616_p7 }
  0x98   : > { %p4937_p2 = por %p4936_p0, %p4935_p13 }
  0x99   : > { %p4931_p12 = pneg %p4930_p11 }
  0x9b   : > { %p4938_p4 = pnand %p4937_p2, %p4931_p12 }
  0x9d   : > { %4941 = shalt.err (!%p4938_p4)
}
  0x9e   : > { %4352 = dma.hbm_to_vmem [thread:$0]  (!%p5600_p5), %s6948_s9, 16, %s486_s18, [#allocation23]  }
  0x9f   : > { %s6949_s11 = sld [smem:[#allocation66_spill]] }
  0xa5   : > { %s4942_s16 = scalar_lea.hbm %s6949_s11, 16 }
  0xa6   : > { %p4943_p6 = scmp.ne.s32.totalorder %s6949_s11, %s4942_s16  ;;  %p4949_p1 = scmp.lt.u32.totalorder %s4942_s16, %s6949_s11 }
  0xa8   : > { %p4945_p8 = pnand %p4943_p6, %p5616_p7 }
  0xaa   : > { %p4946_p9 = pneg %p4945_p8 }
  0xac   : > { %p4951_p3 = pnand %p4949_p1, %p4946_p9 }
  0xae   : > { %4954 = shalt.err (!%p4951_p3)
}
  0xaf   : > { %s4955_s15 = scalar_lea.vmem %s510_s30, 16  ;;  %s4962_s18 = scalar_lea.vmem %s510_s30, 32 }
  0xb0   : > { %p4956_p10 = scmp.ne.s32.totalorder %s510_s30, %s4955_s15  ;;  %p4963_p13 = scmp.lt.s32.totalorder %s510_s30, %s510_s30 }
  0xb1   : > { %p4964_p0 = scmp.lt.s32.totalorder %s4962_s18, %s4955_s15 }
  0xb2   : > { %p4958_p11 = pnand %p4956_p10, %p5616_p7 }
  0xb3   : > { %p4965_p2 = por %p4964_p0, %p4963_p13 }
  0xb4   : > { %p4959_p12 = pneg %p4958_p11 }
  0xb6   : > { %p4966_p4 = pnand %p4965_p2, %p4959_p12 }
  0xb8   : > { %4969 = shalt.err (!%p4966_p4)
}
  0xb9   : > { %4358 = dma.hbm_to_vmem [thread:$0]  (!%p5600_p5), %s6949_s11, 16, %s510_s30, [#allocation26]  }
  0xba   : > { %s2999_s14 = sadd.s32 4294967294, %s5412_s26   ;;  %p76_p6 = scmp.ne.s32.totalorder %s5392_s21, %s5388_s20 }
  0xbb   : > { %p6898_p8 = scmp.eq.s32.totalorder %s5412_s26, 0  ;;  %p82_p9 = scmp.ne.s32.totalorder %s5388_s20, %s5384_s19 }
  0xbc   : > { %p400_p1 = scmp.eq.s32.totalorder %s5587_s27, 3  ;;  %p406_p10 = scmp.eq.s32.totalorder %s2999_s14, 3 }
  0xbd   : > { %p78_p3 = por %p6898_p8, %p76_p6  ;;  %p6950_p11 = scmp.eq.s32.totalorder %s5587_s27, 0 }
  0xbe   : > { %p5733_p13 = por %p400_p1, %p76_p6  ;;  %p5737_p0 = por %p406_p10, %p82_p9 }
  0xbf   : > { %p5729_p12 = por %p6950_p11, %p82_p9  ;;  %p6897_p2 = scmp.lt.s32.totalorder %s5412_s26, 4 }
  0xc0   : > { %s6952_s30 = scalar_select %p5733_p13, 1, 0 }
  0xc1   : > { %s6951_s16 = scalar_select %p5729_p12, 1, 0 }
  0xc2   : > { %6953 = sst [smem:[#allocation53_spill]] %s6952_s30  ;;  %s6895_s3 = sand.u32 1, %s5392_s21  }
  0xc3   : > { %s6954_s23 = scalar_select %p5737_p0, 1, 0 }
  0xc4   : > { %s6896_s0 = sshll.u32 %s5408_s25, 8  ;;  %s5746_s24 = sshll.u32 %s6895_s3, 4 }
  0xc5   : > { %6955 = sst [smem:[#allocation54_spill]] %s6954_s23  ;;  %p5750_p4 = pnand %p6897_p2, %p78_p3 }
  0xc6   : > { %s6903_s18 = sand.u32 1, %s5412_s26   ;;  %s6957_s1 = sld [smem:[#allocation56_spill]] }
  0xc7   : > { %s6956_s15 = scalar_select %p5750_p4, 1, 0 }
  0xc8   : > { %s571_s2 = scalar_lea.vmem [#allocation10], %s5746_s24  ;;  %s5767_s3 = scalar_lea.sflag [#allocation11], %s6903_s18 }
  0xc9   : > { %s580_s4 = sshll.u32 %s571_s2, 4  ;;  %p6908_p9 = pneg %p5750_p4  ;;  %s5763_s4 = int_to_ptr.vmem [resolvable:$true] %s580_s4 }
  0xcc   : > { %s5760_s14 = scalar_lea.hbm %s6957_s1, %s6896_s0  ;;  %s4975_s0 = scalar_lea.hbm %s6957_s1, 512 }
  0xcd   : > { %s4970_s5 = scalar_lea.hbm %s5760_s14, 256  ;;  %p4976_p10 = scmp.lt.u32.totalorder %s5760_s14, %s6957_s1 }
  0xce   : > { %p4971_p6 = scmp.ne.s32.totalorder %s5760_s14, %s4970_s5  ;;  %p4977_p11 = scmp.lt.u32.totalorder %s4975_s0, %s4970_s5 }
  0xcf   : > { %p4979_p8 = scmp.lt.u32.totalorder %s4970_s5, %s5760_s14 }
  0xd0   : > { %p4973_p1 = pnand %p6908_p9, %p4971_p6  ;;  %p4978_p2 = por %p4977_p11, %p4976_p10 }
  0xd2   : > { %p4974_p3 = pneg %p4973_p1  ;;  %p4980_p0 = por %p4979_p8, %p4978_p2 }
  0xd4   : > { %p4981_p13 = pnand %p4980_p0, %p4974_p3 }
  0xd6   : > { %4984 = shalt.err (!%p4981_p13)
}
  0xd7   : > { %s4985_s2 = scalar_lea.vmem %s5763_s4, 256  ;;  %s5419_s17 = smov [#allocation10]  }
  0xd8   : > { %p4986_p6 = scmp.ne.s32.totalorder %s5763_s4, %s4985_s2  ;;  %s4990_s28 = sshll.u32 %s5419_s17, 4  ;;  %s4991_s28 = int_to_ptr.vmem [resolvable:$false] %s4990_s28 }
  0xd9   : > { %s4992_s7 = scalar_lea.vmem %s4991_s28, 512  ;;  %p4993_p5 = scmp.lt.s32.totalorder %s5763_s4, %s4991_s28 }
  0xda   : > { %p4988_p1 = pnand %p4986_p6, %p6908_p9  ;;  %p4994_p10 = scmp.lt.s32.totalorder %s4992_s7, %s4985_s2 }
  0xdc   : > { %p4989_p12 = pneg %p4988_p1  ;;  %p4995_p11 = por %p4994_p10, %p4993_p5 }
  0xde   : > { %p4996_p8 = pnand %p4995_p11, %p4989_p12 }
  0xe0   : > { %4999 = shalt.err (!%p4996_p8)
}
  0xe1   : > { %s6911_s5 = smov 128   ;;  %s6912_s9 = smov 8  }
  0xe2   : > { %4371 = dma.hbm_to_vmem [thread:$0]  (!%p5750_p4), %s5760_s14, 256, %s5763_s4, %s5767_s3, %s6911_s5, %s6911_s5, %s6912_s9  }
  0xe3   : > { %s5422_s0 = smov [#allocation18]   ;;  %s5423_s28 = smov [#allocation21]  }
  0xe4   : > { %s447_s17 = sshll.u32 %s5422_s0, 4  ;;  %s471_s2 = sshll.u32 %s5423_s28, 4  ;;  %s448_s17 = int_to_ptr.vmem [resolvable:$true] %s447_s17  ;;  %s472_s2 = int_to_ptr.vmem [resolvable:$true] %s471_s2 }
  0xe5   : > { %s6958_s6 = sld [smem:[#allocation61_spill]] }
  0xeb   : > { %s5000_s1 = scalar_lea.hbm %s6958_s6, 2048 }
  0xec   : > { %p5001_p5 = scmp.ne.s32.totalorder %s6958_s6, %s5000_s1  ;;  %p5007_p0 = scmp.lt.u32.totalorder %s5000_s1, %s6958_s6 }
  0xee   : > { %p5003_p12 = pnand %p5001_p5, %p5616_p7 }
  0xf0   : > { %p5004_p13 = pneg %p5003_p12 }
  0xf2   : > { %p5009_p2 = pnand %p5007_p0, %p5004_p13 }
  0xf4   : > { %5012 = shalt.err (!%p5009_p2)
}
  0xf5   : > { %s5013_s4 = scalar_lea.vmem %s448_s17, 2048  ;;  %p5021_p10 = scmp.lt.s32.totalorder %s448_s17, %s448_s17 }
  0xf6   : > { %p5014_p3 = scmp.ne.s32.totalorder %s448_s17, %s5013_s4  ;;  %p5022_p11 = scmp.lt.s32.totalorder %s5013_s4, %s5013_s4 }
  0xf8   : > { %p5016_p6 = pnand %p5014_p3, %p5616_p7  ;;  %p5023_p8 = por %p5022_p11, %p5021_p10 }
  0xfa   : > { %p5017_p1 = pneg %p5016_p6 }
  0xfc   : > { %p5024_p9 = pnand %p5023_p8, %p5017_p1 }
  0xfe   : > { %5027 = shalt.err (!%p5024_p9)
}
  0xff   : > { %p6959_p5 = scmp.ne.s32.totalorder %s6943_s29, 0  ;;  %s6960_s8 = sld [smem:[#allocation63_spill]] }
 0x101   : > { %4343 = dma.hbm_to_vmem [thread:$0]  (!%p6959_p5), %s6958_s6, 2048, %s448_s17, [#allocation17], %s6911_s5, %s6911_s5, %s6912_s9  }
 0x105   : > { %s5028_s23 = scalar_lea.hbm %s6960_s8, 2048 }
 0x106   : > { %p5029_p12 = scmp.ne.s32.totalorder %s6960_s8, %s5028_s23  ;;  %p5035_p0 = scmp.lt.u32.totalorder %s5028_s23, %s6960_s8 }
 0x108   : > { %p5031_p9 = pnand %p5029_p12, %p5616_p7 }
 0x10a   : > { %p5032_p13 = pneg %p5031_p9 }
 0x10c   : > { %p5037_p2 = pnand %p5035_p0, %p5032_p13 }
 0x10e   : > { %5040 = shalt.err (!%p5037_p2)
}
 0x10f   : > { %s5041_s7 = scalar_lea.vmem %s472_s2, 2048  ;;  %p5049_p10 = scmp.lt.s32.totalorder %s472_s2, %s472_s2 }
 0x110   : > { %p5042_p3 = scmp.ne.s32.totalorder %s472_s2, %s5041_s7  ;;  %p5050_p11 = scmp.lt.s32.totalorder %s5041_s7, %s5041_s7 }
 0x112   : > { %p5044_p6 = pnand %p5042_p3, %p5616_p7  ;;  %p5051_p8 = por %p5050_p11, %p5049_p10 }
 0x114   : > { %p5045_p1 = pneg %p5044_p6 }
 0x116   : > { %p5052_p4 = pnand %p5051_p8, %p5045_p1 }
 0x118   : > { %5055 = shalt.err (!%p5052_p4)
}
 0x119   : > { %4349 = dma.hbm_to_vmem [thread:$0]  (!%p6959_p5), %s6960_s8, 2048, %s472_s2, [#allocation20], %s6911_s5, %s6911_s5, %s6912_s9  }
 0x11a   : > { %s5424_s11 = smov [#allocation24]   ;;  %s5425_s19 = smov [#allocation27]  }
 0x11b   : > { %s495_s1 = sshll.u32 %s5424_s11, 4  ;;  %s519_s30 = sshll.u32 %s5425_s19, 4  ;;  %s496_s1 = int_to_ptr.vmem [resolvable:$true] %s495_s1  ;;  %s520_s30 = int_to_ptr.vmem [resolvable:$true] %s519_s30 }
 0x11c   : > { %s6961_s10 = sld [smem:[#allocation65_spill]] }
 0x122   : > { %s5056_s14 = scalar_lea.hbm %s6961_s10, 2048 }
 0x123   : > { %p5057_p4 = scmp.ne.s32.totalorder %s6961_s10, %s5056_s14  ;;  %p5063_p13 = scmp.lt.u32.totalorder %s5056_s14, %s6961_s10 }
 0x125   : > { %p5059_p12 = pnand %p5057_p4, %p5616_p7 }
 0x127   : > { %p5060_p9 = pneg %p5059_p12 }
 0x129   : > { %p5065_p0 = pnand %p5063_p13, %p5060_p9 }
 0x12b   : > { %5068 = shalt.err (!%p5065_p0)
}
 0x12c   : > { %s5069_s2 = scalar_lea.vmem %s496_s1, 2048  ;;  %p5077_p1 = scmp.lt.s32.totalorder %s496_s1, %s496_s1 }
 0x12d   : > { %p5070_p2 = scmp.ne.s32.totalorder %s496_s1, %s5069_s2  ;;  %p5078_p10 = scmp.lt.s32.totalorder %s5069_s2, %s5069_s2 }
 0x12f   : > { %p5072_p3 = pnand %p5070_p2, %p5616_p7  ;;  %p5079_p11 = por %p5078_p10, %p5077_p1 }
 0x131   : > { %p5073_p6 = pneg %p5072_p3 }
 0x133   : > { %p5080_p8 = pnand %p5079_p11, %p5073_p6 }
 0x135   : > { %5083 = shalt.err (!%p5080_p8)
}
 0x136   : > { %4355 = dma.hbm_to_vmem [thread:$0]  (!%p6959_p5), %s6961_s10, 2048, %s496_s1, [#allocation23], %s6911_s5, %s6911_s5, %s6912_s9  }
 0x137   : > { %s6962_s12 = sld [smem:[#allocation67_spill]] }
 0x13d   : > { %s5084_s18 = scalar_lea.hbm %s6962_s12, 2048 }
 0x13e   : > { %p5085_p4 = scmp.ne.s32.totalorder %s6962_s12, %s5084_s18  ;;  %p5091_p13 = scmp.lt.u32.totalorder %s5084_s18, %s6962_s12 }
 0x140   : > { %p5087_p12 = pnand %p5085_p4, %p5616_p7 }
 0x142   : > { %p5088_p9 = pneg %p5087_p12 }
 0x144   : > { %p5093_p0 = pnand %p5091_p13, %p5088_p9 }
 0x146   : > { %5096 = shalt.err (!%p5093_p0)
}
 0x147   : > { %s5097_s17 = scalar_lea.vmem %s520_s30, 2048  ;;  %p5105_p1 = scmp.lt.s32.totalorder %s520_s30, %s520_s30 }
 0x148   : > { %p5098_p2 = scmp.ne.s32.totalorder %s520_s30, %s5097_s17  ;;  %p5106_p10 = scmp.lt.s32.totalorder %s5097_s17, %s5097_s17 }
 0x14a   : > { %p5100_p3 = pnand %p5098_p2, %p5616_p7  ;;  %p5107_p11 = por %p5106_p10, %p5105_p1 }
 0x14c   : > { %p5101_p6 = pneg %p5100_p3 }
 0x14e   : > { %p5108_p8 = pnand %p5107_p11, %p5101_p6 }
 0x150   : > { %5111 = shalt.err (!%p5108_p8)
}
 0x151   : > { %4361 = dma.hbm_to_vmem [thread:$0]  (!%p6959_p5), %s6962_s12, 2048, %s520_s30, [#allocation26], %s6911_s5, %s6911_s5, %s6912_s9  }
 0x152   : > { %s5426_s4 = smov [#allocation28]   ;;  %s6963_s13 = sld [smem:[#allocation68_spill]] }
 0x153   : > { %s533_s11 = sshll.u32 %s5426_s4, 4  ;;  %s534_s11 = int_to_ptr.vmem [resolvable:$true] %s533_s11 }
 0x158   : > { %s5112_s18 = scalar_lea.hbm %s6963_s13, 16 }
 0x159   : > { %p5113_p4 = scmp.ne.s32.totalorder %s6963_s13, %s5112_s18  ;;  %p5119_p13 = scmp.lt.u32.totalorder %s5112_s18, %s6963_s13 }
 0x15b   : > { %p5115_p12 = pnand %p5113_p4, %p5616_p7 }
 0x15d   : > { %p5116_p9 = pneg %p5115_p12 }
 0x15f   : > { %p5121_p0 = pnand %p5119_p13, %p5116_p9 }
 0x161   : > { %5124 = shalt.err (!%p5121_p0)
}
 0x162   : > { %s5125_s30 = scalar_lea.vmem %s534_s11, 16  ;;  %s5132_s17 = scalar_lea.vmem %s534_s11, 32 }
 0x163   : > { %p5126_p2 = scmp.ne.s32.totalorder %s534_s11, %s5125_s30  ;;  %p5133_p1 = scmp.lt.s32.totalorder %s534_s11, %s534_s11 }
 0x164   : > { %p5134_p10 = scmp.lt.s32.totalorder %s5132_s17, %s5125_s30 }
 0x165   : > { %p5128_p3 = pnand %p5126_p2, %p5616_p7 }
 0x166   : > { %p5135_p11 = por %p5134_p10, %p5133_p1 }
 0x167   : > { %p5129_p6 = pneg %p5128_p3 }
 0x169   : > { %p5136_p8 = pnand %p5135_p11, %p5129_p6 }
 0x16b   : > { %5139 = shalt.err (!%p5136_p8)
}
 0x16c   : > { %4364 = dma.hbm_to_vmem [thread:$0]  (!%p6959_p5), %s6963_s13, 16, %s534_s11, [#allocation29]  }
 0x16d   : > { %s6964_s4 = sshll.u32 %s5408_s25, 8  ;;  %s6965_s23 = sld [smem:[#allocation55_spill]] }
 0x16e   : > { %s548_s0 = scalar_lea.vmem [#allocation7], %s5746_s24  ;;  %s6967_s28 = sand.u32 1, %s5392_s21  }
 0x16f   : > { %s557_s29 = sshll.u32 %s548_s0, 4  ;;  %s5912_s7 = scalar_lea.sflag [#allocation8], %s6967_s28  ;;  %s5908_s29 = int_to_ptr.vmem [resolvable:$true] %s557_s29 }
 0x170   : > { %p6968_p5 = scmp.ne.s32.totalorder %s6956_s15, 0 }
 0x172   : > { %p6969_p4 = pneg %p6968_p5 }
 0x173   : > { %s6966_s14 = smov %s6965_s23  ;;  %s5905_s18 = scalar_lea.hbm %s6965_s23, %s6964_s4 }
 0x174   : > { %s5140_s30 = scalar_lea.hbm %s5905_s18, 256  ;;  %s5145_s1 = scalar_lea.hbm %s6966_s14, 512 }
 0x175   : > { %p5141_p7 = scmp.ne.s32.totalorder %s5905_s18, %s5140_s30  ;;  %p5146_p13 = scmp.lt.u32.totalorder %s5905_s18, %s6966_s14 }
 0x176   : > { %p5147_p0 = scmp.lt.u32.totalorder %s5145_s1, %s5140_s30  ;;  %p5149_p3 = scmp.lt.u32.totalorder %s5140_s30, %s5905_s18 }
 0x177   : > { %p5143_p12 = pnand %p5141_p7, %p6969_p4 }
 0x178   : > { %p5148_p2 = por %p5147_p0, %p5146_p13 }
 0x179   : > { %p5144_p9 = pneg %p5143_p12 }
 0x17a   : > { %p5150_p6 = por %p5149_p3, %p5148_p2 }
 0x17c   : > { %p5151_p1 = pnand %p5150_p6, %p5144_p9 }
 0x17e   : > { %5154 = shalt.err (!%p5151_p1)
}
 0x17f   : > { %s5155_s24 = scalar_lea.vmem %s5908_s29, 256  ;;  %p6970_p11 = pmov %p6969_p4 }
 0x180   : > { %p5156_p10 = scmp.ne.s32.totalorder %s5908_s29, %s5155_s24  ;;  %s5427_s22 = smov [#allocation7]  }
 0x181   : > { %s5160_s19 = sshll.u32 %s5427_s22, 4  ;;  %s5161_s19 = int_to_ptr.vmem [resolvable:$false] %s5160_s19 }
 0x182   : > { %p5158_p8 = pnand %p5156_p10, %p6970_p11  ;;  %s5162_s23 = scalar_lea.vmem %s5161_s19, 512 }
 0x183   : > { %p5163_p4 = scmp.lt.s32.totalorder %s5908_s29, %s5161_s19  ;;  %p5164_p12 = scmp.lt.s32.totalorder %s5162_s23, %s5155_s24 }
 0x184   : > { %p5159_p7 = pneg %p5158_p8 }
 0x185   : > { %p5165_p13 = por %p5164_p12, %p5163_p4 }
 0x187   : > { %p5166_p0 = pnand %p5165_p13, %p5159_p7 }
 0x189   : > { %5169 = shalt.err (!%p5166_p0)
}
 0x18a   : > { %s6971_s0 = sld [smem:[#allocation51_spill]]  ;;  %s6972_s28 = sld [smem:[#allocation47_spill]] }
 0x18b   : > { %s6973_s30 = sld [smem:[#allocation46_spill]]  ;;  %s6974_s11 = sld [smem:[#allocation45_spill]] }
 0x18c   : > { %4368 = dma.hbm_to_vmem [thread:$0]  (!%p6968_p5), %s5905_s18, 256, %s5908_s29, %s5912_s7, %s6911_s5, %s6911_s5, %s6912_s9  }
 0x18d   : > { %s6975_s1 = sadd.s32 1, %s5408_s25  ;;  %p6976_p6 = scmp.eq.s32.totalorder %s5412_s26, 0 }
 0x18e   : > { %p6978_p10 = scmp.eq.s32.totalorder %s5587_s27, 0  ;;  %s3020_s23 = sshll.u32 %s5408_s25, 5 }
 0x18f   : > { %s6981_s12 = sld [smem:[#allocation57_spill]]  ;;  %p6982_p12 = scmp.lt.s32.totalorder %s5412_s26, 4 }
 0x190   : > { %s53_s15 = sadd.s32 1, %s6971_s0  ;;  %s125_s17 = sadd.s32 1, %s6972_s28 }
 0x191   : > { %p54_p9 = scmp.ge.s32.totalorder %s53_s15, 2  ;;  %p132_p2 = scmp.ne.s32.totalorder %s6972_s28, %s6973_s30 }
 0x192   : > { %p138_p3 = scmp.ne.s32.totalorder %s6973_s30, %s6974_s11  ;;  %s592_s7 = sand.u32 1, %s6972_s28  }
 0x193   : > { %s7044_s15 = smov (%p54_p9, %s53_s15), 0  ;;  %s7046_s1 = smov (!%p54_p9, %s6975_s1), %s5408_s25 }
 0x194   : > { %s5954_s2 = ssub.s32 %s6971_s0, %s7044_s15  ;;  %p5958_p5 = por %p132_p2, %p6976_p6 }
 0x195   : > { %p62_p1 = scmp.ge.s32.totalorder %s7046_s1, 2  ;;  %p5964_p11 = por %p138_p3, %p6978_p10 }
 0x196   : > { %s3018_s4 = sshll.u32 %s592_s7, 7  ;;  %s3019_s24 = sshll.u32 %s6971_s0, 4 }
 0x197   : > { %s7048_s1 = smov (%p62_p1, %s7046_s1), 0  ;;  %s6980_s30 = sadd.s32 1, %s5392_s21 }
 0x198   : > { %s64_s22 = ssub.s32 %s5408_s25, %s7048_s1  ;;  %s600_s5 = sadd.s32 %s3020_s23, %s3019_s24 }
 0x199   : > { %p67_p7 = scmp.eq.s32.totalorder %s64_s22, 0  ;;  %s122_s19 = sor.u32 %s5954_s2, %s64_s22 }
 0x19a   : > { %p123_p4 = scmp.eq.s32.totalorder %s122_s19, 0  ;;  %s594_s9 = scalar_lea.vmem [#allocation12], %s3018_s4 }
 0x19b   : > { %s5980_s11 = scalar_select %p67_p7, %s5392_s21, %s6980_s30  }
 0x19c   : > { %s7050_s28 = smov (!%p123_p4, %s6972_s28), %s125_s17  ;;  %s603_s6 = sshll.u32 %s594_s9, 4  ;;  %s5987_s6 = int_to_ptr.vmem [resolvable:$true] %s603_s6 }
 0x19d   : > { %s3021_s8 = sshll.u32 %s600_s5, 7  ;;  %p5998_p13 = pnand %p6982_p12, %p5958_p5 }
 0x19e   : > { %s5992_s13 = scalar_lea.hbm %s6981_s12, %s3021_s8  ;;  %s5175_s9 = scalar_lea.hbm %s6981_s12, 8192 }
 0x19f   : > { %s5170_s5 = scalar_lea.hbm %s5992_s13, 2048  ;;  %p5172_p9 = pneg %p5998_p13 }
 0x1a0   : > { %p5171_p0 = scmp.ne.s32.totalorder %s5992_s13, %s5170_s5  ;;  %p5176_p6 = scmp.lt.u32.totalorder %s5992_s13, %s6981_s12 }
 0x1a1   : > { %p5177_p5 = scmp.lt.u32.totalorder %s5175_s9, %s5170_s5  ;;  %p5179_p10 = scmp.lt.u32.totalorder %s5170_s5, %s5992_s13 }
 0x1a2   : > { %p5173_p2 = pnand %p5172_p9, %p5171_p0 }
 0x1a3   : > { %p5178_p1 = por %p5177_p5, %p5176_p6 }
 0x1a4   : > { %p5174_p3 = pneg %p5173_p2 }
 0x1a5   : > { %p5180_p7 = por %p5179_p10, %p5178_p1 }
 0x1a7   : > { %p5181_p4 = pnand %p5180_p7, %p5174_p3 }
 0x1a9   : > { %5184 = shalt.err (!%p5181_p4)
}
 0x1aa   : > { %s5185_s22 = scalar_lea.vmem %s5987_s6, 2048  ;;  %s5428_s19 = smov [#allocation12]  }
 0x1ab   : > { %p5186_p12 = scmp.ne.s32.totalorder %s5987_s6, %s5185_s22  ;;  %s5190_s23 = sshll.u32 %s5428_s19, 4  ;;  %s5191_s23 = int_to_ptr.vmem [resolvable:$false] %s5190_s23 }
 0x1ac   : > { %s5192_s30 = scalar_lea.vmem %s5191_s23, 4096  ;;  %p5193_p8 = scmp.lt.s32.totalorder %s5987_s6, %s5191_s23 }
 0x1ad   : > { %p5188_p0 = pnand %p5186_p12, %p5172_p9  ;;  %p5194_p6 = scmp.lt.s32.totalorder %s5192_s30, %s5185_s22 }
 0x1af   : > { %p5189_p2 = pneg %p5188_p0  ;;  %p5195_p5 = por %p5194_p6, %p5193_p8 }
 0x1b1   : > { %p5196_p1 = pnand %p5195_p5, %p5189_p2 }
 0x1b3   : > { %5199 = shalt.err (!%p5196_p1)
}
 0x1b4   : > { %s6984_s7 = smov 8   ;;  %s6985_s5 = smov 128  }
 0x1b5   : > { %s6986_s8 = sld [smem:[#allocation44_spill]]  ;;  %s6987_s10 = sld [smem:[#allocation43_spill]] }
 0x1b6   : > { %s6988_s9 = sld [smem:[#allocation42_spill]]  ;;  %p6989_p8 = scmp.eq.s32.totalorder %s5954_s2, 0 }
 0x1b7   : > { %4374 = dma.hbm_to_vmem [thread:$0]  (!%p5998_p13), %s5992_s13, 2048, %s5987_s6, %s5767_s3, %s6985_s5, %s6985_s5, %s6984_s7  }
 0x1b8   : > { %p6990_p10 = scmp.eq.s32.totalorder %s5412_s26, 0  ;;  %p6991_p4 = scmp.eq.s32.totalorder %s5587_s27, 0 }
 0x1b9   : > { %s6993_s30 = sld [smem:[#allocation58_spill]]  ;;  %p6995_p13 = scmp.lt.s32.totalorder %s5412_s26, 4 }
 0x1ba   : > { %s6997_s0 = sand.u32 1, %s5412_s26  }
 0x1bb   : > { %s151_s17 = sadd.s32 1, %s6986_s8  ;;  %p158_p9 = scmp.ne.s32.totalorder %s6986_s8, %s6987_s10 }
 0x1bc   : > { %s6035_s18 = scalar_select %p6989_p8, %s6986_s8, %s151_s17  }
 0x1bd   : > { %p164_p3 = scmp.ne.s32.totalorder %s6987_s10, %s6988_s9  ;;  %s615_s4 = sand.u32 1, %s6986_s8  }
 0x1be   : > { %p160_p7 = por %p158_p9, %p6990_p10  ;;  %s616_s6 = scalar_lea.vmem [#allocation13], %s615_s4 }
 0x1bf   : > { %p6046_p12 = por %p164_p3, %p6991_p4  ;;  %s6994_s12 = smov %s6993_s30 }
 0x1c0   : > { %s6055_s14 = scalar_lea.hbm %s6993_s30, %s3019_s24  ;;  %s623_s13 = sshll.u32 %s616_s6, 4  ;;  %s6063_s13 = int_to_ptr.vmem [resolvable:$true] %s623_s13 }
 0x1c1   : > { %s6992_s22 = scalar_select %p6046_p12, 1, 0 }
 0x1c2   : > { %p6059_p0 = pnand %p6995_p13, %p160_p7  ;;  %s614_s2 = scalar_lea.sflag [#allocation14], %s6997_s0 }
 0x1c3   : > { %s5200_s7 = scalar_lea.hbm %s6055_s14, 16  ;;  %s5205_s8 = scalar_lea.hbm %s6994_s12, 32 }
 0x1c4   : > { %p5201_p2 = scmp.ne.s32.totalorder %s6055_s14, %s5200_s7  ;;  %p5202_p6 = pneg %p6059_p0 }
 0x1c5   : > { %p5206_p8 = scmp.lt.u32.totalorder %s6055_s14, %s6994_s12  ;;  %p5207_p9 = scmp.lt.u32.totalorder %s5205_s8, %s5200_s7 }
 0x1c6   : > { %p5203_p5 = pnand %p5202_p6, %p5201_p2  ;;  %p5209_p10 = scmp.lt.u32.totalorder %s5200_s7, %s6055_s14 }
 0x1c7   : > { %p5208_p3 = por %p5207_p9, %p5206_p8 }
 0x1c8   : > { %p5204_p1 = pneg %p5203_p5 }
 0x1c9   : > { %p5210_p7 = por %p5209_p10, %p5208_p3 }
 0x1cb   : > { %p5211_p4 = pnand %p5210_p7, %p5204_p1 }
 0x1cd   : > { %5214 = shalt.err (!%p5211_p4)
}
 0x1ce   : > { %s5215_s17 = scalar_lea.vmem %s6063_s13, 16  ;;  %s5429_s4 = smov [#allocation13]  }
 0x1cf   : > { %p5216_p13 = scmp.ne.s32.totalorder %s6063_s13, %s5215_s17  ;;  %s5220_s19 = sshll.u32 %s5429_s4, 4  ;;  %s5221_s19 = int_to_ptr.vmem [resolvable:$false] %s5220_s19 }
 0x1d0   : > { %s5222_s23 = scalar_lea.vmem %s5221_s19, 32  ;;  %p5223_p12 = scmp.lt.s32.totalorder %s6063_s13, %s5221_s19 }
 0x1d1   : > { %p5218_p2 = pnand %p5216_p13, %p5202_p6  ;;  %p5224_p8 = scmp.lt.s32.totalorder %s5222_s23, %s5215_s17 }
 0x1d3   : > { %p5219_p5 = pneg %p5218_p2  ;;  %p5225_p9 = por %p5224_p8, %p5223_p12 }
 0x1d5   : > { %p5226_p3 = pnand %p5225_p9, %p5219_p5 }
 0x1d7   : > { %5229 = shalt.err (!%p5226_p3)
}
 0x1d8   : > { %4377 = dma.hbm_to_vmem [thread:$0]  (!%p6059_p0), %s6055_s14, 16, %s6063_s13, %s614_s2  }
 0x1d9   : > { %s6998_s30 = sld [smem:[#allocation52_spill]] }
 0x1df   : > { %p6999_p1 = scmp.ne.s32.totalorder %s6998_s30, 0 }
 0x1e0   : > { %s6095_s6 = sand.u32 (!%p6999_p1), 1, %s5388_s20   ;;  %p7000_p12 = scmp.ne.s32.totalorder (!%p6999_p1), %s6951_s16, 0 }
 0x1e1   : > { %632 = sbr.rel (%p6999_p1) target bundleno = 3672 (0xe58), region = 76  ;;  %s6098_s0 = sshll.u32 (!%p6999_p1), %s6095_s6, 4 }
 0x1e2   : > { %s635_s7 = scalar_lea.sflag (!%p6999_p1), [#allocation8], %s6095_s6  ;;  %s638_s24 = scalar_lea.vmem (!%p6999_p1), [#allocation7], %s6098_s0 }
 0x1e8   : > { %5315 = dma.done.wait (%p7000_p12), %s635_s7, 256  }
 0x1e9   : > { %5317 = vsyncadd (%p7000_p12), %s635_s7, 4294967040  ;;  %s643_s14 = sand.u32 1, %s5587_s27   ;;  %s647_s3 = scalar_lea.vmem [#allocation10], %s6098_s0 }
 0x1ea   : > { %s644_s13 = scalar_lea.sflag [#allocation11], %s643_s14 }
 0x1eb   : > { %5319 = dma.done.wait (%p7000_p12), %s644_s13, 256  }
 0x1ec   : > { %5321 = vsyncadd (%p7000_p12), %s644_s13, 4294967040  ;;  %s7001_s2 = sld [smem:[#allocation46_spill]] }
 0x1f2   : > { %s654_s5 = sand.u32 1, %s7001_s2  }
 0x1f3   : > { %s3026_s8 = sshll.u32 %s654_s5, 7 }
 0x1f4   : > { %s6113_s10 = scalar_lea.vmem [#allocation12], %s3026_s8 }
 0x1f5   : > { %5323 = dma.done.wait (%p5964_p11), %s644_s13, 2048  }
 0x1f6   : > { %5325 = vsyncadd (%p5964_p11), %s644_s13, 4294965248  ;;  %s7002_s9 = sld [smem:[#allocation43_spill]]  ;;  %s662_s4 = scalar_lea.sflag [#allocation14], %s643_s14 }
 0x1f7   : > { %p7003_p0 = scmp.ne.s32.totalorder %s6992_s22, 0 }
 0x1fc   : > { %s663_s17 = sand.u32 1, %s7002_s9  }
 0x1fd   : > { %s6120_s19 = scalar_lea.vmem [#allocation13], %s663_s17 }
 0x1fe   : > { %5327 = dma.done.wait (%p7003_p0), %s662_s4, 16  }
 0x1ff   : > { %5329 = vsyncadd (%p7003_p0), %s662_s4, 4294967280  ;;  %p7004_p6 = scmp.eq.s32.totalorder %s5587_s27, 0 }
 0x201   : > { %5331 = dma.done.wait (%p7004_p6), [#allocation14], 16   ;;  %p7005_p10 = pmov %p7004_p6 }
 0x202   : > { %p7006_p7 = pmov %p7004_p6 }
 0x203   : > { %5333 = vsyncadd (%p7005_p10), [#allocation14], 4294967280 }
 0x204   : > { %5335 = dma.done.wait (%p7006_p7), [#allocation17], 2064   ;;  %p7007_p11 = pmov %p7004_p6 }
 0x205   : > { %p7008_p4 = pmov %p7004_p6 }
 0x206   : > { %5337 = vsyncadd (%p7007_p11), [#allocation17], 4294965232 }
 0x207   : > { %5339 = dma.done.wait (%p7008_p4), [#allocation20], 2064   ;;  %p7009_p13 = pmov %p7008_p4 }
 0x208   : > { %p7010_p2 = pmov %p7008_p4 }
 0x209   : > { %5341 = vsyncadd (%p7009_p13), [#allocation20], 4294965232 }
 0x20a   : > { %5343 = dma.done.wait (%p7010_p2), [#allocation23], 2064   ;;  %p7011_p5 = pmov %p7010_p2 }
 0x20b   : > { %p7012_p8 = pmov %p7010_p2 }
 0x20c   : > { %5345 = vsyncadd (%p7011_p5), [#allocation23], 4294965232 }
 0x20d   : > { %5347 = dma.done.wait (%p7012_p8), [#allocation26], 2064   ;;  %p7013_p9 = pmov %p7010_p2 }
 0x20e   : > { %p7014_p3 = pmov %p7010_p2 }
 0x20f   : > { %5349 = vsyncadd (%p7013_p9), [#allocation26], 4294965232 }
 0x210   : > { %5351 = dma.done.wait (%p7014_p3), [#allocation29], 16   ;;  %p7015_p1 = pmov %p7010_p2 }
 0x211   : > { %s6151_s16 = scalar_lea.vmem [#allocation30], %s6098_s0  ;;  %s7016_s29 = sld [smem:[#allocation49_spill]] }
 0x212   : > { %5353 = vsyncadd (%p7015_p1), [#allocation29], 4294967280 }
 0x217   : > { %p3038_p12 = scmp.ne.s32.totalorder %s7016_s29, 0 }
 0x218   : > { %v771_v0 = vld [vmem:[%s638_s24] sm:$0xff] (!%p3038_p12)  ;;  %v772_v1 = vld [vmem:[%s638_s24 + $0x8] sm:$0xff] (!%p3038_p12)  ;;  %v5430_v54 = vmov (!%p3038_p12), -inf   ;;  %v5431_v55 = vmov (!%p3038_p12), 0.0  }
 0x219   : > { %770 = sbr.rel (%p3038_p12) target bundleno = 1072 (0x430), region = 136  ;;  %773 = vadd.xlane.f32.xlu0 (!%p3038_p12), %v771_v0  ;;  %v820_v2 = vld [vmem:[#allocation18] sm:$0xff] (!%p3038_p12)  ;;  %v821_v3 = vld [vmem:[#allocation18 + $0x8] sm:$0xff] (!%p3038_p12)  ;;  %v822_v4 = vld [vmem:[#allocation18 + $0x10] sm:$0xff] (!%p3038_p12)  ;;  %922 = vst [vmem:[#allocation4] sm:$0xff] (!%p3038_p12), %v5430_v54 }
 0x21a   : > { %v3836_v5 = vpack.c.bf16 (!%p3038_p12), %v821_v3, %v820_v2  ;;  %v823_v6 = vld [vmem:[#allocation18 + $0x18] sm:$0xff] (!%p3038_p12)  ;;  %v824_v16 = vld [vmem:[#allocation18 + $0x20] sm:$0xff] (!%p3038_p12)  ;;  %v825_v17 = vld [vmem:[#allocation18 + $0x28] sm:$0xff] (!%p3038_p12)  ;;  %923 = vst [vmem:[#allocation4 + $0x8] sm:$0xff] (!%p3038_p12), %v5430_v54 }
 0x21b   : > { %v3840_v7 = vpack.c.bf16 (!%p3038_p12), %v823_v6, %v822_v4  ;;  %v3844_v18 = vpack.c.bf16 (!%p3038_p12), %v825_v17, %v824_v16  ;;  %v826_v19 = vld [vmem:[#allocation18 + $0x30] sm:$0xff] (!%p3038_p12)  ;;  %v827_v20 = vld [vmem:[#allocation18 + $0x38] sm:$0xff] (!%p3038_p12)  ;;  %v828_v22 = vld [vmem:[#allocation18 + $0x40] sm:$0xff] (!%p3038_p12)  ;;  %924 = vst [vmem:[#allocation4 + $0x10] sm:$0xff] (!%p3038_p12), %v5430_v54 }
 0x21c   : > { %3837 = vmatprep.subr.bf16.mxu0 (!%p3038_p12), %v3836_v5  ;;  %v3848_v21 = vpack.c.bf16 (!%p3038_p12), %v827_v20, %v826_v19  ;;  %v829_v23 = vld [vmem:[#allocation18 + $0x48] sm:$0xff] (!%p3038_p12)  ;;  %v830_v24 = vld [vmem:[#allocation18 + $0x50] sm:$0xff] (!%p3038_p12)  ;;  %v831_v26 = vld [vmem:[#allocation18 + $0x58] sm:$0xff] (!%p3038_p12)  ;;  %925 = vst [vmem:[#allocation4 + $0x18] sm:$0xff] (!%p3038_p12), %v5430_v54 }
 0x21d   : > { %775 = vadd.xlane.f32.xlu0 (!%p3038_p12), %v772_v1  ;;  %3839 = vmatpush3.bf16.msra.mxu0 (!%p3038_p12), %v3836_v5  ;;  %v3852_v25 = vpack.c.bf16 (!%p3038_p12), %v829_v23, %v828_v22  ;;  %v3856_v27 = vpack.c.bf16 (!%p3038_p12), %v831_v26, %v830_v24  ;;  %v832_v28 = vld [vmem:[#allocation18 + $0x60] sm:$0xff] (!%p3038_p12)  ;;  %v833_v29 = vld [vmem:[#allocation18 + $0x68] sm:$0xff] (!%p3038_p12)  ;;  %v834_v31 = vld [vmem:[#allocation18 + $0x70] sm:$0xff] (!%p3038_p12)  ;;  %926 = vst [vmem:[#allocation4 + $0x20] sm:$0xff] (!%p3038_p12), %v5430_v54 }
 0x21e   : > { %3841 = vmatprep.subr.bf16.mxu0 (!%p3038_p12), %v3840_v7  ;;  %v3860_v30 = vpack.c.bf16 (!%p3038_p12), %v833_v29, %v832_v28  ;;  %v835_v32 = vld [vmem:[#allocation18 + $0x78] sm:$0xff] (!%p3038_p12)  ;;  %927 = vst [vmem:[#allocation4 + $0x28] sm:$0xff] (!%p3038_p12), %v5430_v54  ;;  %928 = vst [vmem:[#allocation4 + $0x30] sm:$0xff] (!%p3038_p12), %v5430_v54  ;;  %v3041_v56 = vld [vmem:[#allocation19] ss:$0 sm:$0xff] (!%p3038_p12) }
 0x21f   : > { %v3864_v33 = vpack.c.bf16 (!%p3038_p12), %v835_v32, %v834_v31  ;;  %v3039_v41 = vld [vmem:[#allocation15] ss:$0 sm:$0xff] (!%p3038_p12)  ;;  %v3040_v43 = vld [vmem:[#allocation16] ss:$0 sm:$0xff] (!%p3038_p12)  ;;  %v817_v51 = vld [vmem:[%s647_s3 + $0x8] sm:$0xff] (!%p3038_p12)  ;;  %929 = vst [vmem:[#allocation4 + $0x38] sm:$0xff] (!%p3038_p12), %v5430_v54 }
 0x220   : > { %v816_v46 = vld [vmem:[%s647_s3] sm:$0xff]  ;;  %930 = vst [vmem:[#allocation5] sm:$0xff] %v5431_v55  ;;  %931 = vst [vmem:[#allocation5 + $0x8] sm:$0xff] %v5431_v55 }
 0x221   : > { %3843 = vmatpush3.bf16.msra.mxu0 %v3840_v7  ;;  %932 = vst [vmem:[#allocation5 + $0x10] sm:$0xff] %v5431_v55  ;;  %933 = vst [vmem:[#allocation5 + $0x18] sm:$0xff] %v5431_v55 }
 0x222   : > { %3845 = vmatprep.subr.bf16.mxu0 %v3844_v18  ;;  %934 = vst [vmem:[#allocation5 + $0x20] sm:$0xff] %v5431_v55  ;;  %935 = vst [vmem:[#allocation5 + $0x28] sm:$0xff] %v5431_v55 }
 0x223   : > { %936 = vst [vmem:[#allocation5 + $0x30] sm:$0xff] %v5431_v55  ;;  %937 = vst [vmem:[#allocation5 + $0x38] sm:$0xff] %v5431_v55 }
 0x224   : > { %938 = vst [vmem:[#allocation6] sm:$0xff] %v5431_v55  ;;  %939 = vst [vmem:[#allocation6 + $0x8] sm:$0xff] %v5431_v55 }
 0x225   : > { %3847 = vmatpush3.bf16.msra.mxu0 %v3844_v18 }
 0x226   : > { %3849 = vmatprep.subr.bf16.mxu0 %v3848_v21 }
 0x229   : > { %3851 = vmatpush3.bf16.msra.mxu0 %v3848_v21 }
 0x22a   : > { %3853 = vmatprep.subr.bf16.mxu0 %v3852_v25 }
 0x22d   : > { %3855 = vmatpush3.bf16.msra.mxu0 %v3852_v25 }
 0x22e   : > { %3857 = vmatprep.subr.bf16.mxu0 %v3856_v27 }
 0x231   : > { %3859 = vmatpush3.bf16.msra.mxu0 %v3856_v27 }
 0x232   : > { %3861 = vmatprep.subr.bf16.mxu0 %v3860_v30 }
 0x235   : > { %3863 = vmatpush3.bf16.msra.mxu0 %v3860_v30 }
 0x236   : > { %3865 = vmatprep.subr.bf16.mxu0 %v3864_v33 }
 0x239   : > { %3867 = vmatpush3.bf16.msra.mxu0 %v3864_v33 }
 0x2a6   : > { %v774_v8 = vpop.xlane.xlu0 %773 }
 0x2a7   : > { %v778_v9 = vmul.f32 0.0078125, %v774_v8 }
 0x2a9   : > { %v780_v10 = vsub.f32 %v771_v0, %v778_v9 }
 0x2aa   : > { %v776_v11 = vpop.xlane.xlu0 %775 }
 0x2ab   : > { %v779_v12 = vmul.f32 0.0078125, %v776_v11  ;;  %v782_v13 = vmul.f32 %v780_v10, %v780_v10 }
 0x2ad   : > { %v781_v14 = vsub.f32 %v772_v1, %v779_v12  ;;  %784 = vadd.xlane.f32.xlu1 %v782_v13 }
 0x2af   : > { %v783_v15 = vmul.f32 %v781_v14, %v781_v14 }
 0x2b1   : > { %786 = vadd.xlane.f32.xlu1 %v783_v15 }
 0x33a   : > { %v785_v34 = vpop.xlane.xlu1 %784 }
 0x33b   : > { %v788_v35 = vmul.f32 0.0078125, %v785_v34 }
 0x33d   : > { %v790_v36 = vadd.f32 1e-05, %v788_v35 }
 0x33e   : > { %v787_v37 = vpop.xlane.xlu1 %786 }
 0x33f   : > { %4538 = vrsqrt.f32 %v790_v36  ;;  %v789_v38 = vmul.f32 0.0078125, %v787_v37 }
 0x341   : > { %v791_v39 = vadd.f32 1e-05, %v789_v38 }
 0x343   : > { %4540 = vrsqrt.f32 %v791_v39 }
 0x349   : > { %v4539_v40 = vpop.eup %4538 }
 0x34a   : > { %v794_v42 = vmul.f32 %v4539_v40, %v780_v10 }
 0x34c   : > { %v803_v44 = vmul.f32 %v3039_v41, %v794_v42 }
 0x34d   : > { %v4541_v45 = vpop.eup %4540 }
 0x34e   : > { %v795_v47 = vmul.f32 %v4541_v45, %v781_v14  ;;  %v812_v48 = vadd.f32 %v3040_v43, %v803_v44 }
 0x350   : > { %v804_v49 = vmul.f32 %v3039_v41, %v795_v47  ;;  %814 = vst [vmem:[#allocation2] sm:$0xff] %v812_v48  ;;  %v818_v50 = vadd.f32 %v816_v46, %v812_v48 }
 0x352   : > { %v813_v52 = vadd.f32 %v3040_v43, %v804_v49  ;;  %3406 = vmatprep.mubr.f32.mxu0 %v818_v50 }
 0x354   : > { %815 = vst [vmem:[#allocation2 + $0x8] sm:$0xff] %v813_v52  ;;  %v819_v53 = vadd.f32 %v817_v51, %v813_v52 }
 0x356   : > { %3407 = vmatmul.mubr.f32.vlgmr.msra.gmra.mrb[0].mxu0 %v819_v53 }
 0x429   : > { %v3408_v57 = vpop.f32.mrb[0].mxu0 }
 0x42a   : > { %v915_v58 = vadd.f32 %v3408_v57, %v3041_v56  ;;  %v909_v59 = vpop.f32.mrb[1].mxu0 }
 0x42b   : > { %v910_v60 = vadd.f32 %v3041_v56, %v909_v59 }
 0x42c   : > { %v919_v61 = vmul.f32 0.17677669, %v915_v58 }
 0x42d   : > { %v918_v62 = vmul.f32 0.17677669, %v910_v60 }
 0x42e   : > { %921 = vst [vmem:[#allocation3 + $0x8] sm:$0xff] %v919_v61 }
 0x42f   : > { %920 = vst [vmem:[#allocation3] sm:$0xff] %v918_v62 }
 0x430 PF: > { %v956_v63 = vld [vmem:[#allocation21] sm:$0xff]  ;;  %v957_v0 = vld [vmem:[#allocation21 + $0x8] sm:$0xff]  ;;  %v958_v1 = vld [vmem:[#allocation21 + $0x10] sm:$0xff]  ;;  %vm1301_vm0 = vcmask 261120   ;;  %s5432_s27 = smov 96   ;;  %s5433_s22 = smov 64  }
 0x431   : > { %v3868_v2 = vpack.c.bf16 %v957_v0, %v956_v63  ;;  %v959_v3 = vld [vmem:[#allocation21 + $0x18] sm:$0xff]  ;;  %v960_v5 = vld [vmem:[#allocation21 + $0x20] sm:$0xff]  ;;  %v961_v6 = vld [vmem:[#allocation21 + $0x28] sm:$0xff]  ;;  %s5434_s23 = smov 32   ;;  %vm2521_vm2 = vcmask 523264   ;;  %vm2524_vm3 = vcmask 785408  }
 0x432   : > { %v3872_v4 = vpack.c.bf16 %v959_v3, %v958_v1  ;;  %v3876_v7 = vpack.c.bf16 %v961_v6, %v960_v5  ;;  %v940_v8 = vld [vmem:[%s6113_s10] sm:$0xff]  ;;  %v962_v9 = vld [vmem:[#allocation21 + $0x30] sm:$0xff]  ;;  %v964_v12 = vld [vmem:[#allocation21 + $0x40] sm:$0xff]  ;;  %s7019_s30 = sld [smem:[#allocation49_spill]] }
 0x433   : > { %3869 = vmatprep.subr.bf16.mxu0 %v3868_v2  ;;  %v963_v10 = vld [vmem:[#allocation21 + $0x38] sm:$0xff]  ;;  %3441 = vmatprep.mubr.f32.mxu0 %v940_v8  ;;  %v965_v13 = vld [vmem:[#allocation21 + $0x48] sm:$0xff]  ;;  %v966_v23 = vld [vmem:[#allocation21 + $0x50] sm:$0xff] }
 0x434   : > { %3871 = vmatpush3.bf16.msra.mxu0 %v3868_v2  ;;  %3497 = vmatprep.mubr.f32.mxu1 %v940_v8  ;;  %v3880_v11 = vpack.c.bf16 %v963_v10, %v962_v9  ;;  %v1124_v14 = vld [vmem:[#allocation24] sm:$0xff]  ;;  %v1125_v15 = vld [vmem:[#allocation24 + $0x8] sm:$0xff]  ;;  %v1126_v16 = vld [vmem:[#allocation24 + $0x10] sm:$0xff]  ;;  %v3884_v20 = vpack.c.bf16 %v965_v13, %v964_v12 }
 0x435   : > { %3873 = vmatprep.subr.bf16.mxu0 %v3872_v4  ;;  %v1127_v17 = vld [vmem:[#allocation24 + $0x18] sm:$0xff]  ;;  %v3900_v18 = vpack.c.bf16 %v1125_v15, %v1124_v14  ;;  %v1128_v21 = vld [vmem:[#allocation24 + $0x20] sm:$0xff]  ;;  %v1129_v22 = vld [vmem:[#allocation24 + $0x28] sm:$0xff] }
 0x436   : > { %v3904_v19 = vpack.c.bf16 %v1127_v17, %v1126_v16  ;;  %v967_v24 = vld [vmem:[#allocation21 + $0x58] sm:$0xff]  ;;  %v3908_v25 = vpack.c.bf16 %v1129_v22, %v1128_v21  ;;  %v968_v29 = vld [vmem:[#allocation21 + $0x60] sm:$0xff]  ;;  %v969_v30 = vld [vmem:[#allocation21 + $0x68] sm:$0xff] }
 0x437   : > { %3901 = vmatprep.subr.bf16.mxu1 %v3900_v18  ;;  %v3888_v26 = vpack.c.bf16 %v967_v24, %v966_v23  ;;  %v1130_v27 = vld [vmem:[#allocation24 + $0x30] sm:$0xff]  ;;  %v1131_v28 = vld [vmem:[#allocation24 + $0x38] sm:$0xff]  ;;  %v3892_v32 = vpack.c.bf16 %v969_v30, %v968_v29  ;;  %v1132_v33 = vld [vmem:[#allocation24 + $0x40] sm:$0xff] }
 0x438   : > { %3875 = vmatpush3.bf16.msra.mxu0 %v3872_v4  ;;  %3903 = vmatpush3.bf16.msra.mxu1 %v3900_v18  ;;  %v3912_v31 = vpack.c.bf16 %v1131_v28, %v1130_v27  ;;  %v1133_v34 = vld [vmem:[#allocation24 + $0x48] sm:$0xff]  ;;  %v971_v36 = vld [vmem:[#allocation21 + $0x78] sm:$0xff]  ;;  %v1136_v42 = vld [vmem:[#allocation24 + $0x60] sm:$0xff]  ;;  %p3120_p0 = scmp.ne.s32.totalorder %s7019_s30, 1 }
 0x439   : > { %3877 = vmatprep.subr.bf16.mxu0 %v3876_v7  ;;  %3905 = vmatprep.subr.bf16.mxu1 %v3904_v19  ;;  %v970_v35 = vld [vmem:[#allocation21 + $0x70] sm:$0xff]  ;;  %v3916_v37 = vpack.c.bf16 %v1133_v34, %v1132_v33  ;;  %v1135_v40 = vld [vmem:[#allocation24 + $0x58] sm:$0xff]  ;;  %v942_v46 = vld [vmem:[%s6113_s10 + $0x10] sm:$0xff]  ;;  %s5435_s0 = smov (!%p3120_p0), 64   ;;  %s5436_s7 = smov (!%p3120_p0), 32  }
 0x43a   : > { %v3896_v38 = vpack.c.bf16 %v971_v36, %v970_v35  ;;  %v1134_v39 = vld [vmem:[#allocation24 + $0x50] sm:$0xff]  ;;  %v1137_v43 = vld [vmem:[#allocation24 + $0x68] sm:$0xff]  ;;  %v941_v44 = vld [vmem:[%s6113_s10 + $0x8] sm:$0xff]  ;;  %s5437_s24 = smov (!%p3120_p0), 96  }
 0x43b   : > { %v3920_v41 = vpack.c.bf16 %v1135_v40, %v1134_v39  ;;  %v3924_v45 = vpack.c.bf16 %v1137_v43, %v1136_v42  ;;  %v1138_v47 = vld [vmem:[#allocation24 + $0x70] sm:$0xff]  ;;  %v1139_v48 = vld [vmem:[#allocation24 + $0x78] sm:$0xff]  ;;  %v946_v53 = vld [vmem:[%s6113_s10 + $0x30] sm:$0xff] }
 0x43c   : > { %3879 = vmatpush3.bf16.msra.mxu0 %v3876_v7  ;;  %3907 = vmatpush3.bf16.msra.mxu1 %v3904_v19  ;;  %v943_v49 = vld [vmem:[%s6113_s10 + $0x18] sm:$0xff]  ;;  %v3928_v50 = vpack.c.bf16 %v1139_v48, %v1138_v47  ;;  %v944_v51 = vld [vmem:[%s6113_s10 + $0x20] sm:$0xff]  ;;  %v945_v52 = vld [vmem:[%s6113_s10 + $0x28] sm:$0xff] }
 0x43d   : > { %3881 = vmatprep.subr.bf16.mxu0 %v3880_v11  ;;  %3909 = vmatprep.subr.bf16.mxu1 %v3908_v25  ;;  %v947_v54 = vld [vmem:[%s6113_s10 + $0x38] sm:$0xff]  ;;  %v948_v55 = vld [vmem:[%s6113_s10 + $0x40] sm:$0xff]  ;;  %v949_v56 = vld [vmem:[%s6113_s10 + $0x48] sm:$0xff] }
 0x43e   : > { %v950_v57 = vld [vmem:[%s6113_s10 + $0x50] sm:$0xff]  ;;  %v951_v58 = vld [vmem:[%s6113_s10 + $0x58] sm:$0xff]  ;;  %v952_v59 = vld [vmem:[%s6113_s10 + $0x60] sm:$0xff] }
 0x43f   : > { %v953_v60 = vld [vmem:[%s6113_s10 + $0x68] sm:$0xff]  ;;  %v954_v61 = vld [vmem:[%s6113_s10 + $0x70] sm:$0xff]  ;;  %v955_v62 = vld [vmem:[%s6113_s10 + $0x78] sm:$0xff] }
 0x440   : > { %3883 = vmatpush3.bf16.msra.mxu0 %v3880_v11  ;;  %3911 = vmatpush3.bf16.msra.mxu1 %v3908_v25  ;;  %v6178_v63 = vld [vmem:[#allocation3] sm:$0xff]  ;;  %v6182_v0 = vld [vmem:[#allocation22] ss:$0 sm:$0xff]  ;;  %vm6188_vm1 = vmpackc.low %vm1301_vm0, %vm1301_vm0 }
 0x441   : > { %3885 = vmatprep.subr.bf16.mxu0 %v3884_v20  ;;  %3913 = vmatprep.subr.bf16.mxu1 %v3912_v31  ;;  %v6205_v17 = vld [vmem:[#allocation25] ss:$0 sm:$0xff] }
 0x444   : > { %3887 = vmatpush3.bf16.msra.mxu0 %v3884_v20  ;;  %3915 = vmatpush3.bf16.msra.mxu1 %v3912_v31 }
 0x445   : > { %3889 = vmatprep.subr.bf16.mxu0 %v3888_v26  ;;  %3917 = vmatprep.subr.bf16.mxu1 %v3916_v37 }
 0x448   : > { %3891 = vmatpush3.bf16.msra.mxu0 %v3888_v26  ;;  %3919 = vmatpush3.bf16.msra.mxu1 %v3916_v37 }
 0x449   : > { %3893 = vmatprep.subr.bf16.mxu0 %v3892_v32  ;;  %3921 = vmatprep.subr.bf16.mxu1 %v3920_v41 }
 0x44c   : > { %3895 = vmatpush3.bf16.msra.mxu0 %v3892_v32  ;;  %3923 = vmatpush3.bf16.msra.mxu1 %v3920_v41 }
 0x44d   : > { %3897 = vmatprep.subr.bf16.mxu0 %v3896_v38  ;;  %3925 = vmatprep.subr.bf16.mxu1 %v3924_v45 }
 0x450   : > { %3899 = vmatpush3.bf16.msra.mxu0 %v3896_v38  ;;  %3927 = vmatpush3.bf16.msra.mxu1 %v3924_v45 }
 0x451   : > { %3929 = vmatprep.subr.bf16.mxu1 %v3928_v50 }
 0x453   : > { %3442 = vmatmul.mubr.f32.vlgmr.msra.gmra.mrb[0].mxu0 %v941_v44 }
 0x454   : > { %3444 = vmatprep.mubr.f32.mxu0 %v942_v46  ;;  %3931 = vmatpush3.bf16.msra.mxu1 %v3928_v50 }
 0x457   : > { %3445 = vmatmul.mubr.f32.gmra.mrb[2].mxu0 %v943_v49  ;;  %3498 = vmatmul.mubr.f32.vlgmr.msra.gmra.mrb[0].mxu1 %v941_v44 }
 0x458   : > { %3447 = vmatprep.mubr.f32.mxu0 %v944_v51  ;;  %3500 = vmatprep.mubr.f32.mxu1 %v942_v46 }
 0x45b   : > { %3448 = vmatmul.mubr.f32.gmra.mrb[4].mxu0 %v945_v52  ;;  %3501 = vmatmul.mubr.f32.gmra.mrb[2].mxu1 %v943_v49 }
 0x45c   : > { %3450 = vmatprep.mubr.f32.mxu0 %v946_v53  ;;  %3503 = vmatprep.mubr.f32.mxu1 %v944_v51 }
 0x45f   : > { %3451 = vmatmul.mubr.f32.gmra.mrb[6].mxu0 %v947_v54  ;;  %3504 = vmatmul.mubr.f32.gmra.mrb[4].mxu1 %v945_v52 }
 0x460   : > { %3453 = vmatprep.mubr.f32.mxu0 %v948_v55  ;;  %3506 = vmatprep.mubr.f32.mxu1 %v946_v53 }
 0x463   : > { %3454 = vmatmul.mubr.f32.gmra.mrb[8].mxu0 %v949_v56  ;;  %3507 = vmatmul.mubr.f32.gmra.mrb[6].mxu1 %v947_v54 }
 0x464   : > { %3456 = vmatprep.mubr.f32.mxu0 %v950_v57  ;;  %3509 = vmatprep.mubr.f32.mxu1 %v948_v55 }
 0x467   : > { %3457 = vmatmul.mubr.f32.gmra.mrb[10].mxu0 %v951_v58  ;;  %3510 = vmatmul.mubr.f32.gmra.mrb[8].mxu1 %v949_v56 }
 0x468   : > { %3459 = vmatprep.mubr.f32.mxu0 %v952_v59  ;;  %3512 = vmatprep.mubr.f32.mxu1 %v950_v57 }
 0x46b   : > { %3460 = vmatmul.mubr.f32.gmra.mrb[12].mxu0 %v953_v60  ;;  %3513 = vmatmul.mubr.f32.gmra.mrb[10].mxu1 %v951_v58 }
 0x46c   : > { %3462 = vmatprep.mubr.f32.mxu0 %v954_v61  ;;  %3515 = vmatprep.mubr.f32.mxu1 %v952_v59 }
 0x46f   : > { %3463 = vmatmul.mubr.f32.gmra.mrb[14].mxu0 %v955_v62  ;;  %3516 = vmatmul.mubr.f32.gmra.mrb[12].mxu1 %v953_v60 }
 0x470   : > { %3518 = vmatprep.mubr.f32.mxu1 %v954_v61  ;;  %3553 = vmatprep.mubr.msk.f32.mxu0 %vm1301_vm0, %v6178_v63 }
 0x473   : > { %3519 = vmatmul.mubr.f32.gmra.mrb[14].mxu1 %v955_v62 }
 0x526   : > { %v3443_v1 = vpop.f32.mrb[0].mxu0 }
 0x527   : > { %v1051_v2 = vadd.f32 %v3443_v1, %v6182_v0  ;;  %v1045_v3 = vpop.f32.mrb[1].mxu0 }
 0x528   : > { %v1046_v4 = vadd.f32 %v6182_v0, %v1045_v3 }
 0x52a   : > { %v6192_v6 = vpack.i.bf16 %v1051_v2, %v1046_v4  ;;  %v3932_v7 = vpack.c.bf16 %v1051_v2, %v1046_v4  ;;  %v3446_v8 = vpop.f32.mrb[2].mxu0  ;;  %v3499_v19 = vpop.f32.mrb[0].mxu1 }
 0x52b   : > { %v1061_v9 = vadd.f32 %v3446_v8, %v6182_v0  ;;  %v1055_v10 = vpop.f32.mrb[3].mxu0  ;;  %v6213_v22 = vadd.f32 %v3499_v19, %v6205_v17  ;;  %v1213_v23 = vpop.f32.mrb[1].mxu1 }
 0x52c   : > { %4543 = vrot.lane.b32.xlu1 %v6192_v6, %s5432_s27  ;;  %3934 = vmatprep.subr.msk.bf16.mxu0 %vm6188_vm1, %v3932_v7  ;;  %v1056_v11 = vadd.f32 %v6182_v0, %v1055_v10  ;;  %v6219_v27 = vadd.f32 %v6205_v17, %v1213_v23 }
 0x52d   : > { %3937 = vmatpush3.bf16.xpose.msk.msra.mxu0 %vm6188_vm1, %v3932_v7 }
 0x52e   : > { %v6202_v12 = vpack.i.bf16 %v1061_v9, %v1056_v11  ;;  %v3938_v13 = vpack.c.bf16 %v1061_v9, %v1056_v11  ;;  %v3449_v14 = vpop.f32.mrb[4].mxu0  ;;  %v3502_v29 = vpop.f32.mrb[2].mxu1  ;;  %v3980_v30 = vpack.c.bf16 %v6213_v22, %v6219_v27 }
 0x52f   : > { %v1071_v15 = vadd.f32 %v3449_v14, %v6182_v0  ;;  %v1065_v16 = vpop.f32.mrb[5].mxu0  ;;  %v6231_v34 = vadd.f32 %v3502_v29, %v6205_v17  ;;  %v1223_v35 = vpop.f32.mrb[3].mxu1 }
 0x530   : > { %4548 = vrot.lane.b32.xlu1 %v6202_v12, %s5432_s27  ;;  %3940 = vmatprep.subr.msk.bf16.mxu0 %vm6188_vm1, %v3938_v13  ;;  %v1066_v18 = vadd.f32 %v6182_v0, %v1065_v16  ;;  %v6235_v38 = vadd.f32 %v6205_v17, %v1223_v35 }
 0x531   : > { %3981 = vmatprep.subr.bf16.mxu1 %v3980_v30 }
 0x532   : > { %v3944_v20 = vpack.c.bf16 %v1071_v15, %v1066_v18  ;;  %v3452_v21 = vpop.f32.mrb[6].mxu0  ;;  %v6215_v24 = vpack.i.bf16 %v1071_v15, %v1066_v18  ;;  %3983 = vmatpush3.bf16.msra.mxu1 %v3980_v30  ;;  %v3505_v40 = vpop.f32.mrb[4].mxu1  ;;  %v3984_v41 = vpack.c.bf16 %v6231_v34, %v6235_v38 }
 0x533   : > { %v1081_v25 = vadd.f32 %v3452_v21, %v6182_v0  ;;  %v1075_v26 = vpop.f32.mrb[7].mxu0  ;;  %v6245_v45 = vadd.f32 %v3505_v40, %v6205_v17  ;;  %v1233_v46 = vpop.f32.mrb[5].mxu1 }
 0x534   : > { %v1076_v28 = vadd.f32 %v6182_v0, %v1075_v26  ;;  %v6249_v49 = vadd.f32 %v6205_v17, %v1233_v46  ;;  %3985 = vmatprep.subr.bf16.mxu1 %v3984_v41  ;;  %v6346_v46 = vld [vmem:[%s6120_s19] ss:$0 sm:$0xff] }
 0x535   : > { %3943 = vmatpush3.bf16.xpose.msk.msra.mxu0 %vm6188_vm1, %v3938_v13 }
 0x536   : > { %3946 = vmatprep.subr.msk.bf16.mxu0 %vm6188_vm1, %v3944_v20  ;;  %v6228_v31 = vpack.i.bf16 %v1081_v25, %v1076_v28  ;;  %v3950_v32 = vpack.c.bf16 %v1081_v25, %v1076_v28  ;;  %v3455_v33 = vpop.f32.mrb[8].mxu0  ;;  %3987 = vmatpush3.bf16.msra.mxu1 %v3984_v41  ;;  %v3508_v51 = vpop.f32.mrb[6].mxu1  ;;  %v3988_v52 = vpack.c.bf16 %v6245_v45, %v6249_v49 }
 0x537   : > { %v1091_v36 = vadd.f32 %v3455_v33, %v6182_v0  ;;  %v1085_v37 = vpop.f32.mrb[9].mxu0  ;;  %v6263_v56 = vadd.f32 %v3508_v51, %v6205_v17  ;;  %v1243_v57 = vpop.f32.mrb[7].mxu1 }
 0x538   : > { %4558 = vrot.lane.b32.xlu1 %v6228_v31, %s5432_s27  ;;  %v1086_v39 = vadd.f32 %v6182_v0, %v1085_v37  ;;  %v6267_v60 = vadd.f32 %v6205_v17, %v1243_v57  ;;  %3989 = vmatprep.subr.bf16.mxu1 %v3988_v52 }
 0x53a   : > { %v6242_v42 = vpack.i.bf16 %v1091_v36, %v1086_v39  ;;  %v3956_v43 = vpack.c.bf16 %v1091_v36, %v1086_v39  ;;  %v3458_v44 = vpop.f32.mrb[10].mxu0  ;;  %3991 = vmatpush3.bf16.msra.mxu1 %v3988_v52  ;;  %v3511_v62 = vpop.f32.mrb[8].mxu1  ;;  %v3992_v1 = vpack.c.bf16 %v6263_v56, %v6267_v60  ;;  %v6364_v52 = vpack.i.bf16 %v6231_v34, %v6235_v38 }
 0x53b   : > { %v1101_v47 = vadd.f32 %v3458_v44, %v6182_v0  ;;  %v1095_v48 = vpop.f32.mrb[11].mxu0  ;;  %v6277_v7 = vadd.f32 %v3511_v62, %v6205_v17  ;;  %v1253_v8 = vpop.f32.mrb[9].mxu1  ;;  %v6341_v44 = vpack.i.bf16 %v6263_v56, %v6267_v60 }
 0x53c   : > { %4563 = vrot.lane.b32.xlu1 %v6242_v42, %s5432_s27  ;;  %v1096_v50 = vadd.f32 %v6182_v0, %v1095_v48  ;;  %v6281_v11 = vadd.f32 %v6205_v17, %v1253_v8  ;;  %3993 = vmatprep.subr.bf16.mxu1 %v3992_v1 }
 0x53d   : > { %3949 = vmatpush3.bf16.xpose.msk.msra.mxu0 %vm6188_vm1, %v3944_v20 }
 0x53e   : > { %3952 = vmatprep.subr.msk.bf16.mxu0 %vm6188_vm1, %v3950_v32  ;;  %v6260_v53 = vpack.i.bf16 %v1101_v47, %v1096_v50  ;;  %v3962_v54 = vpack.c.bf16 %v1101_v47, %v1096_v50  ;;  %v3461_v55 = vpop.f32.mrb[12].mxu0  ;;  %3995 = vmatpush3.bf16.msra.mxu1 %v3992_v1  ;;  %v3514_v14 = vpop.f32.mrb[10].mxu1  ;;  %v3996_v15 = vpack.c.bf16 %v6277_v7, %v6281_v11  ;;  %v6390_v1 = vld [vmem:[#allocation4] sm:$0xff] }
 0x53f   : > { %v1111_v58 = vadd.f32 %v3461_v55, %v6182_v0  ;;  %v1105_v59 = vpop.f32.mrb[13].mxu0  ;;  %v1269_v19 = vadd.f32 %v3514_v14, %v6205_v17  ;;  %v1263_v20 = vpop.f32.mrb[11].mxu1  ;;  %v6376_v55 = vpack.i.bf16 %v6277_v7, %v6281_v11  ;;  %v6395_v7 = vld [vmem:[#allocation4 + $0x8] sm:$0xff] }
 0x540   : > { %4568 = vrot.lane.b32.xlu1 %v6260_v53, %s5432_s27  ;;  %v1106_v61 = vadd.f32 %v6182_v0, %v1105_v59  ;;  %v1264_v21 = vadd.f32 %v6205_v17, %v1263_v20  ;;  %3997 = vmatprep.subr.bf16.mxu1 %v3996_v15 }
 0x542   : > { %v6274_v2 = vpack.i.bf16 %v1111_v58, %v1106_v61  ;;  %v3968_v3 = vpack.c.bf16 %v1111_v58, %v1106_v61  ;;  %v3464_v4 = vpop.f32.mrb[14].mxu0  ;;  %3999 = vmatpush3.bf16.msra.mxu1 %v3996_v15  ;;  %v4000_v23 = vpack.c.bf16 %v1269_v19, %v1264_v21 }
 0x543   : > { %v1121_v9 = vadd.f32 %v3464_v4, %v6182_v0  ;;  %v1115_v10 = vpop.f32.mrb[15].mxu0 }
 0x544   : > { %4573 = vrot.lane.b32.xlu1 %v6274_v2, %s5432_s27  ;;  %v1116_v13 = vadd.f32 %v6182_v0, %v1115_v10  ;;  %v3517_v0 = vpop.f32.mrb[12].mxu1  ;;  %4001 = vmatprep.subr.bf16.mxu1 %v4000_v23 }
 0x545   : > { %3955 = vmatpush3.bf16.xpose.msk.msra.mxu0 %vm6188_vm1, %v3950_v32  ;;  %v1279_v25 = vadd.f32 %v3517_v0, %v6205_v17  ;;  %v1273_v26 = vpop.f32.mrb[13].mxu1 }
 0x546   : > { %3958 = vmatprep.subr.msk.bf16.mxu0 %vm6188_vm1, %v3956_v43  ;;  %v6292_v16 = vpack.i.bf16 %v1121_v9, %v1116_v13  ;;  %v3974_v18 = vpack.c.bf16 %v1121_v9, %v1116_v13  ;;  %v1274_v28 = vadd.f32 %v6205_v17, %v1273_v26  ;;  %4003 = vmatpush3.bf16.msra.mxu1 %v4000_v23  ;;  %v3520_v29 = vpop.f32.mrb[14].mxu1 }
 0x547   : > { %v6307_v32 = vadd.f32 %v3520_v29, %v6205_v17  ;;  %v1283_v33 = vpop.f32.mrb[15].mxu1 }
 0x548   : > { %4578 = vrot.lane.b32.xlu1 %v6292_v16, %s5432_s27  ;;  %v4004_v30 = vpack.c.bf16 %v1279_v25, %v1274_v28  ;;  %v6310_v35 = vadd.f32 %v6205_v17, %v1283_v33  ;;  %v6324_v17 = vld [vmem:[#allocation3 + $0x8] sm:$0xff]  ;;  %v6354_v51 = vpack.i.bf16 %v1279_v25, %v1274_v28 }
 0x54a   : > { %4005 = vmatprep.subr.bf16.mxu1 %v4004_v30  ;;  %v4008_v36 = vpack.c.bf16 %v6307_v32, %v6310_v35 }
 0x54b   : > { %4007 = vmatpush3.bf16.msra.mxu1 %v4004_v30 }
 0x54c   : > { %1547 = vrot.lane.b32.xlu1 %v6178_v63, %s5432_s27  ;;  %4009 = vmatprep.subr.bf16.mxu1 %v4008_v36 }
 0x54d   : > { %3961 = vmatpush3.bf16.xpose.msk.msra.mxu0 %vm6188_vm1, %v3956_v43  ;;  %v6335_v43 = vpack.i.bf16 %v6213_v22, %v6219_v27  ;;  %v6350_v27 = vpack.i.bf16 %v1269_v19, %v1264_v21 }
 0x54e   : > { %3964 = vmatprep.subr.msk.bf16.mxu0 %vm6188_vm1, %v3962_v54 }
 0x54f   : > { %4011 = vmatpush3.bf16.msra.mxu1 %v4008_v36 }
 0x550   : > { %4583 = vrot.lane.b32.xlu1 %v6335_v43, %s5432_s27 }
 0x554   : > { %4598 = vrot.lane.b32.xlu1 %v6341_v44, %s5432_s27 }
 0x555   : > { %3967 = vmatpush3.bf16.xpose.msk.msra.mxu0 %vm6188_vm1, %v3962_v54  ;;  %v6370_v54 = vpack.i.bf16 %v6245_v45, %v6249_v49 }
 0x556   : > { %3970 = vmatprep.subr.msk.bf16.mxu0 %vm6188_vm1, %v3968_v3 }
 0x558   : > { %4608 = vrot.lane.b32.xlu1 %v6350_v27, %s5432_s27 }
 0x55c   : > { %4613 = vrot.lane.b32.xlu1 %v6354_v51, %s5432_s27 }
 0x55d   : > { %3973 = vmatpush3.bf16.xpose.msk.msra.mxu0 %vm6188_vm1, %v3968_v3 }
 0x55e   : > { %3976 = vmatprep.subr.msk.bf16.mxu0 %vm6188_vm1, %v3974_v18 }
 0x565   : > { %3979 = vmatpush3.bf16.xpose.msk.msra.mxu0 %vm6188_vm1, %v3974_v18 }
 0x56c   : > { %3554 = vmatmul.mubr.msk.f32.vlgmr.msra.gmra.mrb[16].mxu0 %vm1301_vm0, %v6324_v17 }
 0x59e   : > { %v4544_v37 = vpop.permute.xlu1 %4543 }
 0x59f   : > { %v4546_v39 = vunpack.i.h.bf16 %v4544_v37  ;;  %v4545_v40 = vunpack.i.l.bf16 %v4544_v37 }
 0x5a1   : > { %v6328_v41 = vpack.c.bf16 %v4546_v39, %v4545_v40 }
 0x5a2   : > { %v4549_v56 = vpop.permute.xlu1 %4548 }
 0x5a3   : > { %4014 = vmatprep.subr.msk.bf16.mxu1 %vm6188_vm1, %v6328_v41  ;;  %v4551_v28 = vunpack.i.h.bf16 %v4549_v56  ;;  %v4550_v29 = vunpack.i.l.bf16 %v4549_v56 }
 0x5aa   : > { %v6380_v34 = vpop.permute.xlu1 %4558 }
 0x5ae   : > { %v6382_v38 = vpop.permute.xlu1 %4563 }
 0x5b2   : > { %v6384_v57 = vpop.permute.xlu1 %4568 }
 0x5b6   : > { %v6386_v58 = vpop.permute.xlu1 %4573 }
 0x5ba   : > { %v6388_v45 = vpop.permute.xlu1 %4578 }
 0x5be   : > { %v1548_v49 = vpop.permute.xlu1 %1547 }
 0x5c2   : > { %v4584_v59 = vpop.permute.xlu1 %4583 }
 0x5c3   : > { %v4586_v60 = vunpack.i.h.bf16 %v4584_v59  ;;  %v4585_v61 = vunpack.i.l.bf16 %v4584_v59 }
 0x5c5   : > { %v4060_v62 = vpack.c.bf16 %v4586_v60, %v4585_v61 }
 0x5c6   : > { %v4599_v0 = vpop.permute.xlu1 %4598 }
 0x5c7   : > { %4061 = vmatprep.subr.bf16.mxu0 %v4060_v62  ;;  %v4601_v33 = vunpack.i.h.bf16 %v4599_v0  ;;  %v4600_v36 = vunpack.i.l.bf16 %v4599_v0  ;;  %v4561_v0 = vunpack.i.h.bf16 %v6380_v34 }
 0x5c8   : > { %4063 = vmatpush3.bf16.msra.mxu0 %v4060_v62 }
 0x5c9   : > { %v4072_v59 = vpack.c.bf16 %v4601_v33, %v4600_v36  ;;  %v4570_v33 = vunpack.i.l.bf16 %v6384_v57 }
 0x63f   : > { %v3555_v47 = vpop.f32.mrb[16].mxu0 }
 0x640   : > { %v1422_v48 = vpop.f32.mrb[17].mxu0  ;;  %v1428_v22 = vadd.f32 %v3555_v47, %v6346_v46 }
 0x641   : > { %v1423_v50 = vadd.f32 %v6346_v46, %v1422_v48  ;;  %v4609_v48 = vpop.permute.xlu1 %4608 }
 0x642   : > { %v4611_v62 = vunpack.i.h.bf16 %v4609_v48 }
 0x643   : > { %1433 = vmax.xlane.f32.xlu0 %v1423_v50 }
 0x647   : > { %1435 = vmax.xlane.f32.xlu0 %v1428_v22 }
 0x65d   : > { %4553 = vrot.lane.b32.xlu0 %v6215_v24, %s5432_s27 }
 0x661   : > { %1549 = vrot.lane.b32.xlu0 %v6324_v17, %s5432_s27 }
 0x665   : > { %4588 = vrot.lane.b32.xlu0 %v6364_v52, %s5432_s27 }
 0x669   : > { %4593 = vrot.lane.b32.xlu0 %v6370_v54, %s5432_s27 }
 0x66d   : > { %4603 = vrot.lane.b32.xlu0 %v6376_v55, %s5432_s27 }
 0x6d0   : > { %v1434_v3 = vpop.xlane.xlu0 %1433 }
 0x6d1   : > { %v6393_v4 = vmax.f32 %v6390_v1, %v1434_v3 }
 0x6d3   : > { %v1439_v8 = vsub.f32 %v6390_v1, %v6393_v4  ;;  %v1445_v9 = vsub.f32 %v1423_v50, %v6393_v4  ;;  %1463 = vst [vmem:[#allocation4] sm:$0xff] %v6393_v4  ;;  %v4018_v50 = vpack.c.bf16 %v4551_v28, %v4550_v29  ;;  %v4566_v28 = vunpack.i.h.bf16 %v6382_v38 }
 0x6d4   : > { %v1436_v10 = vpop.xlane.xlu0 %1435  ;;  %v4565_v29 = vunpack.i.l.bf16 %v6382_v38  ;;  %v4576_v38 = vunpack.i.h.bf16 %v6386_v58 }
 0x6d5   : > { %v1447_v11 = vmul.f32 1.442695, %v1445_v9  ;;  %v6402_v13 = vmax.f32 %v6395_v7, %v1436_v10 }
 0x6d7   : > { %v1440_v14 = vsub.f32 %v6395_v7, %v6402_v13  ;;  %v1446_v15 = vsub.f32 %v1428_v22, %v6402_v13  ;;  %1464 = vst [vmem:[#allocation4 + $0x8] sm:$0xff] %v6402_v13  ;;  %4782 = vpow2.f32 %v1447_v11  ;;  %v4610_v11 = vunpack.i.l.bf16 %v4609_v48 }
 0x6d8   : > { %v4554_v18 = vpop.permute.xlu0 %4553 }
 0x6d9   : > { %v1449_v19 = vmul.f32 1.442695, %v1446_v15  ;;  %v4556_v3 = vunpack.i.h.bf16 %v4554_v18  ;;  %v4555_v9 = vunpack.i.l.bf16 %v4554_v18  ;;  %v4614_v15 = vpop.permute.xlu1 %4613  ;;  %v4560_v18 = vunpack.i.l.bf16 %v6380_v34 }
 0x6da   : > { %v4571_v34 = vunpack.i.h.bf16 %v6384_v57  ;;  %v4581_v57 = vunpack.i.h.bf16 %v6388_v45 }
 0x6db   : > { %4784 = vpow2.f32 %v1449_v19  ;;  %v4024_v19 = vpack.c.bf16 %v4556_v3, %v4555_v9 }
 0x6dc   : > { %v6408_v20 = vpop.permute.xlu0 %1549  ;;  %v4042_v36 = vpack.c.bf16 %v4571_v34, %v4570_v33 }
 0x6e0   : > { %v4589_v21 = vpop.permute.xlu0 %4588 }
 0x6e1   : > { %v4591_v23 = vunpack.i.h.bf16 %v4589_v21  ;;  %v4590_v25 = vunpack.i.l.bf16 %v4589_v21  ;;  %v6410_v26 = vpop.eup %4782  ;;  %v4615_v21 = vunpack.i.l.bf16 %v4614_v15 }
 0x6e2   : > { %3588 = vmatprep.mubr.f32.mxu1 %v6410_v26 }
 0x6e3   : > { %v4064_v30 = vpack.c.bf16 %v4591_v23, %v4590_v25  ;;  %v4030_v25 = vpack.c.bf16 %v4561_v0, %v4560_v18 }
 0x6e4   : > { %v4594_v37 = vpop.permute.xlu0 %4593 }
 0x6e5   : > { %v4596_v39 = vunpack.i.h.bf16 %v4594_v37  ;;  %v4595_v40 = vunpack.i.l.bf16 %v4594_v37  ;;  %4065 = vmatprep.subr.bf16.mxu0 %v4064_v30  ;;  %v6413_v47 = vpop.eup %4784  ;;  %v4575_v37 = vunpack.i.l.bf16 %v6386_v58 }
 0x6e6   : > { %4067 = vmatpush3.bf16.msra.mxu0 %v4064_v30  ;;  %3589 = vmatmul.mubr.f32.vlgmr.msra.gmra.mrb[16].mxu1 %v6413_v47  ;;  %v4036_v30 = vpack.c.bf16 %v4566_v28, %v4565_v29 }
 0x6e7   : > { %v4068_v22 = vpack.c.bf16 %v4596_v39, %v4595_v40  ;;  %4017 = vmatpush3.bf16.xpose.msk.msra.mxu1 %vm6188_vm1, %v6328_v41  ;;  %3623 = vmatprep.mubr.msk.f32.mxu1 %vm1301_vm0, %v1548_v49  ;;  %v4080_v41 = vpack.c.bf16 %v4611_v62, %v4610_v11  ;;  %v4616_v49 = vunpack.i.h.bf16 %v4614_v15  ;;  %v4048_v39 = vpack.c.bf16 %v4576_v38, %v4575_v37 }
 0x6e8   : > { %v4604_v56 = vpop.permute.xlu0 %4603  ;;  %4020 = vmatprep.subr.msk.bf16.mxu1 %vm6188_vm1, %v4018_v50  ;;  %v4580_v40 = vunpack.i.l.bf16 %v6388_v45 }
 0x6e9   : > { %4069 = vmatprep.subr.bf16.mxu0 %v4068_v22  ;;  %v4606_v60 = vunpack.i.h.bf16 %v4604_v56  ;;  %v4605_v61 = vunpack.i.l.bf16 %v4604_v56  ;;  %v4084_v23 = vpack.c.bf16 %v4616_v49, %v4615_v21 }
 0x6ea   : > { %4071 = vmatpush3.bf16.msra.mxu0 %v4068_v22  ;;  %v4054_v48 = vpack.c.bf16 %v4581_v57, %v4580_v40 }
 0x6eb   : > { %v4076_v10 = vpack.c.bf16 %v4606_v60, %v4605_v61  ;;  %4073 = vmatprep.subr.bf16.mxu0 %v4072_v59  ;;  %v6470_v60 = vpack.i.bf16 %v6307_v32, %v6310_v35  ;;  %v6506_v32 = vld [vmem:[#allocation4 + $0x18] sm:$0xff]  ;;  %v6508_v35 = vld [vmem:[#allocation4 + $0x10] sm:$0xff] }
 0x6ee   : > { %4075 = vmatpush3.bf16.msra.mxu0 %v4072_v59 }
 0x6ef   : > { %4077 = vmatprep.subr.bf16.mxu0 %v4076_v10  ;;  %4023 = vmatpush3.bf16.xpose.msk.msra.mxu1 %vm6188_vm1, %v4018_v50 }
 0x6f0   : > { %4026 = vmatprep.subr.msk.bf16.mxu1 %vm6188_vm1, %v4024_v19 }
 0x6f2   : > { %4079 = vmatpush3.bf16.msra.mxu0 %v4076_v10 }
 0x6f3   : > { %4081 = vmatprep.subr.bf16.mxu0 %v4080_v41 }
 0x6f6   : > { %4083 = vmatpush3.bf16.msra.mxu0 %v4080_v41 }
 0x6f7   : > { %4085 = vmatprep.subr.bf16.mxu0 %v4084_v23  ;;  %4029 = vmatpush3.bf16.xpose.msk.msra.mxu1 %vm6188_vm1, %v4024_v19 }
 0x6f8   : > { %4032 = vmatprep.subr.msk.bf16.mxu1 %vm6188_vm1, %v4030_v25 }
 0x6fa   : > { %4087 = vmatpush3.bf16.msra.mxu0 %v4084_v23 }
 0x6ff   : > { %4035 = vmatpush3.bf16.xpose.msk.msra.mxu1 %vm6188_vm1, %v4030_v25 }
 0x700   : > { %4038 = vmatprep.subr.msk.bf16.mxu1 %vm6188_vm1, %v4036_v30 }
 0x707   : > { %4041 = vmatpush3.bf16.xpose.msk.msra.mxu1 %vm6188_vm1, %v4036_v30 }
 0x708   : > { %4044 = vmatprep.subr.msk.bf16.mxu1 %vm6188_vm1, %v4042_v36 }
 0x70f   : > { %4047 = vmatpush3.bf16.xpose.msk.msra.mxu1 %vm6188_vm1, %v4042_v36 }
 0x710   : > { %4050 = vmatprep.subr.msk.bf16.mxu1 %vm6188_vm1, %v4048_v39 }
 0x717   : > { %4053 = vmatpush3.bf16.xpose.msk.msra.mxu1 %vm6188_vm1, %v4048_v39 }
 0x718   : > { %4056 = vmatprep.subr.msk.bf16.mxu1 %vm6188_vm1, %v4054_v48 }
 0x71f   : > { %4059 = vmatpush3.bf16.xpose.msk.msra.mxu1 %vm6188_vm1, %v4054_v48 }
 0x726   : > { %3624 = vmatmul.mubr.msk.f32.vlgmr.msra.gmra.mrb[18].mxu1 %vm1301_vm0, %v6408_v20 }
 0x7b9   : > { %v6460_v58 = vpop.f32.mrb[16].mxu1 }
 0x7ba   : > { %v6462_v50 = vpop.f32.mrb[17].mxu1 }
 0x7f9   : > { %v3625_v22 = vpop.f32.mrb[18].mxu1 }
 0x7fa   : > { %v1691_v45 = vadd.f32 %v3625_v22, %v6346_v46  ;;  %v1685_v59 = vpop.f32.mrb[19].mxu1 }
 0x7fb   : > { %v1686_v56 = vadd.f32 %v6346_v46, %v1685_v59 }
 0x7fc   : > { %1699 = vmax.xlane.f32.xlu0 %v1691_v45 }
 0x7fd   : > { %1697 = vmax.xlane.f32.xlu1 %v1686_v56 }
 0x80e   : > { %4623 = vrot.lane.b32.xlu1 %v6192_v6, %s5433_s22 }
 0x812   : > { %4618 = vrot.lane.b32.xlu0 %v6470_v60, %s5432_s27  ;;  %4633 = vrot.lane.b32.xlu1 %v6215_v24, %s5433_s22 }
 0x816   : > { %4628 = vrot.lane.b32.xlu0 %v6202_v12, %s5433_s22  ;;  %4643 = vrot.lane.b32.xlu1 %v6242_v42, %s5433_s22 }
 0x81a   : > { %4638 = vrot.lane.b32.xlu0 %v6228_v31, %s5433_s22  ;;  %4653 = vrot.lane.b32.xlu1 %v6274_v2, %s5433_s22 }
 0x81e   : > { %4648 = vrot.lane.b32.xlu0 %v6260_v53, %s5433_s22  ;;  %1876 = vrot.lane.b32.xlu1 %v6178_v63, %s5433_s22 }
 0x822   : > { %4658 = vrot.lane.b32.xlu0 %v6292_v16, %s5433_s22  ;;  %4663 = vrot.lane.b32.xlu1 %v6335_v43, %s5433_s22 }
 0x826   : > { %1878 = vrot.lane.b32.xlu0 %v6324_v17, %s5433_s22  ;;  %4678 = vrot.lane.b32.xlu1 %v6341_v44, %s5433_s22 }
 0x82a   : > { %4668 = vrot.lane.b32.xlu0 %v6364_v52, %s5433_s22  ;;  %4688 = vrot.lane.b32.xlu1 %v6350_v27, %s5433_s22 }
 0x82e   : > { %4673 = vrot.lane.b32.xlu0 %v6370_v54, %s5433_s22  ;;  %4693 = vrot.lane.b32.xlu1 %v6354_v51, %s5433_s22 }
 0x832   : > { %4683 = vrot.lane.b32.xlu0 %v6376_v55, %s5433_s22 }
 0x889   : > { %v1700_v20 = vpop.xlane.xlu0 %1699 }
 0x88a   : > { %v6511_v61 = vmax.f32 %v6506_v32, %v1700_v20  ;;  %v1698_v62 = vpop.xlane.xlu1 %1697 }
 0x88b   : > { %v6514_v3 = vmax.f32 %v6508_v35, %v1698_v62 }
 0x88c   : > { %v1704_v9 = vsub.f32 %v6506_v32, %v6511_v61  ;;  %v1710_v10 = vsub.f32 %v1691_v45, %v6511_v61  ;;  %1729 = vst [vmem:[#allocation4 + $0x18] sm:$0xff] %v6511_v61  ;;  %v2338_v61 = vld [vmem:[#allocation4 + $0x38] sm:$0xff] }
 0x88d   : > { %v1703_v11 = vsub.f32 %v6508_v35, %v6514_v3  ;;  %v1709_v15 = vsub.f32 %v1686_v56, %v6514_v3  ;;  %1728 = vst [vmem:[#allocation4 + $0x10] sm:$0xff] %v6514_v3  ;;  %v4619_v19 = vpop.permute.xlu0 %4618  ;;  %v2337_v3 = vld [vmem:[#allocation4 + $0x30] sm:$0xff] }
 0x88e   : > { %v4621_v41 = vunpack.i.h.bf16 %v4619_v19  ;;  %v4620_v49 = vunpack.i.l.bf16 %v4619_v19  ;;  %v4624_v21 = vpop.permute.xlu1 %4623  ;;  %v1713_v25 = vmul.f32 1.442695, %v1710_v10  ;;  %v1707_v5 = vmul.f32 1.442695, %v1704_v9 }
 0x88f   : > { %v1711_v0 = vmul.f32 1.442695, %v1709_v15  ;;  %v4626_v18 = vunpack.i.h.bf16 %v4624_v21  ;;  %v4625_v23 = vunpack.i.l.bf16 %v4624_v21 }
 0x890   : > { %v4088_v28 = vpack.c.bf16 %v4621_v41, %v4620_v49 }
 0x891   : > { %v4092_v29 = vpack.c.bf16 %v4626_v18, %v4625_v23  ;;  %v4629_v30 = vpop.permute.xlu0 %4628  ;;  %4786 = vpow2.f32 %v1711_v0 }
 0x892   : > { %4089 = vmatprep.subr.bf16.mxu0 %v4088_v28  ;;  %v4634_v34 = vpop.permute.xlu1 %4633  ;;  %4788 = vpow2.f32 %v1713_v25  ;;  %v4631_v39 = vunpack.i.h.bf16 %v4629_v30  ;;  %v4630_v57 = vunpack.i.l.bf16 %v4629_v30 }
 0x893   : > { %4091 = vmatpush3.bf16.msra.mxu0 %v4088_v28  ;;  %v4636_v62 = vunpack.i.h.bf16 %v4634_v34  ;;  %v4635_v10 = vunpack.i.l.bf16 %v4634_v34 }
 0x894   : > { %4094 = vmatprep.subr.msk.bf16.mxu0 %vm6188_vm1, %v4092_v29  ;;  %v4098_v59 = vpack.c.bf16 %v4631_v39, %v4630_v57 }
 0x895   : > { %v4639_v33 = vpop.permute.xlu0 %4638  ;;  %v4104_v18 = vpack.c.bf16 %v4636_v62, %v4635_v10 }
 0x896   : > { %v4644_v36 = vpop.permute.xlu1 %4643  ;;  %v4641_v34 = vunpack.i.h.bf16 %v4639_v33  ;;  %v4640_v39 = vunpack.i.l.bf16 %v4639_v33 }
 0x897   : > { %v4646_v33 = vunpack.i.h.bf16 %v4644_v36 }
 0x899   : > { %v6526_v38 = vpop.permute.xlu0 %4648 }
 0x89a   : > { %v6528_v37 = vpop.permute.xlu1 %4653 }
 0x89b   : > { %v6530_v40 = vpop.eup %4786 }
 0x89c   : > { %v6534_v22 = vpop.eup %4788  ;;  %3658 = vmatprep.mubr.f32.mxu0 %v6530_v40 }
 0x89d   : > { %v6532_v48 = vpop.permute.xlu0 %4658  ;;  %3659 = vmatmul.mubr.f32.vlgmr.msra.gmra.mrb[18].mxu0 %v6534_v22 }
 0x89e   : > { %v1877_v45 = vpop.permute.xlu1 %1876  ;;  %4097 = vmatpush3.bf16.xpose.msk.msra.mxu0 %vm6188_vm1, %v4092_v29 }
 0x89f   : > { %3693 = vmatprep.mubr.msk.f32.mxu0 %vm1301_vm0, %v1877_v45  ;;  %4100 = vmatprep.subr.msk.bf16.mxu0 %vm6188_vm1, %v4098_v59 }
 0x8a1   : > { %v6543_v56 = vpop.permute.xlu0 %1878 }
 0x8a2   : > { %v4664_v20 = vpop.permute.xlu1 %4663 }
 0x8a3   : > { %v4666_v15 = vunpack.i.h.bf16 %v4664_v20  ;;  %v4665_v19 = vunpack.i.l.bf16 %v4664_v20 }
 0x8a5   : > { %v4140_v41 = vpack.c.bf16 %v4666_v15, %v4665_v19  ;;  %v4669_v49 = vpop.permute.xlu0 %4668  ;;  %v4110_v15 = vpack.c.bf16 %v4641_v34, %v4640_v39 }
 0x8a6   : > { %v4671_v21 = vunpack.i.h.bf16 %v4669_v49  ;;  %v4670_v0 = vunpack.i.l.bf16 %v4669_v49  ;;  %4103 = vmatpush3.bf16.xpose.msk.msra.mxu0 %vm6188_vm1, %v4098_v59  ;;  %v4679_v25 = vpop.permute.xlu1 %4678  ;;  %v4645_v49 = vunpack.i.l.bf16 %v4644_v36  ;;  %v4651_v36 = vunpack.i.h.bf16 %v6526_v38 }
 0x8a7   : > { %4141 = vmatprep.subr.bf16.mxu1 %v4140_v41  ;;  %4106 = vmatprep.subr.msk.bf16.mxu0 %vm6188_vm1, %v4104_v18  ;;  %v4681_v57 = vunpack.i.h.bf16 %v4679_v25  ;;  %v4680_v45 = vunpack.i.l.bf16 %v4679_v25 }
 0x8a8   : > { %v4144_v23 = vpack.c.bf16 %v4671_v21, %v4670_v0  ;;  %4143 = vmatpush3.bf16.msra.mxu1 %v4140_v41 }
 0x8a9   : > { %v4674_v28 = vpop.permute.xlu0 %4673  ;;  %v4152_v59 = vpack.c.bf16 %v4681_v57, %v4680_v45  ;;  %v4656_v45 = vunpack.i.h.bf16 %v6528_v37 }
 0x8aa   : > { %v4676_v29 = vunpack.i.h.bf16 %v4674_v28  ;;  %v4675_v30 = vunpack.i.l.bf16 %v4674_v28  ;;  %4145 = vmatprep.subr.bf16.mxu1 %v4144_v23  ;;  %v4689_v10 = vpop.permute.xlu1 %4688  ;;  %v4116_v28 = vpack.c.bf16 %v4646_v33, %v4645_v49 }
 0x8ab   : > { %v4691_v21 = vunpack.i.h.bf16 %v4689_v10  ;;  %v4690_v0 = vunpack.i.l.bf16 %v4689_v10  ;;  %v4660_v10 = vunpack.i.l.bf16 %v6532_v48 }
 0x8ac   : > { %v4148_v20 = vpack.c.bf16 %v4676_v29, %v4675_v30  ;;  %4147 = vmatpush3.bf16.msra.mxu1 %v4144_v23 }
 0x8ad   : > { %v4684_v62 = vpop.permute.xlu0 %4683  ;;  %v4160_v29 = vpack.c.bf16 %v4691_v21, %v4690_v0 }
 0x8ae   : > { %4149 = vmatprep.subr.bf16.mxu1 %v4148_v20  ;;  %v4686_v19 = vunpack.i.h.bf16 %v4684_v62  ;;  %v4685_v41 = vunpack.i.l.bf16 %v4684_v62  ;;  %4109 = vmatpush3.bf16.xpose.msk.msra.mxu0 %vm6188_vm1, %v4104_v18  ;;  %v4694_v25 = vpop.permute.xlu1 %4693  ;;  %v4650_v18 = vunpack.i.l.bf16 %v6526_v38  ;;  %v4661_v38 = vunpack.i.h.bf16 %v6532_v48 }
 0x8af   : > { %4112 = vmatprep.subr.msk.bf16.mxu0 %vm6188_vm1, %v4110_v15  ;;  %v4696_v30 = vunpack.i.h.bf16 %v4694_v25  ;;  %v4695_v34 = vunpack.i.l.bf16 %v4694_v25 }
 0x8b0   : > { %4151 = vmatpush3.bf16.msra.mxu1 %v4148_v20  ;;  %v4156_v23 = vpack.c.bf16 %v4686_v19, %v4685_v41  ;;  %v4122_v57 = vpack.c.bf16 %v4651_v36, %v4650_v18  ;;  %v4655_v20 = vunpack.i.l.bf16 %v6528_v37 }
 0x8b1   : > { %4153 = vmatprep.subr.bf16.mxu1 %v4152_v59  ;;  %v4164_v39 = vpack.c.bf16 %v4696_v30, %v4695_v34 }
 0x8b2   : > { %v4128_v62 = vpack.c.bf16 %v4656_v45, %v4655_v20 }
 0x8b4   : > { %4155 = vmatpush3.bf16.msra.mxu1 %v4152_v59 }
 0x8b5   : > { %4157 = vmatprep.subr.bf16.mxu1 %v4156_v23 }
 0x8b6   : > { %4115 = vmatpush3.bf16.xpose.msk.msra.mxu0 %vm6188_vm1, %v4110_v15  ;;  %v4134_v15 = vpack.c.bf16 %v4661_v38, %v4660_v10 }
 0x8b7   : > { %4118 = vmatprep.subr.msk.bf16.mxu0 %vm6188_vm1, %v4116_v28 }
 0x8b8   : > { %4159 = vmatpush3.bf16.msra.mxu1 %v4156_v23 }
 0x8b9   : > { %4161 = vmatprep.subr.bf16.mxu1 %v4160_v29 }
 0x8bc   : > { %4163 = vmatpush3.bf16.msra.mxu1 %v4160_v29 }
 0x8bd   : > { %4165 = vmatprep.subr.bf16.mxu1 %v4164_v39 }
 0x8be   : > { %4121 = vmatpush3.bf16.xpose.msk.msra.mxu0 %vm6188_vm1, %v4116_v28 }
 0x8bf   : > { %4124 = vmatprep.subr.msk.bf16.mxu0 %vm6188_vm1, %v4122_v57 }
 0x8c0   : > { %4167 = vmatpush3.bf16.msra.mxu1 %v4164_v39 }
 0x8c6   : > { %4127 = vmatpush3.bf16.xpose.msk.msra.mxu0 %vm6188_vm1, %v4122_v57 }
 0x8c7   : > { %4130 = vmatprep.subr.msk.bf16.mxu0 %vm6188_vm1, %v4128_v62 }
 0x8ce   : > { %4133 = vmatpush3.bf16.xpose.msk.msra.mxu0 %vm6188_vm1, %v4128_v62 }
 0x8cf   : > { %4136 = vmatprep.subr.msk.bf16.mxu0 %vm6188_vm1, %v4134_v15 }
 0x8d6   : > { %4139 = vmatpush3.bf16.xpose.msk.msra.mxu0 %vm6188_vm1, %v4134_v15 }
 0x8dd   : > { %3694 = vmatmul.mubr.msk.f32.vlgmr.msra.gmra.mrb[20].mxu0 %vm1301_vm0, %v6543_v56 }
 0x970   : > { %v6579_v37 = vpop.f32.mrb[18].mxu0 }
 0x971   : > { %v6581_v59 = vpop.f32.mrb[19].mxu0 }
 0x9b0   : > { %v3695_v19 = vpop.f32.mrb[20].mxu0 }
 0x9b1   : > { %v2020_v48 = vadd.f32 %v3695_v19, %v6346_v46  ;;  %v2014_v41 = vpop.f32.mrb[21].mxu0 }
 0x9b2   : > { %v2015_v33 = vadd.f32 %v6346_v46, %v2014_v41 }
 0x9b3   : > { %2028 = vmax.xlane.f32.xlu0 %v2020_v48 }
 0x9b4   : > { %2026 = vmax.xlane.f32.xlu1 %v2015_v33 }
 0x9c5   : > { %4703 = vrot.lane.b32.xlu1 %v6192_v6, %s5434_s23  ;;  %v6621_v6 = vld [vmem:[#allocation4 + $0x20] sm:$0xff] }
 0x9c9   : > { %4698 = vrot.lane.b32.xlu0 %v6470_v60, %s5433_s22  ;;  %4713 = vrot.lane.b32.xlu1 %v6215_v24, %s5434_s23 }
 0x9cd   : > { %4708 = vrot.lane.b32.xlu0 %v6202_v12, %s5434_s23  ;;  %4723 = vrot.lane.b32.xlu1 %v6242_v42, %s5434_s23 }
 0x9d1   : > { %4718 = vrot.lane.b32.xlu0 %v6228_v31, %s5434_s23  ;;  %4733 = vrot.lane.b32.xlu1 %v6274_v2, %s5434_s23 }
 0x9d5   : > { %4728 = vrot.lane.b32.xlu0 %v6260_v53, %s5434_s23  ;;  %2189 = vrot.lane.b32.xlu1 %v6178_v63, %s5434_s23  ;;  %v6619_v63 = vld [vmem:[#allocation4 + $0x28] sm:$0xff] }
 0x9d9   : > { %4738 = vrot.lane.b32.xlu0 %v6292_v16, %s5434_s23  ;;  %4743 = vrot.lane.b32.xlu1 %v6335_v43, %s5434_s23 }
 0x9dd   : > { %2191 = vrot.lane.b32.xlu0 %v6324_v17, %s5434_s23  ;;  %4753 = vrot.lane.b32.xlu1 %v6370_v54, %s5434_s23 }
 0x9e1   : > { %4748 = vrot.lane.b32.xlu0 %v6364_v52, %s5434_s23  ;;  %4763 = vrot.lane.b32.xlu1 %v6376_v55, %s5434_s23 }
 0x9e5   : > { %4758 = vrot.lane.b32.xlu0 %v6341_v44, %s5434_s23 }
 0x9e9   : > { %4768 = vrot.lane.b32.xlu0 %v6350_v27, %s5434_s23 }
 0xa40   : > { %v2029_v12 = vpop.xlane.xlu0 %2028 }
 0xa41   : > { %v6624_v24 = vmax.f32 %v6619_v63, %v2029_v12  ;;  %v2027_v31 = vpop.xlane.xlu1 %2026 }
 0xa42   : > { %v6627_v42 = vmax.f32 %v6621_v6, %v2027_v31 }
 0xa43   : > { %v2033_v53 = vsub.f32 %v6619_v63, %v6624_v24  ;;  %v2039_v2 = vsub.f32 %v2020_v48, %v6624_v24  ;;  %2058 = vst [vmem:[#allocation4 + $0x28] sm:$0xff] %v6624_v24 }
 0xa44   : > { %v2032_v16 = vsub.f32 %v6621_v6, %v6627_v42  ;;  %v2038_v17 = vsub.f32 %v2015_v33, %v6627_v42  ;;  %2057 = vst [vmem:[#allocation4 + $0x20] sm:$0xff] %v6627_v42  ;;  %v4699_v43 = vpop.permute.xlu0 %4698 }
 0xa45   : > { %v4701_v44 = vunpack.i.h.bf16 %v4699_v43  ;;  %v4700_v27 = vunpack.i.l.bf16 %v4699_v43  ;;  %v4704_v52 = vpop.permute.xlu1 %4703  ;;  %v2042_v49 = vmul.f32 1.442695, %v2039_v2 }
 0xa46   : > { %v2040_v54 = vmul.f32 1.442695, %v2038_v17  ;;  %v4706_v55 = vunpack.i.h.bf16 %v4704_v52  ;;  %v4705_v56 = vunpack.i.l.bf16 %v4704_v52 }
 0xa47   : > { %v4168_v21 = vpack.c.bf16 %v4701_v44, %v4700_v27 }
 0xa48   : > { %v4172_v0 = vpack.c.bf16 %v4706_v55, %v4705_v56  ;;  %v4709_v23 = vpop.permute.xlu0 %4708  ;;  %4790 = vpow2.f32 %v2040_v54 }
 0xa49   : > { %4169 = vmatprep.subr.bf16.mxu1 %v4168_v21  ;;  %v4714_v25 = vpop.permute.xlu1 %4713  ;;  %4792 = vpow2.f32 %v2042_v49  ;;  %v4711_v36 = vunpack.i.h.bf16 %v4709_v23  ;;  %v4710_v18 = vunpack.i.l.bf16 %v4709_v23 }
 0xa4a   : > { %4171 = vmatpush3.bf16.msra.mxu1 %v4168_v21  ;;  %v4716_v15 = vunpack.i.h.bf16 %v4714_v25  ;;  %v4715_v19 = vunpack.i.l.bf16 %v4714_v25  ;;  %4794 = vpow2.f32 %v1707_v5 }
 0xa4b   : > { %4174 = vmatprep.subr.msk.bf16.mxu1 %vm6188_vm1, %v4172_v0  ;;  %v4178_v62 = vpack.c.bf16 %v4711_v36, %v4710_v18 }
 0xa4c   : > { %v4719_v28 = vpop.permute.xlu0 %4718  ;;  %v4184_v43 = vpack.c.bf16 %v4716_v15, %v4715_v19 }
 0xa4d   : > { %v4724_v29 = vpop.permute.xlu1 %4723  ;;  %v4721_v55 = vunpack.i.h.bf16 %v4719_v28  ;;  %v4720_v56 = vunpack.i.l.bf16 %v4719_v28 }
 0xa4e   : > { %v4726_v28 = vunpack.i.h.bf16 %v4724_v29 }
 0xa4f   : > { %v4190_v25 = vpack.c.bf16 %v4721_v55, %v4720_v56 }
 0xa50   : > { %v6639_v30 = vpop.permute.xlu0 %4728 }
 0xa51   : > { %v6641_v34 = vpop.permute.xlu1 %4733 }
 0xa52   : > { %v6643_v39 = vpop.eup %4790 }
 0xa53   : > { %v6647_v45 = vpop.eup %4792  ;;  %3728 = vmatprep.mubr.f32.mxu1 %v6643_v39 }
 0xa54   : > { %v6645_v57 = vpop.permute.xlu0 %4738  ;;  %3729 = vmatmul.mubr.f32.vlgmr.msra.gmra.mrb[20].mxu1 %v6647_v45 }
 0xa55   : > { %v2190_v20 = vpop.permute.xlu1 %2189  ;;  %4177 = vmatpush3.bf16.xpose.msk.msra.mxu1 %vm6188_vm1, %v4172_v0 }
 0xa56   : > { %3763 = vmatprep.mubr.msk.f32.mxu1 %vm1301_vm0, %v2190_v20  ;;  %4180 = vmatprep.subr.msk.bf16.mxu1 %vm6188_vm1, %v4178_v62 }
 0xa58   : > { %v6656_v38 = vpop.permute.xlu0 %2191 }
 0xa59   : > { %v4744_v10 = vpop.permute.xlu1 %4743 }
 0xa5a   : > { %v4746_v48 = vunpack.i.h.bf16 %v4744_v10  ;;  %v4745_v41 = vunpack.i.l.bf16 %v4744_v10 }
 0xa5c   : > { %v4220_v33 = vpack.c.bf16 %v4746_v48, %v4745_v41  ;;  %v4749_v12 = vpop.permute.xlu0 %4748 }
 0xa5d   : > { %v4751_v31 = vunpack.i.h.bf16 %v4749_v12  ;;  %v4750_v2 = vunpack.i.l.bf16 %v4749_v12  ;;  %v4754_v17 = vpop.permute.xlu1 %4753  ;;  %4183 = vmatpush3.bf16.xpose.msk.msra.mxu1 %vm6188_vm1, %v4178_v62  ;;  %v4725_v62 = vunpack.i.l.bf16 %v4724_v29  ;;  %v4731_v12 = vunpack.i.h.bf16 %v6639_v30 }
 0xa5e   : > { %v4756_v44 = vunpack.i.h.bf16 %v4754_v17  ;;  %v4755_v27 = vunpack.i.l.bf16 %v4754_v17  ;;  %4221 = vmatprep.subr.bf16.mxu0 %v4220_v33  ;;  %4186 = vmatprep.subr.msk.bf16.mxu1 %vm6188_vm1, %v4184_v43  ;;  %v4735_v17 = vunpack.i.l.bf16 %v6641_v34 }
 0xa5f   : > { %v4224_v52 = vpack.c.bf16 %v4751_v31, %v4750_v2  ;;  %4223 = vmatpush3.bf16.msra.mxu0 %v4220_v33  ;;  %v4196_v41 = vpack.c.bf16 %v4726_v28, %v4725_v62  ;;  %v4730_v31 = vunpack.i.l.bf16 %v6639_v30  ;;  %v4736_v2 = vunpack.i.h.bf16 %v6641_v34 }
 0xa60   : > { %v4759_v54 = vpop.permute.xlu0 %4758  ;;  %v4228_v49 = vpack.c.bf16 %v4756_v44, %v4755_v27  ;;  %v4741_v30 = vunpack.i.h.bf16 %v6645_v57  ;;  %v4740_v44 = vunpack.i.l.bf16 %v6645_v57  ;;  %v1441_v28 = vmul.f32 1.442695, %v1439_v8  ;;  %v1716_v8 = vld [vmem:[#allocation5 + $0x10] sm:$0xff] }
 0xa61   : > { %4225 = vmatprep.subr.bf16.mxu0 %v4224_v52  ;;  %v4761_v21 = vunpack.i.h.bf16 %v4759_v54  ;;  %v4760_v0 = vunpack.i.l.bf16 %v4759_v54  ;;  %v4764_v23 = vpop.permute.xlu1 %4763  ;;  %v4202_v29 = vpack.c.bf16 %v4731_v12, %v4730_v31  ;;  %v1443_v62 = vmul.f32 1.442695, %v1440_v14 }
 0xa62   : > { %v4766_v18 = vunpack.i.h.bf16 %v4764_v23  ;;  %v4765_v20 = vunpack.i.l.bf16 %v4764_v23  ;;  %v4214_v27 = vpack.c.bf16 %v4741_v30, %v4740_v44  ;;  %v2045_v44 = vld [vmem:[#allocation5 + $0x20] sm:$0xff] }
 0xa63   : > { %4227 = vmatpush3.bf16.msra.mxu0 %v4224_v52  ;;  %v4232_v36 = vpack.c.bf16 %v4761_v21, %v4760_v0 }
 0xa64   : > { %4229 = vmatprep.subr.bf16.mxu0 %v4228_v49  ;;  %v4769_v10 = vpop.permute.xlu0 %4768  ;;  %v4236_v15 = vpack.c.bf16 %v4766_v18, %v4765_v20 }
 0xa65   : > { %4189 = vmatpush3.bf16.xpose.msk.msra.mxu1 %vm6188_vm1, %v4184_v43  ;;  %v4771_v19 = vunpack.i.h.bf16 %v4769_v10  ;;  %v4770_v48 = vunpack.i.l.bf16 %v4769_v10  ;;  %v4208_v43 = vpack.c.bf16 %v4736_v2, %v4735_v17  ;;  %v2046_v17 = vld [vmem:[#allocation5 + $0x28] sm:$0xff] }
 0xa66   : > { %4192 = vmatprep.subr.msk.bf16.mxu1 %vm6188_vm1, %v4190_v25 }
 0xa67   : > { %4231 = vmatpush3.bf16.msra.mxu0 %v4228_v49  ;;  %v4240_v33 = vpack.c.bf16 %v4771_v19, %v4770_v48  ;;  %v1451_v19 = vld [vmem:[#allocation5] sm:$0xff] }
 0xa68   : > { %4233 = vmatprep.subr.bf16.mxu0 %v4232_v36 }
 0xa6b   : > { %4235 = vmatpush3.bf16.msra.mxu0 %v4232_v36 }
 0xa6c   : > { %4237 = vmatprep.subr.bf16.mxu0 %v4236_v15 }
 0xa6d   : > { %4195 = vmatpush3.bf16.xpose.msk.msra.mxu1 %vm6188_vm1, %v4190_v25 }
 0xa6e   : > { %4198 = vmatprep.subr.msk.bf16.mxu1 %vm6188_vm1, %v4196_v41 }
 0xa6f   : > { %4239 = vmatpush3.bf16.msra.mxu0 %v4236_v15 }
 0xa70   : > { %4241 = vmatprep.subr.bf16.mxu0 %v4240_v33 }
 0xa73   : > { %4243 = vmatpush3.bf16.msra.mxu0 %v4240_v33 }
 0xa75   : > { %4201 = vmatpush3.bf16.xpose.msk.msra.mxu1 %vm6188_vm1, %v4196_v41  ;;  %v1452_v41 = vld [vmem:[#allocation5 + $0x8] sm:$0xff] }
 0xa76   : > { %4204 = vmatprep.subr.msk.bf16.mxu1 %vm6188_vm1, %v4202_v29 }
 0xa7d   : > { %4207 = vmatpush3.bf16.xpose.msk.msra.mxu1 %vm6188_vm1, %v4202_v29  ;;  %v1717_v29 = vld [vmem:[#allocation5 + $0x18] sm:$0xff] }
 0xa7e   : > { %4210 = vmatprep.subr.msk.bf16.mxu1 %vm6188_vm1, %v4208_v43 }
 0xa85   : > { %4213 = vmatpush3.bf16.xpose.msk.msra.mxu1 %vm6188_vm1, %v4208_v43 }
 0xa86   : > { %4216 = vmatprep.subr.msk.bf16.mxu1 %vm6188_vm1, %v4214_v27 }
 0xa8d   : > { %4219 = vmatpush3.bf16.xpose.msk.msra.mxu1 %vm6188_vm1, %v4214_v27 }
 0xa94   : > { %3764 = vmatmul.mubr.msk.f32.vlgmr.msra.gmra.mrb[22].mxu1 %vm1301_vm0, %v6656_v38 }
 0xb27   : > { %v3730_v34 = vpop.f32.mrb[20].mxu1 }
 0xb28   : > { %v2173_v52 = vpop.f32.mrb[21].mxu1 }
 0xb67   : > { %v3765_v54 = vpop.f32.mrb[22].mxu1 }
 0xb68   : > { %v2333_v55 = vadd.f32 %v3765_v54, %v6346_v46  ;;  %v2327_v56 = vpop.f32.mrb[23].mxu1 }
 0xb69   : > { %v2328_v57 = vadd.f32 %v6346_v46, %v2327_v56  ;;  %v2034_v46 = vmul.f32 1.442695, %v2032_v16 }
 0xb6a   : > { %2341 = vmax.xlane.f32.xlu1 %v2333_v55 }
 0xb6b   : > { %2339 = vmax.xlane.f32.xlu0 %v2328_v57  ;;  %4796 = vpow2.f32 %v2034_v46 }
 0xb7b   : > { %4773 = vrot.lane.b32.xlu1 %v6354_v51, %s5434_s23  ;;  %v1705_v51 = vmul.f32 1.442695, %v1703_v11 }
 0xb7d   : > { %4798 = vpow2.f32 %v1705_v51 }
 0xb81   : > { %4778 = vrot.lane.b32.xlu0 %v6470_v60, %s5434_s23 }
 0xb9f   : > { %1455 = vadd.xlane.f32.xlu1 %v6410_v26  ;;  %v2036_v26 = vmul.f32 1.442695, %v2033_v53 }
 0xba0   : > { %1457 = vadd.xlane.f32.xlu0 %v6413_v47  ;;  %v6716_v47 = vpop.eup %4794 }
 0xba1   : > { %4800 = vpow2.f32 %v2036_v26  ;;  %v6720_v60 = vpop.eup %4796  ;;  %v1719_v7 = vmul.f32 %v6716_v47, %v1717_v29  ;;  %v2631_v29 = vld [vmem:[#allocation27 + $0x8] sm:$0xff] (!%p3120_p0) }
 0xba2   : > { %v6724_v32 = vpop.eup %4798  ;;  %v2047_v54 = vmul.f32 %v6720_v60, %v2045_v44  ;;  %v2637_v44 = vld [vmem:[#allocation27 + $0x38] sm:$0xff] (!%p3120_p0) }
 0xba3   : > { %1722 = vadd.xlane.f32.xlu1 %v6534_v22  ;;  %v1718_v14 = vmul.f32 %v6724_v32, %v1716_v8  ;;  %v2633_v8 = vld [vmem:[#allocation27 + $0x18] sm:$0xff] (!%p3120_p0) }
 0xba4   : > { %1720 = vadd.xlane.f32.xlu0 %v6530_v40 }
 0xba7   : > { %2051 = vadd.xlane.f32.xlu1 %v6647_v45 }
 0xba8   : > { %2049 = vadd.xlane.f32.xlu0 %v6643_v39 }
 0xbab   : > { %v6730_v35 = vpop.eup %4800 }
 0xbb8   : > { %2499 = vrot.lane.b32.xlu1 %v6716_v47, %s5434_s23 }
 0xbbc   : > { %2505 = vrot.lane.b32.xlu1 %v6720_v60, %s5433_s22 }
 0xbbe   : > { %2497 = vrot.lane.b32.xlu0 %v6724_v32, %s5434_s23 }
 0xbc0   : > { %2533 = vrot.lane.b32.xlu1 %v6581_v59, %s5434_s23 }
 0xbc2   : > { %2507 = vrot.lane.b32.xlu0 %v6730_v35, %s5433_s22 }
 0xbc4   : > { %2541 = vrot.lane.b32.xlu1 %v2173_v52, %s5433_s22 }
 0xbc6   : > { %2535 = vrot.lane.b32.xlu0 %v6579_v37, %s5434_s23 }
 0xbca   : > { %2543 = vrot.lane.b32.xlu0 %v3730_v34, %s5433_s22  ;;  %v2048_v34 = vmul.f32 %v6730_v35, %v2046_v17 }
 0xbf7   : > { %v2342_v9 = vpop.xlane.xlu1 %2341 }
 0xbf8   : > { %v2344_v11 = vmax.f32 %v2338_v61, %v2342_v9  ;;  %v2340_v40 = vpop.xlane.xlu0 %2339 }
 0xbf9   : > { %v2343_v22 = vmax.f32 %v2337_v3, %v2340_v40 }
 0xbfa   : > { %v2346_v63 = vsub.f32 %v2338_v61, %v2344_v11  ;;  %v2352_v59 = vsub.f32 %v2333_v55, %v2344_v11  ;;  %2371 = vst [vmem:[#allocation4 + $0x38] sm:$0xff] %v2344_v11 }
 0xbfb   : > { %v2351_v6 = vsub.f32 %v2328_v57, %v2343_v22  ;;  %2370 = vst [vmem:[#allocation4 + $0x30] sm:$0xff] %v2343_v22  ;;  %v4774_v24 = vpop.permute.xlu1 %4773  ;;  %v2345_v25 = vsub.f32 %v2337_v3, %v2343_v22 }
 0xbfc   : > { %v2349_v42 = vmul.f32 1.442695, %v2346_v63  ;;  %v2355_v53 = vmul.f32 1.442695, %v2352_v59  ;;  %v4776_v16 = vunpack.i.h.bf16 %v4774_v24  ;;  %v4775_v39 = vunpack.i.l.bf16 %v4774_v24  ;;  %v4779_v45 = vpop.permute.xlu0 %4778  ;;  %v2359_v24 = vld [vmem:[#allocation5 + $0x38] sm:$0xff] }
 0xbfd   : > { %v2353_v37 = vmul.f32 1.442695, %v2351_v6  ;;  %v4781_v38 = vunpack.i.h.bf16 %v4779_v45  ;;  %v4780_v49 = vunpack.i.l.bf16 %v4779_v45  ;;  %v2347_v20 = vmul.f32 1.442695, %v2345_v25 }
 0xbfe   : > { %4802 = vpow2.f32 %v2349_v42  ;;  %v4244_v21 = vpack.c.bf16 %v4776_v16, %v4775_v39  ;;  %v2358_v39 = vld [vmem:[#allocation5 + $0x30] sm:$0xff] }
 0xbff   : > { %4804 = vpow2.f32 %v2355_v53  ;;  %v4248_v0 = vpack.c.bf16 %v4781_v38, %v4780_v49 }
 0xc00   : > { %4245 = vmatprep.subr.bf16.mxu0 %v4244_v21  ;;  %4806 = vpow2.f32 %v2353_v37 }
 0xc01   : > { %4247 = vmatpush3.bf16.msra.mxu0 %v4244_v21  ;;  %4808 = vpow2.f32 %v2347_v20  ;;  %v2528_v21 = vld [vmem:[#allocation6 + $0x8] sm:$0xff] }
 0xc02   : > { %4249 = vmatprep.subr.bf16.mxu0 %v4248_v0  ;;  %4810 = vpow2.f32 %v1441_v28 }
 0xc03   : > { %4812 = vpow2.f32 %v1443_v62 }
 0xc05   : > { %4251 = vmatpush3.bf16.msra.mxu0 %v4248_v0  ;;  %v2527_v0 = vld [vmem:[#allocation6] sm:$0xff] }
 0xc08   : > { %v6738_v23 = vpop.eup %4802 }
 0xc09   : > { %v4805_v36 = vpop.eup %4804  ;;  %2515 = vrot.lane.b32.xlu0 %v6738_v23, %s5432_s27  ;;  %v2361_v42 = vmul.f32 %v6738_v23, %v2359_v24 }
 0xc0a   : > { %2364 = vadd.xlane.f32.xlu1 %v4805_v36  ;;  %v4807_v18 = vpop.eup %4806 }
 0xc0b   : > { %3798 = vmatprep.mubr.f32.mxu0 %v4807_v18  ;;  %v6742_v10 = vpop.eup %4808 }
 0xc0c   : > { %3799 = vmatmul.mubr.f32.vlgmr.msra.gmra.mrb[22].mxu0 %v4805_v36  ;;  %v4811_v15 = vpop.eup %4810 }
 0xc0d   : > { %v4813_v48 = vpop.eup %4812  ;;  %v1453_v33 = vmul.f32 %v4811_v15, %v1451_v19 }
 0xc0e   : > { %v1454_v31 = vmul.f32 %v4813_v48, %v1452_v41 }
 0xc1b   : > { %2513 = vrot.lane.b32.xlu1 %v6742_v10, %s5432_s27 }
 0xc28   : > { %2362 = vadd.xlane.f32.xlu0 %v4807_v18 }
 0xc2c   : > { %v1456_v12 = vpop.xlane.xlu1 %1455 }
 0xc2d   : > { %v1459_v1 = vadd.f32 %v1456_v12, %v1453_v33  ;;  %v1458_v4 = vpop.xlane.xlu0 %1457 }
 0xc2e   : > { %v1460_v2 = vadd.f32 %v1458_v4, %v1454_v31  ;;  %v2630_v31 = vld [vmem:[#allocation27] sm:$0xff] (!%p3120_p0) }
 0xc2f   : > { %1461 = vst [vmem:[#allocation5] sm:$0xff] %v1459_v1  ;;  %v2632_v1 = vld [vmem:[#allocation27 + $0x10] sm:$0xff] (!%p3120_p0)  ;;  %v4252_v4 = vpack.c.bf16 (!%p3120_p0), %v2631_v29, %v2630_v31 }
 0xc30   : > { %1462 = vst [vmem:[#allocation5 + $0x8] sm:$0xff] %v1460_v2  ;;  %v1723_v13 = vpop.xlane.xlu1 %1722 }
 0xc31   : > { %v1725_v43 = vadd.f32 %v1723_v13, %v1719_v7  ;;  %v1721_v30 = vpop.xlane.xlu0 %1720  ;;  %v4256_v7 = vpack.c.bf16 (!%p3120_p0), %v2633_v8, %v2632_v1  ;;  %v2634_v13 = vld [vmem:[#allocation27 + $0x20] sm:$0xff] (!%p3120_p0)  ;;  %4253 = vmatprep.subr.bf16.mxu0 (!%p3120_p0), %v4252_v4 }
 0xc32   : > { %v1724_v27 = vadd.f32 %v1721_v30, %v1718_v14  ;;  %v2635_v14 = vld [vmem:[#allocation27 + $0x28] sm:$0xff] (!%p3120_p0)  ;;  %4255 = vmatpush3.bf16.msra.mxu0 (!%p3120_p0), %v4252_v4  ;;  %v2636_v30 = vld [vmem:[#allocation27 + $0x30] sm:$0xff] (!%p3120_p0) }
 0xc33   : > { %1727 = vst [vmem:[#allocation5 + $0x18] sm:$0xff] %v1725_v43  ;;  %4257 = vmatprep.subr.bf16.mxu0 (!%p3120_p0), %v4256_v7  ;;  %v4260_v43 = vpack.c.bf16 (!%p3120_p0), %v2635_v14, %v2634_v13 }
 0xc34   : > { %1726 = vst [vmem:[#allocation5 + $0x10] sm:$0xff] %v1724_v27  ;;  %v2052_v52 = vpop.xlane.xlu1 %2051 }
 0xc35   : > { %v2054_v55 = vadd.f32 %v2052_v52, %v2048_v34  ;;  %v2050_v56 = vpop.xlane.xlu0 %2049  ;;  %v4264_v34 = vpack.c.bf16 (!%p3120_p0), %v2637_v44, %v2636_v30 }
 0xc36   : > { %v2053_v57 = vadd.f32 %v2050_v56, %v2047_v54  ;;  %4259 = vmatpush3.bf16.msra.mxu0 (!%p3120_p0), %v4256_v7  ;;  %v2638_v54 = vld [vmem:[#allocation27 + $0x40] sm:$0xff] (!%p3120_p0) }
 0xc37   : > { %2056 = vst [vmem:[#allocation5 + $0x28] sm:$0xff] %v2054_v55  ;;  %4261 = vmatprep.subr.bf16.mxu0 (!%p3120_p0), %v4260_v43  ;;  %v2639_v55 = vld [vmem:[#allocation27 + $0x48] sm:$0xff] (!%p3120_p0) }
 0xc38   : > { %2055 = vst [vmem:[#allocation5 + $0x20] sm:$0xff] %v2053_v57  ;;  %v2500_v5 = vpop.permute.xlu1 %2499 }
 0xc39   : > { %v2498_v46 = vpop.permute.xlu0 %2497  ;;  %v2520_v47 = vsel %vm1301_vm0, %v4813_v48, %v2500_v5  ;;  %v4268_v5 = vpack.c.bf16 (!%p3120_p0), %v2639_v55, %v2638_v54 }
 0xc3a   : > { %v2519_v51 = vsel %vm1301_vm0, %v4811_v15, %v2498_v46  ;;  %v2574_v12 = vld [vmem:[#allocation5 + $0x18] sm:$0xff] (!%p3120_p0)  ;;  %4263 = vmatpush3.bf16.msra.mxu0 (!%p3120_p0), %v4260_v43  ;;  %v2640_v46 = vld [vmem:[#allocation27 + $0x50] sm:$0xff] (!%p3120_p0) }
 0xc3b   : > { %v2573_v41 = vld [vmem:[#allocation5 + $0x10] sm:$0xff] (!%p3120_p0)  ;;  %4265 = vmatprep.subr.bf16.mxu0 (!%p3120_p0), %v4264_v34 }
 0xc3c   : > { %v2506_v26 = vpop.permute.xlu1 %2505 }
 0xc3d   : > { %v2522_v32 = vsel %vm2521_vm2, %v2519_v51, %v2506_v26  ;;  %v2508_v35 = vpop.permute.xlu0 %2507  ;;  %v2641_v51 = vld [vmem:[#allocation27 + $0x58] sm:$0xff] (!%p3120_p0) }
 0xc3e   : > { %v2523_v61 = vsel %vm2521_vm2, %v2520_v47, %v2508_v35  ;;  %v2578_v33 = vld [vmem:[#allocation5 + $0x28] sm:$0xff] (!%p3120_p0)  ;;  %4267 = vmatpush3.bf16.msra.mxu0 (!%p3120_p0), %v4264_v34  ;;  %v2642_v35 = vld [vmem:[#allocation27 + $0x60] sm:$0xff] (!%p3120_p0) }
 0xc3f   : > { %v2577_v48 = vld [vmem:[#allocation5 + $0x20] sm:$0xff] (!%p3120_p0)  ;;  %4269 = vmatprep.subr.bf16.mxu0 (!%p3120_p0), %v4268_v5 }
 0xc40   : > { %v2534_v3 = vpop.permute.xlu1 %2533  ;;  %4814 = vrcp.f32 (!%p3120_p0), %v2577_v48 }
 0xc41   : > { %v2555_v60 = vsel %vm1301_vm0, %v6462_v50, %v2534_v3  ;;  %v2536_v9 = vpop.permute.xlu0 %2535  ;;  %v2360_v50 = vmul.f32 %v6742_v10, %v2358_v39  ;;  %4816 = vrcp.f32 (!%p3120_p0), %v2573_v41 }
 0xc42   : > { %v2556_v11 = vsel %vm1301_vm0, %v6460_v58, %v2536_v9  ;;  %4818 = vrcp.f32 (!%p3120_p0), %v2578_v33  ;;  %4271 = vmatpush3.bf16.msra.mxu0 (!%p3120_p0), %v4268_v5  ;;  %v2645_v9 = vld [vmem:[#allocation27 + $0x78] sm:$0xff] (!%p3120_p0) }
 0xc43   : > { %4820 = vrcp.f32 (!%p3120_p0), %v2574_v12 }
 0xc44   : > { %v2542_v6 = vpop.permute.xlu1 %2541 }
 0xc45   : > { %v2544_v40 = vpop.permute.xlu0 %2543  ;;  %v2557_v18 = vsel %vm2521_vm2, %v2555_v60, %v2542_v6  ;;  %v2644_v60 = vld [vmem:[#allocation27 + $0x70] sm:$0xff] (!%p3120_p0) }
 0xc46   : > { %v2558_v22 = vsel %vm2521_vm2, %v2556_v11, %v2544_v40  ;;  %v4280_v11 = vpack.c.bf16 (!%p3120_p0), %v2645_v9, %v2644_v60  ;;  %v2569_v40 = vld [vmem:[#allocation5] sm:$0xff] (!%p3120_p0) }
 0xc4a   : > { %v4815_v27 = vpop.eup (!%p3120_p0), %4814 }
 0xc4b   : > { %v4817_v52 = vpop.eup (!%p3120_p0), %4816 }
 0xc4c   : > { %v4819_v56 = vpop.eup (!%p3120_p0), %4818 }
 0xc4d   : > { %v4821_v57 = vpop.eup (!%p3120_p0), %4820 }
 0xc7b   : > { %v2516_v63 = vpop.permute.xlu0 %2515 }
 0xc7c   : > { %v2526_v59 = vsel %vm2524_vm3, %v2523_v61, %v2516_v63  ;;  %v2643_v61 = vld [vmem:[#allocation27 + $0x68] sm:$0xff] (!%p3120_p0) }
 0xc7d   : > { %v2530_v25 = vmul.f32 %v2528_v21, %v2526_v59  ;;  %v4276_v3 = vpack.c.bf16 (!%p3120_p0), %v2643_v61, %v2642_v35 }
 0xc97   : > { %v2365_v53 = vpop.xlane.xlu1 %2364 }
 0xc98   : > { %v2367_v16 = vadd.f32 %v2365_v53, %v2361_v42 }
 0xc9a   : > { %2369 = vst [vmem:[#allocation5 + $0x38] sm:$0xff] %v2367_v16 }
 0xc9b   : > { %v2514_v49 = vpop.permute.xlu1 %2513 }
 0xc9c   : > { %v2525_v23 = vsel %vm2524_vm3, %v2522_v32, %v2514_v49  ;;  %v4272_v32 = vpack.c.bf16 (!%p3120_p0), %v2641_v51, %v2640_v46 }
 0xc9d   : > { %v2529_v20 = vmul.f32 %v2527_v0, %v2525_v23 }
 0xc9e   : > { %4273 = vmatprep.subr.bf16.mxu0 (!%p3120_p0), %v4272_v32 }
 0xc9f   : > { %4275 = vmatpush3.bf16.msra.mxu0 (!%p3120_p0), %v4272_v32 }
 0xca0   : > { %4277 = vmatprep.subr.bf16.mxu0 (!%p3120_p0), %v4276_v3 }
 0xca1   : > { %v2582_v2 = vld [vmem:[#allocation5 + $0x38] sm:$0xff] (!%p3120_p0) }
 0xca2   : > { %4822 = vrcp.f32 (!%p3120_p0), %v2582_v2 }
 0xca3   : > { %4279 = vmatpush3.bf16.msra.mxu0 (!%p3120_p0), %v4276_v3 }
 0xca4   : > { %4281 = vmatprep.subr.bf16.mxu0 (!%p3120_p0), %v4280_v11 }
 0xca7   : > { %4283 = vmatpush3.bf16.msra.mxu0 (!%p3120_p0), %v4280_v11 }
 0xcac   : > { %v4823_v26 = vpop.eup (!%p3120_p0), %4822 }
 0xcb5   : > { %v2363_v45 = vpop.xlane.xlu0 %2362 }
 0xcb6   : > { %v2366_v37 = vadd.f32 %v2363_v45, %v2360_v50 }
 0xcb8   : > { %2368 = vst [vmem:[#allocation5 + $0x30] sm:$0xff] %v2366_v37 }
 0xcbf   : > { %v2581_v17 = vld [vmem:[#allocation5 + $0x30] sm:$0xff] (!%p3120_p0) }
 0xcc0   : > { %4824 = vrcp.f32 (!%p3120_p0), %v2581_v17 }
 0xcc1   : > { %4826 = vrcp.f32 (!%p3120_p0), %v2569_v40 }
 0xcca   : > { %v4825_v47 = vpop.eup (!%p3120_p0), %4824 }
 0xccb   : > { %v4827_v6 = vpop.eup (!%p3120_p0), %4826 }
 0xcdf   : > { %v3800_v58 = vpop.f32.mrb[22].mxu0 }
 0xce0   : > { %2551 = vrot.lane.b32.xlu0 %v3800_v58, %s5432_s27  ;;  %v2486_v38 = vpop.f32.mrb[23].mxu0 }
 0xce1   : > { %2549 = vrot.lane.b32.xlu1 %v2486_v38, %s5432_s27 }
 0xce4   : > { %2587 = vrot.lane.b32.xlu0 (!%p3120_p0), %v4817_v52, %s5436_s7 }
 0xce5   : > { %2595 = vrot.lane.b32.xlu1 (!%p3120_p0), %v4815_v27, %s5435_s0 }
 0xce8   : > { %2589 = vrot.lane.b32.xlu0 (!%p3120_p0), %v4821_v57, %s5436_s7 }
 0xce9   : > { %2597 = vrot.lane.b32.xlu1 (!%p3120_p0), %v4819_v56, %s5435_s0 }
 0xcec   : > { %2603 = vrot.lane.b32.xlu0 (!%p3120_p0), %v4825_v47, %s5437_s24 }
 0xced   : > { %2605 = vrot.lane.b32.xlu1 (!%p3120_p0), %v4823_v26, %s5437_s24 }
 0xd51   : > { %2568 = sbr.rel (%p3120_p0) target bundleno = 3644 (0xe3c), region = 140 }
 0xd52   : > { %v2552_v36 = vpop.permute.xlu0 %2551 }
 0xd53   : > { %v2560_v10 = vsel %vm2524_vm3, %v2558_v22, %v2552_v36  ;;  %v2550_v28 = vpop.permute.xlu1 %2549  ;;  %v2570_v22 = vld [vmem:[#allocation5 + $0x8] sm:$0xff] (!%p3120_p0) }
 0xd54   : > { %v2562_v62 = vadd.f32 %v2560_v10, %v2530_v25  ;;  %v2559_v15 = vsel %vm2524_vm3, %v2557_v18, %v2550_v28  ;;  %4828 = vrcp.f32 (!%p3120_p0), %v2570_v22  ;;  %v2620_v36 = vld [vmem:[#allocation2 + $0x8] sm:$0xff] (!%p3120_p0)  ;;  %v3121_v18 = vld [vmem:[#allocation28] ss:$0 sm:$0xff] (!%p3120_p0) }
 0xd55   : > { %v2561_v19 = vadd.f32 %v2559_v15, %v2529_v20  ;;  %v2619_v20 = vld [vmem:[#allocation2] sm:$0xff] (!%p3120_p0)  ;;  %v2629_v10 = vadd.f32 (!%p3120_p0), %v3121_v18, %v2620_v36 }
 0xd56   : > { %2564 = vst [vmem:[#allocation6 + $0x8] sm:$0xff] %v2562_v62  ;;  %v2588_v59 = vpop.permute.xlu0 (!%p3120_p0), %2587  ;;  %v2628_v28 = vadd.f32 (!%p3120_p0), %v3121_v18, %v2619_v20 }
 0xd57   : > { %2563 = vst [vmem:[#allocation6] sm:$0xff] %v2561_v19  ;;  %v2596_v63 = vpop.permute.xlu1 (!%p3120_p0), %2595  ;;  %v2609_v16 = vsel (!%p3120_p0), %vm1301_vm0, %v4827_v6, %v2588_v59 }
 0xd58   : > { %v2611_v21 = vsel %vm2521_vm2, %v2609_v16, %v2596_v63 }
 0xd5a   : > { %v2590_v53 = vpop.permute.xlu0 %2589 }
 0xd5b   : > { %v2598_v42 = vpop.permute.xlu1 %2597 }
 0xd5d   : > { %v2616_v50 = vld [vmem:[#allocation6 + $0x8] sm:$0xff] }
 0xd5e   : > { %v4829_v24 = vpop.eup %4828  ;;  %v2615_v58 = vld [vmem:[#allocation6] sm:$0xff]  ;;  %v2604_v49 = vpop.permute.xlu0 %2603 }
 0xd5f   : > { %v2610_v39 = vsel %vm1301_vm0, %v4829_v24, %v2590_v53  ;;  %v2606_v45 = vpop.permute.xlu1 %2605  ;;  %v2613_v23 = vsel %vm2524_vm3, %v2611_v21, %v2604_v49 }
 0xd60   : > { %v2612_v37 = vsel %vm2521_vm2, %v2610_v39, %v2598_v42  ;;  %v2617_v25 = vmul.f32 %v2615_v58, %v2613_v23 }
 0xd61   : > { %v2614_v38 = vsel %vm2524_vm3, %v2612_v37, %v2606_v45 }
 0xd62   : > { %v2618_v0 = vmul.f32 %v2616_v50, %v2614_v38  ;;  %3833 = vmatprep.mubr.f32.mxu0 %v2617_v25 }
 0xd64   : > { %3834 = vmatmul.mubr.f32.vlgmr.msra.gmra.mrb[0].mxu0 %v2618_v0 }
 0xe37   : > { %v3835_v62 = vpop.f32.mrb[0].mxu0 }
 0xe38   : > { %v2722_v15 = vadd.f32 %v3835_v62, %v2629_v10  ;;  %v2712_v19 = vpop.f32.mrb[1].mxu0 }
 0xe39   : > { %v2721_v48 = vadd.f32 %v2712_v19, %v2628_v28 }
 0xe3a   : > { %2724 = vst [vmem:[%s6151_s16 + $0x8] sm:$0xff] %v2722_v15 }
 0xe3b   : > { %2723 = vst [vmem:[%s6151_s16] sm:$0xff] %v2721_v48 }
 0xe3c PF: > { %s7020_s14 = sld [smem:[#allocation50_spill]]  ;;  %s7021_s13 = sld [smem:[#allocation53_spill]] }
 0xe3d   : > { %s7022_s8 = sld [smem:[#allocation69_spill]]  ;;  %s2741_s9 = sshll.u32 %s6151_s16, 4  ;;  %s6790_s9 = int_to_ptr.vmem [resolvable:$true] %s2741_s9 }
 0xe3e   : > { %s2726_s17 = scalar_lea.sflag [#allocation9], %s6095_s6  ;;  %s5230_s4 = scalar_lea.vmem %s6790_s9, 256 }
 0xe3f   : > { %p5231_p6 = scmp.ne.s32.totalorder %s6790_s9, %s5230_s4  ;;  %s5438_s19 = smov [#allocation30]  }
 0xe40   : > { %s5234_s29 = sshll.u32 %s5438_s19, 4  ;;  %s5235_s29 = int_to_ptr.vmem [resolvable:$false] %s5234_s29 }
 0xe41   : > { %s5236_s27 = scalar_lea.vmem %s5235_s29, 512  ;;  %p5237_p4 = scmp.lt.s32.totalorder %s6790_s9, %s5235_s29 }
 0xe42   : > { %s3129_s3 = sshll.u32 %s7020_s14, 8  ;;  %p7023_p10 = scmp.ne.s32.totalorder %s7021_s13, 0 }
 0xe43   : > { %s6787_s10 = scalar_lea.hbm %s7022_s8, %s3129_s3  ;;  %p5238_p13 = scmp.lt.s32.totalorder %s5236_s27, %s5230_s4 }
 0xe44   : > { %p5232_p7 = pnand %p5231_p6, %p7023_p10 }
 0xe45   : > { %p5239_p2 = por %p5238_p13, %p5237_p4 }
 0xe46   : > { %p5233_p11 = pneg %p5232_p7 }
 0xe48   : > { %p5240_p5 = pnand %p5239_p2, %p5233_p11 }
 0xe4a   : > { %5243 = shalt.err (!%p5240_p5)
}
 0xe4b   : > { %s5244_s16 = scalar_lea.hbm %s6787_s10, 256  ;;  %s5248_s30 = scalar_lea.hbm %s7022_s8, 512 }
 0xe4c   : > { %p5245_p8 = scmp.ne.s32.totalorder %s6787_s10, %s5244_s16  ;;  %p5249_p1 = scmp.lt.u32.totalorder %s6787_s10, %s7022_s8 }
 0xe4d   : > { %p5250_p12 = scmp.lt.u32.totalorder %s5248_s30, %s5244_s16  ;;  %p5252_p6 = scmp.lt.u32.totalorder %s5244_s16, %s6787_s10 }
 0xe4e   : > { %p5246_p9 = pnand %p5245_p8, %p7023_p10 }
 0xe4f   : > { %p5251_p0 = por %p5250_p12, %p5249_p1 }
 0xe50   : > { %p5247_p3 = pneg %p5246_p9 }
 0xe51   : > { %p5253_p7 = por %p5252_p6, %p5251_p0 }
 0xe53   : > { %p5254_p11 = pnand %p5253_p7, %p5247_p3 }
 0xe55   : > { %5257 = shalt.err (!%p5254_p11)
}
 0xe56   : > { %s5439_s24 = smov 128   ;;  %s5440_s14 = smov 8  }
 0xe57   : > { %4332 = dma.vmem_to_hbm [thread:$0]  (%p7023_p10), %s6790_s9, 256, %s6787_s10, %s2726_s17, %s5439_s24, %s5439_s24, %s5440_s14  }
 0xe58 PF: > { %s7024_s3 = sld [smem:[#allocation48_spill]]  ;;  %s7025_s2 = sld [smem:[#allocation54_spill]] }
 0xe59   : > { %p4403_p4 = scmp.ge.s32.totalorder %s5412_s26, 2 }
 0xe5e   : > { %s2756_s5 = sand.u32 1, %s7024_s3   ;;  %p7026_p13 = scmp.ne.s32.totalorder %s7025_s2, 0 }
 0xe5f   : > { %s2757_s4 = scalar_lea.sflag [#allocation9], %s2756_s5 }
 0xe60   : > { %p4379_p2 = pnand %p4403_p4, %p7026_p13 }
 0xe62   : > { %5355 = dma.done.wait (!%p4379_p2), %s2757_s4, 256  }
 0xe63   : > { %5357 = vsyncadd (!%p4379_p2), %s2757_s4, 4294967040  ;;  %s41_s26 = sadd.s32 1, %s5412_s26   ;;  %s7028_s29 = sld [smem:[#allocation43_spill]] }
 0xe64   : > { %p6821_p5 = scmp.ge.s32.totalorder %s41_s26, 6   ;;  %s7029_s30 = sld [smem:[#allocation44_spill]] }
 0xe65   : > { %s7030_s16 = sld [smem:[#allocation46_spill]]  ;;  %s7031_s17 = sld [smem:[#allocation47_spill]] }
 0xe66   : > { %s7032_s22 = sld [smem:[#allocation51_spill]]  ;;  %s7033_s6 = smov %s7044_s15 }
 0xe67   : > { %s7035_s15 = smov %s6035_s18  ;;  %s7036_s18 = smov %s7050_s28 }
 0xe68   : > { %s7037_s19 = smov %s5388_s20  ;;  %s7038_s20 = smov %s5392_s21 }
 0xe69   : > { %s7039_s21 = smov %s5980_s11  ;;  %s7040_s23 = smov %s5408_s25 }
 0xe6a   : > { %s7041_s24 = smov %s7033_s6  ;;  %s7042_s25 = smov %s7048_s1 }
 0xe6b   :  { %40 = sbr.rel (!%p6821_p5) target bundleno = 35 (0x23), region = 212 }
 0xe72   :  { %2762 = vsyncpa [#allocation8], 1 }
 0xe73   :  { %2764 = vsyncpa [#allocation8 + $0x1], 1 }
 0xe74   :  { %2765 = vsyncpa [#allocation11], 1 }
 0xe75   :  { %2767 = vsyncpa [#allocation11 + $0x1], 1 }
 0xe76   :  { %2768 = vsyncpa [#allocation14], 1 }
 0xe77   :  { %2770 = vsyncpa [#allocation14 + $0x1], 1 }
 0xe78   :  { %2771 = vsyncpa [#allocation17], 1 }
 0xe79   :  { %2772 = vsyncpa [#allocation20], 1 }
 0xe7a   :  { %2773 = vsyncpa [#allocation23], 1 }
 0xe7b   :  { %2774 = vsyncpa [#allocation26], 1 }
 0xe7c   :  { %2775 = vsyncpa [#allocation29], 1 }
 0xe7d   :  { %2776 = vsyncpa [#allocation9], 1 }
 0xe7e   :  { %2778 = vsyncpa [#allocation9 + $0x1], 1 }

</bundles_post_ra>
